<compile_context>
chip_gen: v6e
topology: v6e:2x2x1
jax: 0.10.0
libtpu: 0.0.40
codegen_flags: <defaults>
</compile_context>

<pallas_src>
import jax
import jax.numpy as jnp
import numpy as np
from jax import lax
from jax.experimental import pallas as pl
from jax.experimental.pallas import tpu as pltpu

N_SPLINE = 4      # cubic (order-4) B-spline, i.e. SplineEstimator3D(N=4)
LANES = 128       # residual index runs over (sublane-row, lane)
CHUNK = 8         # sublane rows per inner compute step (one vreg row-group)

# feature-plane offsets along axis 0 of the packed (NUM_FEATS, M/128, 128) input slab
_U      = 0    # 4  : [u_so3_ref, u_r3_ref, u_so3_obs, u_r3_obs]
_R3_REF = 4    # 12 : 4 R3 knots (x,y,z), reference-view window
_R3_OBS = 16   # 12
_R0_REF = 28   # 9  : first SO3 knot rotation, row-major
_R0_OBS = 37   # 9
_DL_REF = 46   # 9  : 3 relative-rotation logs  log(R_{j-1}^T R_j)
_DL_OBS = 55   # 9
_BEAR   = 64   # 3  : R_ic @ reference_bearing   (extrinsic rotation folded host-side)
_IDEPTH = 67   # 1
_OBS    = 68   # 2  : observed pixel
NUM_FEATS = 70


# ---------------------------------------------------------------------------
# in-kernel helpers (operate on (CHUNK, 128) lane-dense slabs)
# ---------------------------------------------------------------------------
def _bspline_coeffs(u):
    # regular uniform cubic B-spline blending:  c = [1 u u^2 u^3] @ M_blend
    u2 = u * u
    u3 = u2 * u
    c0 = (1.0 - 3.0 * u + 3.0 * u2 - u3) * (1.0 / 6.0)
    c1 = (4.0 - 6.0 * u2 + 3.0 * u3) * (1.0 / 6.0)
    c2 = (1.0 + 3.0 * u + 3.0 * u2 - 3.0 * u3) * (1.0 / 6.0)
    c3 = u3 * (1.0 / 6.0)
    return (c0, c1, c2, c3)


def _cum_bspline_coeffs(u):
    # cumulative blending lambdas (lambda_0 == 1 is implicit on the first knot)
    u2 = u * u
    u3 = u2 * u
    l1 = (5.0 + 3.0 * u - 3.0 * u2 + u3) * (1.0 / 6.0)
    l2 = (1.0 + 3.0 * u + 3.0 * u2 - 2.0 * u3) * (1.0 / 6.0)
    l3 = u3 * (1.0 / 6.0)
    return (l1, l2, l3)


def _rot_ab(wx, wy, wz):
    # Rodrigues a = sin|w|/|w|, b = (1-cos|w|)/|w|^2 with a small-angle series fallback;
    # one rsqrt (EUP) instead of sqrt + divides — the kernel is VALU-slot bound.
    t2 = wx * wx + wy * wy + wz * wz
    small = t2 < 1e-12
    safe = jnp.where(small, 1.0, t2)
    inv_t = lax.rsqrt(safe)
    t = safe * inv_t
    a = jnp.where(small, 1.0 - t2 * (1.0 / 6.0), jnp.sin(t) * inv_t)
    b = jnp.where(small, 0.5 - t2 * (1.0 / 24.0), (1.0 - jnp.cos(t)) * (inv_t * inv_t))
    return a, b


def _rot_apply(wx, wy, wz, v, inverse=False):
    # matrix-free exp(w) @ v  (or exp(w)^T @ v when inverse=True):
    #   v' = v +/- a*(w x v) + b*(w x (w x v))
    a, b = _rot_ab(wx, wy, wz)
    cx = wy * v[2] - wz * v[1]
    cy = wz * v[0] - wx * v[2]
    cz = wx * v[1] - wy * v[0]
    dx = wy * cz - wz * cy
    dy = wz * cx - wx * cz
    dz = wx * cy - wy * cx
    if inverse:
        return [v[0] - a * cx + b * dx, v[1] - a * cy + b * dy, v[2] - a * cz + b * dz]
    return [v[0] + a * cx + b * dx, v[1] + a * cy + b * dy, v[2] + a * cz + b * dz]


def _fast_recip(x):
    # EUP-seeded reciprocal + one Newton-Raphson refinement (rel err < 1e-6)
    r = pl.reciprocal(x, approx=True)
    return r * (2.0 - x * r)


# ---------------------------------------------------------------------------
# Pallas kernel: fused spline-eval + reprojection residual (lane-dense layout)
# ---------------------------------------------------------------------------
def _make_repro_kernel(Kp, tic, n_chunks):
    """Kp = K @ R_ic^T (9 floats, row-major) and tic (3 floats) are module parameters,
    baked in as compile-time constants (no constant VMEM/SMEM traffic)."""

    def kernel(x_ref, out_ref):
        # bounded in-kernel loop over 8-sublane row groups: keeps vreg live ranges small
        # at large block_rows (vs a 16-32x static unroll) while DMA tiles stay large.
        @pl.loop(0, n_chunks)
        def _chunk(cidx):
            base = pl.multiple_of(cidx * CHUNK, CHUNK)
            sl = pl.ds(base, CHUNK)
            ld = lambda f: x_ref[f, sl, :]                    # (CHUNK, 128) lane-dense slab

            # landmark in the reference IMU frame:  y = depth * (R_ic @ bearing) + t_ic
            depth = _fast_recip(ld(_IDEPTH))
            v = [ld(_BEAR + d) * depth + tic[d] for d in range(3)]

            # reference rotation applied matrix-free:
            #   R_ref = R0 * exp(l1*d1) * exp(l2*d2) * exp(l3*d3); apply innermost first.
            lam = _cum_bspline_coeffs(ld(_U + 0))
            for j in (2, 1, 0):
                v = _rot_apply(lam[j] * ld(_DL_REF + 3 * j + 0),
                               lam[j] * ld(_DL_REF + 3 * j + 1),
                               lam[j] * ld(_DL_REF + 3 * j + 2), v)

            # world point:  Xw = R0_ref @ v + p_ref  (R3 spline blend fused in)
            c = _bspline_coeffs(ld(_U + 1))
            Xw = [ld(_R0_REF + 3 * i + 0) * v[0] + ld(_R0_REF + 3 * i + 1) * v[1]
                  + ld(_R0_REF + 3 * i + 2) * v[2]
                  + c[0] * ld(_R3_REF + i) + c[1] * ld(_R3_REF + 3 + i)
                  + c[2] * ld(_R3_REF + 6 + i) + c[3] * ld(_R3_REF + 9 + i)
                  for i in range(3)]

            # observing-view spline position and dX = Xw - p_obs
            c = _bspline_coeffs(ld(_U + 3))
            dX = [Xw[i] - (c[0] * ld(_R3_OBS + i) + c[1] * ld(_R3_OBS + 3 + i)
                           + c[2] * ld(_R3_OBS + 6 + i) + c[3] * ld(_R3_OBS + 9 + i))
                  for i in range(3)]

            # z = R_obs^T @ dX - t_ic, matrix-free:
            #   R_obs^T = exp(-l3*d3) exp(-l2*d2) exp(-l1*d1) R0_obs^T
            v = [ld(_R0_OBS + 0 + i) * dX[0] + ld(_R0_OBS + 3 + i) * dX[1]
                 + ld(_R0_OBS + 6 + i) * dX[2] for i in range(3)]
            lam = _cum_bspline_coeffs(ld(_U + 2))
            for j in (0, 1, 2):
                v = _rot_apply(lam[j] * ld(_DL_OBS + 3 * j + 0),
                               lam[j] * ld(_DL_OBS + 3 * j + 1),
                               lam[j] * ld(_DL_OBS + 3 * j + 2), v, inverse=True)
            z = [v[i] - tic[i] for i in range(3)]

            # pinhole projection with folded extrinsics:  h = (K @ R_ic^T) @ z
            h = [Kp[3 * i + 0] * z[0] + Kp[3 * i + 1] * z[1] + Kp[3 * i + 2] * z[2]
                 for i in range(3)]
            inv_z = _fast_recip(h[2])
            out_ref[0, sl, :] = h[0] * inv_z - ld(_OBS + 0)   # full-128-lane stores
            out_ref[1, sl, :] = h[1] * inv_z - ld(_OBS + 1)

    return kernel


def _choose_tile(M, block_rows, min_steps):
    """Pick the block row-count (multiple of CHUNK) and padded row-count such that the
    grid has at least `min_steps` steps (feeds both v7x TensorCores via "parallel")."""
    mr = -(-M // LANES)
    mr_c = -(-mr // CHUNK) * CHUNK
    tb = max(CHUNK, (min(block_rows, mr_c) // CHUNK) * CHUNK)
    if mr_c >= min_steps * CHUNK:
        tb = min(tb, max(CHUNK, (mr_c // min_steps // CHUNK) * CHUNK))
    mr_pad = -(-mr_c // tb) * tb
    return tb, mr_pad


def make_reprojection_residual_fn(K, R_ic, t_ic, *, block_rows=128, min_grid_steps=2):
    """Fold the module parameters (cam_matrix, T_i_c) ONCE on the host and return a
    jitted fused spline-eval + reprojection residual function over per-residual arrays.
    Returns an (M, 2) residual.  No device_get / constant folding in the call path."""
    f32 = jnp.float32
    K_np = np.asarray(K, dtype=np.float32).reshape(3, 3)
    Ric_np = np.asarray(R_ic, dtype=np.float32).reshape(3, 3)
    tic_np = np.asarray(t_ic, dtype=np.float32).reshape(3)
    Kp = tuple(float(v) for v in (K_np @ Ric_np.T).reshape(-1))     # K' = K @ R_ic^T
    tic = tuple(float(v) for v in tic_np)
    Ric_T = jnp.asarray(Ric_np.T)

    @jax.jit
    def residual_fn(u, r3_ref, r3_obs, R0_ref, R0_obs, dl_ref, dl_obs,
                    bearings, inv_depth, obs):
        M = u.shape[0]
        tb, mr_pad = _choose_tile(M, block_rows, min_grid_steps)
        M_pad = mr_pad * LANES

        # fold R_ic into the per-residual bearings (one small matmul)
        bear_ic = bearings.reshape(M, 3).astype(f32) @ Ric_T

        def tp(a, k):                     # (M, k) -> (k, M) f32 feature planes
            return a.reshape(M, k).astype(f32).T

        # TODO(synk): this pack/pad is per-call HBM traffic; the LM loop upstream should
        #             keep the iteration-invariant planes (u, bearings, inv_depth, obs)
        #             packed once and only refresh the knot planes each iteration.
        feats = jnp.concatenate([
            tp(u, 4), tp(r3_ref, 12), tp(r3_obs, 12), tp(R0_ref, 9), tp(R0_obs, 9),
            tp(dl_ref, 9), tp(dl_obs, 9), bear_ic.T, tp(inv_depth, 1), tp(obs, 2),
        ], axis=0)                                                   # (70, M)
        # lane-dense layout: residual m -> (row m // 128, lane m % 128); pad w/ valid rows
        feats = jnp.pad(feats, ((0, 0), (0, M_pad - M)), mode='edge')
        packed = feats.reshape(NUM_FEATS, mr_pad, LANES)

        # VMEM/step: in = 70*tb*128*4 B (tb=128 -> 4.4 MiB, double-buffered 8.8 MiB)
        # + tiny output: fits default scoped VMEM on v5e (16 MiB) and v6e/v7x (32 MiB).
        out = pl.pallas_call(
            _make_repro_kernel(Kp, tic, tb // CHUNK),
            out_shape=jax.ShapeDtypeStruct((2, mr_pad, LANES), f32),
            grid_spec=pltpu.PrefetchScalarGridSpec(
                num_scalar_prefetch=0,
                grid=(mr_pad // tb,),
                in_specs=[pl.BlockSpec((NUM_FEATS, tb, LANES), lambda i: (0, i, 0))],
                out_specs=pl.BlockSpec((2, tb, LANES), lambda i: (0, i, 0))),
            compiler_params=pltpu.CompilerParams(dimension_semantics=("parallel",)),
        )(packed)

        return out.reshape(2, M_pad).T[:M]

    return residual_fn


# ---------------------------------------------------------------------------
# pure-JAX reference (same math in the original, un-folded formulation; no MXU)
# ---------------------------------------------------------------------------
def rodrigues(w):
    t2 = jnp.sum(w * w, axis=-1)
    t = jnp.sqrt(t2)
    small = t2 < 1e-12
    a = jnp.where(small, 1.0 - t2 / 6.0, jnp.sin(t) / jnp.where(small, 1.0, t))
    b = jnp.where(small, 0.5 - t2 / 24.0, (1.0 - jnp.cos(t)) / jnp.where(small, 1.0, t2))
    wx, wy, wz = w[..., 0], w[..., 1], w[..., 2]
    O = jnp.zeros_like(wx)
    W = jnp.stack([jnp.stack([O, -wz, wy], -1),
                   jnp.stack([wz, O, -wx], -1),
                   jnp.stack([-wy, wx, O], -1)], -2)
    I = jnp.eye(3, dtype=w.dtype)
    wwT = w[..., :, None] * w[..., None, :]
    return (I + a[..., None, None] * W
            + b[..., None, None] * (wwT - t2[..., None, None] * I))


def _mm(A, B):  # (...,3,3)@(...,3,3) without MXU
    return jnp.sum(A[..., :, :, None] * B[..., None, :, :], axis=-2)


def reference_residuals(u, r3_ref, r3_obs, R0_ref, R0_obs, dl_ref, dl_obs,
                        bearings, inv_depth, obs, K, R_ic, t_ic):
    def coeffs(uu):
        u2 = uu * uu; u3 = u2 * uu
        return jnp.stack([(1 - 3 * uu + 3 * u2 - u3) / 6, (4 - 6 * u2 + 3 * u3) / 6,
                          (1 + 3 * uu + 3 * u2 - 3 * u3) / 6, u3 / 6], -1)

    def cum(uu):
        u2 = uu * uu; u3 = u2 * uu
        return jnp.stack([(5 + 3 * uu - 3 * u2 + u3) / 6,
                          (1 + 3 * uu + 3 * u2 - 2 * u3) / 6, u3 / 6], -1)

    def eval_pose(u_so3, u_r3, r3k, R0, dl):
        c = coeffs(u_r3)                                   # (M,4)
        p = jnp.sum(c[:, :, None] * r3k, axis=1)           # (M,3)
        lam = cum(u_so3)                                   # (M,3)
        R = R0
        for j in range(3):
            R = _mm(R, rodrigues(lam[:, j:j + 1] * dl[:, j]))
        R_wc = _mm(R, jnp.broadcast_to(R_ic, R.shape))
        t_wc = jnp.sum(R * t_ic[None, None, :], axis=-1) + p
        return R_wc, t_wc

    Rr, tr = eval_pose(u[:, 0], u[:, 1], r3_ref, R0_ref, dl_ref)
    Ro, to = eval_pose(u[:, 2], u[:, 3], r3_obs, R0_obs, dl_obs)
    Xc = bearings / inv_depth
    Xw = jnp.sum(Rr * Xc[:, None, :], axis=-1) + tr
    Xo = jnp.sum(Ro * (Xw - to)[:, :, None], axis=-2)      # R^T (Xw - t)
    h = jnp.sum(K[None, :, :] * Xo[:, None, :], axis=-1)
    pix = h[:, :2] / h[:, 2:3]
    return pix - obs


# ---------------------------------------------------------------------------
if __name__ == "__main__":
    key = jax.random.PRNGKey(0)
    M = 4000          # number of reprojection residuals (exercises padding to 4096)
    ks = jax.random.split(key, 12)
    f32 = jnp.float32

    # per-residual spline-time fractions: [u_so3_ref, u_r3_ref, u_so3_obs, u_r3_obs]
    u = jax.random.uniform(ks[0], (M, 4), f32)
    # R3 knot windows (N=4 consecutive knots) for reference / observing views
    r3_ref = 0.2 * jax.random.normal(ks[1], (M, 4, 3), f32)
    r3_obs = r3_ref + 0.02 * jax.random.normal(ks[2], (M, 4, 3), f32)
    # SO3 knot windows: first knot rotation + relative-rotation logs log(R_{j-1}^T R_j)
    R0_ref = rodrigues(0.1 * jax.random.normal(ks[3], (M, 3), f32))
    R0_obs = rodrigues(0.1 * jax.random.normal(ks[4], (M, 3), f32))
    dl_ref = 0.05 * jax.random.normal(ks[5], (M, 3, 3), f32)
    dl_obs = 0.05 * jax.random.normal(ks[6], (M, 3, 3), f32)
    # track data: reference bearing, inverse depth, observed pixel
    bdir = jnp.concatenate([0.2 * jax.random.normal(ks[7], (M, 2), f32),
                            jnp.ones((M, 1), f32)], axis=-1)
    bearings = bdir / jnp.linalg.norm(bdir, axis=-1, keepdims=True)
    inv_depth = jax.random.uniform(ks[8], (M, 1), f32, 0.1, 0.4)
    obs = jnp.concatenate([jax.random.uniform(ks[9], (M, 1), f32, 220.0, 420.0),
                           jax.random.uniform(ks[10], (M, 1), f32, 140.0, 340.0)], -1)
    # deterministic module parameters (cam_matrix, T_i_c) — synthetic init, no checkpoint
    K = jnp.array([[500.0, 0.0, 320.0], [0.0, 500.0, 240.0], [0.0, 0.0, 1.0]], f32)
    R_ic = rodrigues(jnp.array([[0.02, -0.01, 0.03]], f32))[0]
    t_ic = jnp.array([0.01, 0.02, -0.005], f32)

    # build once (constant folding happens here, not per LM objective evaluation)
    residual_fn = make_reprojection_residual_fn(K, R_ic, t_ic,
                                                block_rows=128, min_grid_steps=2)

    out = residual_fn(u, r3_ref, r3_obs, R0_ref, R0_obs, dl_ref, dl_obs,
                      bearings, inv_depth, obs)
    out = jax.block_until_ready(out)

    ref = reference_residuals(u, r3_ref, r3_obs, R0_ref, R0_obs, dl_ref, dl_obs,
                              bearings, inv_depth, obs, K, R_ic, t_ic)

    assert out.shape == (M, 2)
    assert bool(jnp.all(jnp.isfinite(out)))
    max_err = float(jnp.max(jnp.abs(out - ref)))
    rel_err = max_err / max(1.0, float(jnp.max(jnp.abs(ref))))
    if max_err < 1e-2:
        print("KERNEL_OK")
    else:
        print("MISMATCH max_abs_err=", max_err, " rel_err=", rel_err)
</pallas_src>

<mosaic_0001>
module attributes {stable_mosaic.version = 11 : i64} {
  func.func @kernel(%arg0: i32, %arg1: memref<70x16x128xf32, #tpu.memory_space<vmem>>, %arg2: memref<2x16x128xf32, #tpu.memory_space<vmem>>) attributes {dimension_semantics = [#tpu.dimension_semantics<parallel>], iteration_bounds = array<i64: 2>, scalar_prefetch = 0 : i64, scratch_operands = 0 : i64, tpu.core_type = #tpu.core_type<tc>, window_params = [{transform_indices = @transform_0, window_bounds = array<i64: 70, 16, 128>}, {transform_indices = @transform_1, window_bounds = array<i64: 2, 16, 128>}]} {
    %c0_i32 = arith.constant 0 : i32
    %c2_i32 = arith.constant 2 : i32
    %0 = arith.addi %c0_i32, %c2_i32 : i32
    %c1_i32 = arith.constant 1 : i32
    scf.for %arg3 = %c0_i32 to %0 step %c1_i32  : i32 {
      %c1_i32_1 = arith.constant 1 : i32
      %1 = arith.muli %arg3, %c1_i32_1 : i32
      %c0_i32_2 = arith.constant 0 : i32
      %2 = arith.addi %c0_i32_2, %1 : i32
      %c8_i32 = arith.constant 8 : i32
      %3 = arith.muli %2, %c8_i32 : i32
      %4 = tpu.assume_multiple %3, 8 : i32
      %c67 = arith.constant 67 : index
      %5 = arith.index_cast %4 : i32 to index
      %c0 = arith.constant 0 : index
      %6 = vector.load %arg1[%c67, %5, %c0] : memref<70x16x128xf32, #tpu.memory_space<vmem>>, vector<1x8x128xf32>
      %7 = vector.shape_cast %6 : vector<1x8x128xf32> to vector<8x128xf32>
      %8 = tpu.reciprocal %7 {approx = true} : vector<8x128xf32> -> vector<8x128xf32>
      %9 = arith.mulf %7, %8 : vector<8x128xf32>
      %cst = arith.constant 2.000000e+00 : f32
      %10 = vector.broadcast %cst : f32 to vector<8x128xf32>
      %11 = arith.subf %10, %9 : vector<8x128xf32>
      %12 = arith.mulf %8, %11 : vector<8x128xf32>
      %c64 = arith.constant 64 : index
      %13 = arith.index_cast %4 : i32 to index
      %c0_3 = arith.constant 0 : index
      %14 = vector.load %arg1[%c64, %13, %c0_3] : memref<70x16x128xf32, #tpu.memory_space<vmem>>, vector<1x8x128xf32>
      %15 = vector.shape_cast %14 : vector<1x8x128xf32> to vector<8x128xf32>
      %16 = arith.mulf %15, %12 : vector<8x128xf32>
      %cst_4 = arith.constant 0.00999999977 : f32
      %17 = vector.broadcast %cst_4 : f32 to vector<8x128xf32>
      %18 = arith.addf %16, %17 : vector<8x128xf32>
      %c65 = arith.constant 65 : index
      %19 = arith.index_cast %4 : i32 to index
      %c0_5 = arith.constant 0 : index
      %20 = vector.load %arg1[%c65, %19, %c0_5] : memref<70x16x128xf32, #tpu.memory_space<vmem>>, vector<1x8x128xf32>
      %21 = vector.shape_cast %20 : vector<1x8x128xf32> to vector<8x128xf32>
      %22 = arith.mulf %21, %12 : vector<8x128xf32>
      %cst_6 = arith.constant 2.000000e-02 : f32
      %23 = vector.broadcast %cst_6 : f32 to vector<8x128xf32>
      %24 = arith.addf %22, %23 : vector<8x128xf32>
      %c66 = arith.constant 66 : index
      %25 = arith.index_cast %4 : i32 to index
      %c0_7 = arith.constant 0 : index
      %26 = vector.load %arg1[%c66, %25, %c0_7] : memref<70x16x128xf32, #tpu.memory_space<vmem>>, vector<1x8x128xf32>
      %27 = vector.shape_cast %26 : vector<1x8x128xf32> to vector<8x128xf32>
      %28 = arith.mulf %27, %12 : vector<8x128xf32>
      %cst_8 = arith.constant -5.000000e-03 : f32
      %29 = vector.broadcast %cst_8 : f32 to vector<8x128xf32>
      %30 = arith.addf %28, %29 : vector<8x128xf32>
      %c0_9 = arith.constant 0 : index
      %31 = arith.index_cast %4 : i32 to index
      %c0_10 = arith.constant 0 : index
      %32 = vector.load %arg1[%c0_9, %31, %c0_10] : memref<70x16x128xf32, #tpu.memory_space<vmem>>, vector<1x8x128xf32>
      %33 = vector.shape_cast %32 : vector<1x8x128xf32> to vector<8x128xf32>
      %34 = arith.mulf %33, %33 : vector<8x128xf32>
      %35 = arith.mulf %34, %33 : vector<8x128xf32>
      %cst_11 = arith.constant 3.000000e+00 : f32
      %36 = vector.broadcast %cst_11 : f32 to vector<8x128xf32>
      %37 = arith.mulf %36, %33 : vector<8x128xf32>
      %cst_12 = arith.constant 5.000000e+00 : f32
      %38 = vector.broadcast %cst_12 : f32 to vector<8x128xf32>
      %39 = arith.addf %38, %37 : vector<8x128xf32>
      %cst_13 = arith.constant 3.000000e+00 : f32
      %40 = vector.broadcast %cst_13 : f32 to vector<8x128xf32>
      %41 = arith.mulf %40, %34 : vector<8x128xf32>
      %42 = arith.subf %39, %41 : vector<8x128xf32>
      %43 = arith.addf %42, %35 : vector<8x128xf32>
      %cst_14 = arith.constant 0.166666672 : f32
      %44 = vector.broadcast %cst_14 : f32 to vector<8x128xf32>
      %45 = arith.mulf %43, %44 : vector<8x128xf32>
      %cst_15 = arith.constant 3.000000e+00 : f32
      %46 = vector.broadcast %cst_15 : f32 to vector<8x128xf32>
      %47 = arith.mulf %46, %33 : vector<8x128xf32>
      %cst_16 = arith.constant 1.000000e+00 : f32
      %48 = vector.broadcast %cst_16 : f32 to vector<8x128xf32>
      %49 = arith.addf %48, %47 : vector<8x128xf32>
      %cst_17 = arith.constant 3.000000e+00 : f32
      %50 = vector.broadcast %cst_17 : f32 to vector<8x128xf32>
      %51 = arith.mulf %50, %34 : vector<8x128xf32>
      %52 = arith.addf %49, %51 : vector<8x128xf32>
      %cst_18 = arith.constant 2.000000e+00 : f32
      %53 = vector.broadcast %cst_18 : f32 to vector<8x128xf32>
      %54 = arith.mulf %53, %35 : vector<8x128xf32>
      %55 = arith.subf %52, %54 : vector<8x128xf32>
      %cst_19 = arith.constant 0.166666672 : f32
      %56 = vector.broadcast %cst_19 : f32 to vector<8x128xf32>
      %57 = arith.mulf %55, %56 : vector<8x128xf32>
      %cst_20 = arith.constant 0.166666672 : f32
      %58 = vector.broadcast %cst_20 : f32 to vector<8x128xf32>
      %59 = arith.mulf %35, %58 : vector<8x128xf32>
      %c52 = arith.constant 52 : index
      %60 = arith.index_cast %4 : i32 to index
      %c0_21 = arith.constant 0 : index
      %61 = vector.load %arg1[%c52, %60, %c0_21] : memref<70x16x128xf32, #tpu.memory_space<vmem>>, vector<1x8x128xf32>
      %62 = vector.shape_cast %61 : vector<1x8x128xf32> to vector<8x128xf32>
      %63 = arith.mulf %59, %62 : vector<8x128xf32>
      %c53 = arith.constant 53 : index
      %64 = arith.index_cast %4 : i32 to index
      %c0_22 = arith.constant 0 : index
      %65 = vector.load %arg1[%c53, %64, %c0_22] : memref<70x16x128xf32, #tpu.memory_space<vmem>>, vector<1x8x128xf32>
      %66 = vector.shape_cast %65 : vector<1x8x128xf32> to vector<8x128xf32>
      %67 = arith.mulf %59, %66 : vector<8x128xf32>
      %c54 = arith.constant 54 : index
      %68 = arith.index_cast %4 : i32 to index
      %c0_23 = arith.constant 0 : index
      %69 = vector.load %arg1[%c54, %68, %c0_23] : memref<70x16x128xf32, #tpu.memory_space<vmem>>, vector<1x8x128xf32>
      %70 = vector.shape_cast %69 : vector<1x8x128xf32> to vector<8x128xf32>
      %71 = arith.mulf %59, %70 : vector<8x128xf32>
      %72 = arith.mulf %63, %63 : vector<8x128xf32>
      %73 = arith.mulf %67, %67 : vector<8x128xf32>
      %74 = arith.addf %72, %73 : vector<8x128xf32>
      %75 = arith.mulf %71, %71 : vector<8x128xf32>
      %76 = arith.addf %74, %75 : vector<8x128xf32>
      %cst_24 = arith.constant 9.99999996E-13 : f32
      %77 = vector.broadcast %cst_24 : f32 to vector<8x128xf32>
      %78 = arith.cmpf olt, %76, %77 : vector<8x128xf32>
      %cst_25 = arith.constant 1.000000e+00 : f32
      %79 = vector.broadcast %cst_25 : f32 to vector<8x128xf32>
      %80 = arith.select %78, %79, %76 : vector<8x128xi1>, vector<8x128xf32>
      %81 = math.rsqrt %80 : vector<8x128xf32>
      %82 = arith.mulf %80, %81 : vector<8x128xf32>
      %cst_26 = arith.constant 0.166666672 : f32
      %83 = vector.broadcast %cst_26 : f32 to vector<8x128xf32>
      %84 = arith.mulf %76, %83 : vector<8x128xf32>
      %cst_27 = arith.constant 1.000000e+00 : f32
      %85 = vector.broadcast %cst_27 : f32 to vector<8x128xf32>
      %86 = arith.subf %85, %84 : vector<8x128xf32>
      %87 = math.sin %82 : vector<8x128xf32>
      %88 = arith.mulf %87, %81 : vector<8x128xf32>
      %89 = arith.select %78, %86, %88 : vector<8x128xi1>, vector<8x128xf32>
      %cst_28 = arith.constant 0.0416666679 : f32
      %90 = vector.broadcast %cst_28 : f32 to vector<8x128xf32>
      %91 = arith.mulf %76, %90 : vector<8x128xf32>
      %cst_29 = arith.constant 5.000000e-01 : f32
      %92 = vector.broadcast %cst_29 : f32 to vector<8x128xf32>
      %93 = arith.subf %92, %91 : vector<8x128xf32>
      %94 = math.cos %82 : vector<8x128xf32>
      %cst_30 = arith.constant 1.000000e+00 : f32
      %95 = vector.broadcast %cst_30 : f32 to vector<8x128xf32>
      %96 = arith.subf %95, %94 : vector<8x128xf32>
      %97 = arith.mulf %81, %81 : vector<8x128xf32>
      %98 = arith.mulf %96, %97 : vector<8x128xf32>
      %99 = arith.select %78, %93, %98 : vector<8x128xi1>, vector<8x128xf32>
      %100 = arith.mulf %67, %30 : vector<8x128xf32>
      %101 = arith.mulf %71, %24 : vector<8x128xf32>
      %102 = arith.subf %100, %101 : vector<8x128xf32>
      %103 = arith.mulf %71, %18 : vector<8x128xf32>
      %104 = arith.mulf %63, %30 : vector<8x128xf32>
      %105 = arith.subf %103, %104 : vector<8x128xf32>
      %106 = arith.mulf %63, %24 : vector<8x128xf32>
      %107 = arith.mulf %67, %18 : vector<8x128xf32>
      %108 = arith.subf %106, %107 : vector<8x128xf32>
      %109 = arith.mulf %67, %108 : vector<8x128xf32>
      %110 = arith.mulf %71, %105 : vector<8x128xf32>
      %111 = arith.subf %109, %110 : vector<8x128xf32>
      %112 = arith.mulf %71, %102 : vector<8x128xf32>
      %113 = arith.mulf %63, %108 : vector<8x128xf32>
      %114 = arith.subf %112, %113 : vector<8x128xf32>
      %115 = arith.mulf %63, %105 : vector<8x128xf32>
      %116 = arith.mulf %67, %102 : vector<8x128xf32>
      %117 = arith.subf %115, %116 : vector<8x128xf32>
      %118 = arith.mulf %89, %102 : vector<8x128xf32>
      %119 = arith.addf %18, %118 : vector<8x128xf32>
      %120 = arith.mulf %99, %111 : vector<8x128xf32>
      %121 = arith.addf %119, %120 : vector<8x128xf32>
      %122 = arith.mulf %89, %105 : vector<8x128xf32>
      %123 = arith.addf %24, %122 : vector<8x128xf32>
      %124 = arith.mulf %99, %114 : vector<8x128xf32>
      %125 = arith.addf %123, %124 : vector<8x128xf32>
      %126 = arith.mulf %89, %108 : vector<8x128xf32>
      %127 = arith.addf %30, %126 : vector<8x128xf32>
      %128 = arith.mulf %99, %117 : vector<8x128xf32>
      %129 = arith.addf %127, %128 : vector<8x128xf32>
      %c49 = arith.constant 49 : index
      %130 = arith.index_cast %4 : i32 to index
      %c0_31 = arith.constant 0 : index
      %131 = vector.load %arg1[%c49, %130, %c0_31] : memref<70x16x128xf32, #tpu.memory_space<vmem>>, vector<1x8x128xf32>
      %132 = vector.shape_cast %131 : vector<1x8x128xf32> to vector<8x128xf32>
      %133 = arith.mulf %57, %132 : vector<8x128xf32>
      %c50 = arith.constant 50 : index
      %134 = arith.index_cast %4 : i32 to index
      %c0_32 = arith.constant 0 : index
      %135 = vector.load %arg1[%c50, %134, %c0_32] : memref<70x16x128xf32, #tpu.memory_space<vmem>>, vector<1x8x128xf32>
      %136 = vector.shape_cast %135 : vector<1x8x128xf32> to vector<8x128xf32>
      %137 = arith.mulf %57, %136 : vector<8x128xf32>
      %c51 = arith.constant 51 : index
      %138 = arith.index_cast %4 : i32 to index
      %c0_33 = arith.constant 0 : index
      %139 = vector.load %arg1[%c51, %138, %c0_33] : memref<70x16x128xf32, #tpu.memory_space<vmem>>, vector<1x8x128xf32>
      %140 = vector.shape_cast %139 : vector<1x8x128xf32> to vector<8x128xf32>
      %141 = arith.mulf %57, %140 : vector<8x128xf32>
      %142 = arith.mulf %133, %133 : vector<8x128xf32>
      %143 = arith.mulf %137, %137 : vector<8x128xf32>
      %144 = arith.addf %142, %143 : vector<8x128xf32>
      %145 = arith.mulf %141, %141 : vector<8x128xf32>
      %146 = arith.addf %144, %145 : vector<8x128xf32>
      %cst_34 = arith.constant 9.99999996E-13 : f32
      %147 = vector.broadcast %cst_34 : f32 to vector<8x128xf32>
      %148 = arith.cmpf olt, %146, %147 : vector<8x128xf32>
      %cst_35 = arith.constant 1.000000e+00 : f32
      %149 = vector.broadcast %cst_35 : f32 to vector<8x128xf32>
      %150 = arith.select %148, %149, %146 : vector<8x128xi1>, vector<8x128xf32>
      %151 = math.rsqrt %150 : vector<8x128xf32>
      %152 = arith.mulf %150, %151 : vector<8x128xf32>
      %cst_36 = arith.constant 0.166666672 : f32
      %153 = vector.broadcast %cst_36 : f32 to vector<8x128xf32>
      %154 = arith.mulf %146, %153 : vector<8x128xf32>
      %cst_37 = arith.constant 1.000000e+00 : f32
      %155 = vector.broadcast %cst_37 : f32 to vector<8x128xf32>
      %156 = arith.subf %155, %154 : vector<8x128xf32>
      %157 = math.sin %152 : vector<8x128xf32>
      %158 = arith.mulf %157, %151 : vector<8x128xf32>
      %159 = arith.select %148, %156, %158 : vector<8x128xi1>, vector<8x128xf32>
      %cst_38 = arith.constant 0.0416666679 : f32
      %160 = vector.broadcast %cst_38 : f32 to vector<8x128xf32>
      %161 = arith.mulf %146, %160 : vector<8x128xf32>
      %cst_39 = arith.constant 5.000000e-01 : f32
      %162 = vector.broadcast %cst_39 : f32 to vector<8x128xf32>
      %163 = arith.subf %162, %161 : vector<8x128xf32>
      %164 = math.cos %152 : vector<8x128xf32>
      %cst_40 = arith.constant 1.000000e+00 : f32
      %165 = vector.broadcast %cst_40 : f32 to vector<8x128xf32>
      %166 = arith.subf %165, %164 : vector<8x128xf32>
      %167 = arith.mulf %151, %151 : vector<8x128xf32>
      %168 = arith.mulf %166, %167 : vector<8x128xf32>
      %169 = arith.select %148, %163, %168 : vector<8x128xi1>, vector<8x128xf32>
      %170 = arith.mulf %137, %129 : vector<8x128xf32>
      %171 = arith.mulf %141, %125 : vector<8x128xf32>
      %172 = arith.subf %170, %171 : vector<8x128xf32>
      %173 = arith.mulf %141, %121 : vector<8x128xf32>
      %174 = arith.mulf %133, %129 : vector<8x128xf32>
      %175 = arith.subf %173, %174 : vector<8x128xf32>
      %176 = arith.mulf %133, %125 : vector<8x128xf32>
      %177 = arith.mulf %137, %121 : vector<8x128xf32>
      %178 = arith.subf %176, %177 : vector<8x128xf32>
      %179 = arith.mulf %137, %178 : vector<8x128xf32>
      %180 = arith.mulf %141, %175 : vector<8x128xf32>
      %181 = arith.subf %179, %180 : vector<8x128xf32>
      %182 = arith.mulf %141, %172 : vector<8x128xf32>
      %183 = arith.mulf %133, %178 : vector<8x128xf32>
      %184 = arith.subf %182, %183 : vector<8x128xf32>
      %185 = arith.mulf %133, %175 : vector<8x128xf32>
      %186 = arith.mulf %137, %172 : vector<8x128xf32>
      %187 = arith.subf %185, %186 : vector<8x128xf32>
      %188 = arith.mulf %159, %172 : vector<8x128xf32>
      %189 = arith.addf %121, %188 : vector<8x128xf32>
      %190 = arith.mulf %169, %181 : vector<8x128xf32>
      %191 = arith.addf %189, %190 : vector<8x128xf32>
      %192 = arith.mulf %159, %175 : vector<8x128xf32>
      %193 = arith.addf %125, %192 : vector<8x128xf32>
      %194 = arith.mulf %169, %184 : vector<8x128xf32>
      %195 = arith.addf %193, %194 : vector<8x128xf32>
      %196 = arith.mulf %159, %178 : vector<8x128xf32>
      %197 = arith.addf %129, %196 : vector<8x128xf32>
      %198 = arith.mulf %169, %187 : vector<8x128xf32>
      %199 = arith.addf %197, %198 : vector<8x128xf32>
      %c46 = arith.constant 46 : index
      %200 = arith.index_cast %4 : i32 to index
      %c0_41 = arith.constant 0 : index
      %201 = vector.load %arg1[%c46, %200, %c0_41] : memref<70x16x128xf32, #tpu.memory_space<vmem>>, vector<1x8x128xf32>
      %202 = vector.shape_cast %201 : vector<1x8x128xf32> to vector<8x128xf32>
      %203 = arith.mulf %45, %202 : vector<8x128xf32>
      %c47 = arith.constant 47 : index
      %204 = arith.index_cast %4 : i32 to index
      %c0_42 = arith.constant 0 : index
      %205 = vector.load %arg1[%c47, %204, %c0_42] : memref<70x16x128xf32, #tpu.memory_space<vmem>>, vector<1x8x128xf32>
      %206 = vector.shape_cast %205 : vector<1x8x128xf32> to vector<8x128xf32>
      %207 = arith.mulf %45, %206 : vector<8x128xf32>
      %c48 = arith.constant 48 : index
      %208 = arith.index_cast %4 : i32 to index
      %c0_43 = arith.constant 0 : index
      %209 = vector.load %arg1[%c48, %208, %c0_43] : memref<70x16x128xf32, #tpu.memory_space<vmem>>, vector<1x8x128xf32>
      %210 = vector.shape_cast %209 : vector<1x8x128xf32> to vector<8x128xf32>
      %211 = arith.mulf %45, %210 : vector<8x128xf32>
      %212 = arith.mulf %203, %203 : vector<8x128xf32>
      %213 = arith.mulf %207, %207 : vector<8x128xf32>
      %214 = arith.addf %212, %213 : vector<8x128xf32>
      %215 = arith.mulf %211, %211 : vector<8x128xf32>
      %216 = arith.addf %214, %215 : vector<8x128xf32>
      %cst_44 = arith.constant 9.99999996E-13 : f32
      %217 = vector.broadcast %cst_44 : f32 to vector<8x128xf32>
      %218 = arith.cmpf olt, %216, %217 : vector<8x128xf32>
      %cst_45 = arith.constant 1.000000e+00 : f32
      %219 = vector.broadcast %cst_45 : f32 to vector<8x128xf32>
      %220 = arith.select %218, %219, %216 : vector<8x128xi1>, vector<8x128xf32>
      %221 = math.rsqrt %220 : vector<8x128xf32>
      %222 = arith.mulf %220, %221 : vector<8x128xf32>
      %cst_46 = arith.constant 0.166666672 : f32
      %223 = vector.broadcast %cst_46 : f32 to vector<8x128xf32>
      %224 = arith.mulf %216, %223 : vector<8x128xf32>
      %cst_47 = arith.constant 1.000000e+00 : f32
      %225 = vector.broadcast %cst_47 : f32 to vector<8x128xf32>
      %226 = arith.subf %225, %224 : vector<8x128xf32>
      %227 = math.sin %222 : vector<8x128xf32>
      %228 = arith.mulf %227, %221 : vector<8x128xf32>
      %229 = arith.select %218, %226, %228 : vector<8x128xi1>, vector<8x128xf32>
      %cst_48 = arith.constant 0.0416666679 : f32
      %230 = vector.broadcast %cst_48 : f32 to vector<8x128xf32>
      %231 = arith.mulf %216, %230 : vector<8x128xf32>
      %cst_49 = arith.constant 5.000000e-01 : f32
      %232 = vector.broadcast %cst_49 : f32 to vector<8x128xf32>
      %233 = arith.subf %232, %231 : vector<8x128xf32>
      %234 = math.cos %222 : vector<8x128xf32>
      %cst_50 = arith.constant 1.000000e+00 : f32
      %235 = vector.broadcast %cst_50 : f32 to vector<8x128xf32>
      %236 = arith.subf %235, %234 : vector<8x128xf32>
      %237 = arith.mulf %221, %221 : vector<8x128xf32>
      %238 = arith.mulf %236, %237 : vector<8x128xf32>
      %239 = arith.select %218, %233, %238 : vector<8x128xi1>, vector<8x128xf32>
      %240 = arith.mulf %207, %199 : vector<8x128xf32>
      %241 = arith.mulf %211, %195 : vector<8x128xf32>
      %242 = arith.subf %240, %241 : vector<8x128xf32>
      %243 = arith.mulf %211, %191 : vector<8x128xf32>
      %244 = arith.mulf %203, %199 : vector<8x128xf32>
      %245 = arith.subf %243, %244 : vector<8x128xf32>
      %246 = arith.mulf %203, %195 : vector<8x128xf32>
      %247 = arith.mulf %207, %191 : vector<8x128xf32>
      %248 = arith.subf %246, %247 : vector<8x128xf32>
      %249 = arith.mulf %207, %248 : vector<8x128xf32>
      %250 = arith.mulf %211, %245 : vector<8x128xf32>
      %251 = arith.subf %249, %250 : vector<8x128xf32>
      %252 = arith.mulf %211, %242 : vector<8x128xf32>
      %253 = arith.mulf %203, %248 : vector<8x128xf32>
      %254 = arith.subf %252, %253 : vector<8x128xf32>
      %255 = arith.mulf %203, %245 : vector<8x128xf32>
      %256 = arith.mulf %207, %242 : vector<8x128xf32>
      %257 = arith.subf %255, %256 : vector<8x128xf32>
      %258 = arith.mulf %229, %242 : vector<8x128xf32>
      %259 = arith.addf %191, %258 : vector<8x128xf32>
      %260 = arith.mulf %239, %251 : vector<8x128xf32>
      %261 = arith.addf %259, %260 : vector<8x128xf32>
      %262 = arith.mulf %229, %245 : vector<8x128xf32>
      %263 = arith.addf %195, %262 : vector<8x128xf32>
      %264 = arith.mulf %239, %254 : vector<8x128xf32>
      %265 = arith.addf %263, %264 : vector<8x128xf32>
      %266 = arith.mulf %229, %248 : vector<8x128xf32>
      %267 = arith.addf %199, %266 : vector<8x128xf32>
      %268 = arith.mulf %239, %257 : vector<8x128xf32>
      %269 = arith.addf %267, %268 : vector<8x128xf32>
      %c1 = arith.constant 1 : index
      %270 = arith.index_cast %4 : i32 to index
      %c0_51 = arith.constant 0 : index
      %271 = vector.load %arg1[%c1, %270, %c0_51] : memref<70x16x128xf32, #tpu.memory_space<vmem>>, vector<1x8x128xf32>
      %272 = vector.shape_cast %271 : vector<1x8x128xf32> to vector<8x128xf32>
      %273 = arith.mulf %272, %272 : vector<8x128xf32>
      %274 = arith.mulf %273, %272 : vector<8x128xf32>
      %cst_52 = arith.constant 3.000000e+00 : f32
      %275 = vector.broadcast %cst_52 : f32 to vector<8x128xf32>
      %276 = arith.mulf %275, %272 : vector<8x128xf32>
      %cst_53 = arith.constant 1.000000e+00 : f32
      %277 = vector.broadcast %cst_53 : f32 to vector<8x128xf32>
      %278 = arith.subf %277, %276 : vector<8x128xf32>
      %cst_54 = arith.constant 3.000000e+00 : f32
      %279 = vector.broadcast %cst_54 : f32 to vector<8x128xf32>
      %280 = arith.mulf %279, %273 : vector<8x128xf32>
      %281 = arith.addf %278, %280 : vector<8x128xf32>
      %282 = arith.subf %281, %274 : vector<8x128xf32>
      %cst_55 = arith.constant 0.166666672 : f32
      %283 = vector.broadcast %cst_55 : f32 to vector<8x128xf32>
      %284 = arith.mulf %282, %283 : vector<8x128xf32>
      %cst_56 = arith.constant 6.000000e+00 : f32
      %285 = vector.broadcast %cst_56 : f32 to vector<8x128xf32>
      %286 = arith.mulf %285, %273 : vector<8x128xf32>
      %cst_57 = arith.constant 4.000000e+00 : f32
      %287 = vector.broadcast %cst_57 : f32 to vector<8x128xf32>
      %288 = arith.subf %287, %286 : vector<8x128xf32>
      %cst_58 = arith.constant 3.000000e+00 : f32
      %289 = vector.broadcast %cst_58 : f32 to vector<8x128xf32>
      %290 = arith.mulf %289, %274 : vector<8x128xf32>
      %291 = arith.addf %288, %290 : vector<8x128xf32>
      %cst_59 = arith.constant 0.166666672 : f32
      %292 = vector.broadcast %cst_59 : f32 to vector<8x128xf32>
      %293 = arith.mulf %291, %292 : vector<8x128xf32>
      %cst_60 = arith.constant 3.000000e+00 : f32
      %294 = vector.broadcast %cst_60 : f32 to vector<8x128xf32>
      %295 = arith.mulf %294, %272 : vector<8x128xf32>
      %cst_61 = arith.constant 1.000000e+00 : f32
      %296 = vector.broadcast %cst_61 : f32 to vector<8x128xf32>
      %297 = arith.addf %296, %295 : vector<8x128xf32>
      %cst_62 = arith.constant 3.000000e+00 : f32
      %298 = vector.broadcast %cst_62 : f32 to vector<8x128xf32>
      %299 = arith.mulf %298, %273 : vector<8x128xf32>
      %300 = arith.addf %297, %299 : vector<8x128xf32>
      %cst_63 = arith.constant 3.000000e+00 : f32
      %301 = vector.broadcast %cst_63 : f32 to vector<8x128xf32>
      %302 = arith.mulf %301, %274 : vector<8x128xf32>
      %303 = arith.subf %300, %302 : vector<8x128xf32>
      %cst_64 = arith.constant 0.166666672 : f32
      %304 = vector.broadcast %cst_64 : f32 to vector<8x128xf32>
      %305 = arith.mulf %303, %304 : vector<8x128xf32>
      %cst_65 = arith.constant 0.166666672 : f32
      %306 = vector.broadcast %cst_65 : f32 to vector<8x128xf32>
      %307 = arith.mulf %274, %306 : vector<8x128xf32>
      %c28 = arith.constant 28 : index
      %308 = arith.index_cast %4 : i32 to index
      %c0_66 = arith.constant 0 : index
      %309 = vector.load %arg1[%c28, %308, %c0_66] : memref<70x16x128xf32, #tpu.memory_space<vmem>>, vector<1x8x128xf32>
      %310 = vector.shape_cast %309 : vector<1x8x128xf32> to vector<8x128xf32>
      %311 = arith.mulf %310, %261 : vector<8x128xf32>
      %c29 = arith.constant 29 : index
      %312 = arith.index_cast %4 : i32 to index
      %c0_67 = arith.constant 0 : index
      %313 = vector.load %arg1[%c29, %312, %c0_67] : memref<70x16x128xf32, #tpu.memory_space<vmem>>, vector<1x8x128xf32>
      %314 = vector.shape_cast %313 : vector<1x8x128xf32> to vector<8x128xf32>
      %315 = arith.mulf %314, %265 : vector<8x128xf32>
      %316 = arith.addf %311, %315 : vector<8x128xf32>
      %c30 = arith.constant 30 : index
      %317 = arith.index_cast %4 : i32 to index
      %c0_68 = arith.constant 0 : index
      %318 = vector.load %arg1[%c30, %317, %c0_68] : memref<70x16x128xf32, #tpu.memory_space<vmem>>, vector<1x8x128xf32>
      %319 = vector.shape_cast %318 : vector<1x8x128xf32> to vector<8x128xf32>
      %320 = arith.mulf %319, %269 : vector<8x128xf32>
      %321 = arith.addf %316, %320 : vector<8x128xf32>
      %c4 = arith.constant 4 : index
      %322 = arith.index_cast %4 : i32 to index
      %c0_69 = arith.constant 0 : index
      %323 = vector.load %arg1[%c4, %322, %c0_69] : memref<70x16x128xf32, #tpu.memory_space<vmem>>, vector<1x8x128xf32>
      %324 = vector.shape_cast %323 : vector<1x8x128xf32> to vector<8x128xf32>
      %325 = arith.mulf %284, %324 : vector<8x128xf32>
      %326 = arith.addf %321, %325 : vector<8x128xf32>
      %c7 = arith.constant 7 : index
      %327 = arith.index_cast %4 : i32 to index
      %c0_70 = arith.constant 0 : index
      %328 = vector.load %arg1[%c7, %327, %c0_70] : memref<70x16x128xf32, #tpu.memory_space<vmem>>, vector<1x8x128xf32>
      %329 = vector.shape_cast %328 : vector<1x8x128xf32> to vector<8x128xf32>
      %330 = arith.mulf %293, %329 : vector<8x128xf32>
      %331 = arith.addf %326, %330 : vector<8x128xf32>
      %c10 = arith.constant 10 : index
      %332 = arith.index_cast %4 : i32 to index
      %c0_71 = arith.constant 0 : index
      %333 = vector.load %arg1[%c10, %332, %c0_71] : memref<70x16x128xf32, #tpu.memory_space<vmem>>, vector<1x8x128xf32>
      %334 = vector.shape_cast %333 : vector<1x8x128xf32> to vector<8x128xf32>
      %335 = arith.mulf %305, %334 : vector<8x128xf32>
      %336 = arith.addf %331, %335 : vector<8x128xf32>
      %c13 = arith.constant 13 : index
      %337 = arith.index_cast %4 : i32 to index
      %c0_72 = arith.constant 0 : index
      %338 = vector.load %arg1[%c13, %337, %c0_72] : memref<70x16x128xf32, #tpu.memory_space<vmem>>, vector<1x8x128xf32>
      %339 = vector.shape_cast %338 : vector<1x8x128xf32> to vector<8x128xf32>
      %340 = arith.mulf %307, %339 : vector<8x128xf32>
      %341 = arith.addf %336, %340 : vector<8x128xf32>
      %c31 = arith.constant 31 : index
      %342 = arith.index_cast %4 : i32 to index
      %c0_73 = arith.constant 0 : index
      %343 = vector.load %arg1[%c31, %342, %c0_73] : memref<70x16x128xf32, #tpu.memory_space<vmem>>, vector<1x8x128xf32>
      %344 = vector.shape_cast %343 : vector<1x8x128xf32> to vector<8x128xf32>
      %345 = arith.mulf %344, %261 : vector<8x128xf32>
      %c32 = arith.constant 32 : index
      %346 = arith.index_cast %4 : i32 to index
      %c0_74 = arith.constant 0 : index
      %347 = vector.load %arg1[%c32, %346, %c0_74] : memref<70x16x128xf32, #tpu.memory_space<vmem>>, vector<1x8x128xf32>
      %348 = vector.shape_cast %347 : vector<1x8x128xf32> to vector<8x128xf32>
      %349 = arith.mulf %348, %265 : vector<8x128xf32>
      %350 = arith.addf %345, %349 : vector<8x128xf32>
      %c33 = arith.constant 33 : index
      %351 = arith.index_cast %4 : i32 to index
      %c0_75 = arith.constant 0 : index
      %352 = vector.load %arg1[%c33, %351, %c0_75] : memref<70x16x128xf32, #tpu.memory_space<vmem>>, vector<1x8x128xf32>
      %353 = vector.shape_cast %352 : vector<1x8x128xf32> to vector<8x128xf32>
      %354 = arith.mulf %353, %269 : vector<8x128xf32>
      %355 = arith.addf %350, %354 : vector<8x128xf32>
      %c5 = arith.constant 5 : index
      %356 = arith.index_cast %4 : i32 to index
      %c0_76 = arith.constant 0 : index
      %357 = vector.load %arg1[%c5, %356, %c0_76] : memref<70x16x128xf32, #tpu.memory_space<vmem>>, vector<1x8x128xf32>
      %358 = vector.shape_cast %357 : vector<1x8x128xf32> to vector<8x128xf32>
      %359 = arith.mulf %284, %358 : vector<8x128xf32>
      %360 = arith.addf %355, %359 : vector<8x128xf32>
      %c8 = arith.constant 8 : index
      %361 = arith.index_cast %4 : i32 to index
      %c0_77 = arith.constant 0 : index
      %362 = vector.load %arg1[%c8, %361, %c0_77] : memref<70x16x128xf32, #tpu.memory_space<vmem>>, vector<1x8x128xf32>
      %363 = vector.shape_cast %362 : vector<1x8x128xf32> to vector<8x128xf32>
      %364 = arith.mulf %293, %363 : vector<8x128xf32>
      %365 = arith.addf %360, %364 : vector<8x128xf32>
      %c11 = arith.constant 11 : index
      %366 = arith.index_cast %4 : i32 to index
      %c0_78 = arith.constant 0 : index
      %367 = vector.load %arg1[%c11, %366, %c0_78] : memref<70x16x128xf32, #tpu.memory_space<vmem>>, vector<1x8x128xf32>
      %368 = vector.shape_cast %367 : vector<1x8x128xf32> to vector<8x128xf32>
      %369 = arith.mulf %305, %368 : vector<8x128xf32>
      %370 = arith.addf %365, %369 : vector<8x128xf32>
      %c14 = arith.constant 14 : index
      %371 = arith.index_cast %4 : i32 to index
      %c0_79 = arith.constant 0 : index
      %372 = vector.load %arg1[%c14, %371, %c0_79] : memref<70x16x128xf32, #tpu.memory_space<vmem>>, vector<1x8x128xf32>
      %373 = vector.shape_cast %372 : vector<1x8x128xf32> to vector<8x128xf32>
      %374 = arith.mulf %307, %373 : vector<8x128xf32>
      %375 = arith.addf %370, %374 : vector<8x128xf32>
      %c34 = arith.constant 34 : index
      %376 = arith.index_cast %4 : i32 to index
      %c0_80 = arith.constant 0 : index
      %377 = vector.load %arg1[%c34, %376, %c0_80] : memref<70x16x128xf32, #tpu.memory_space<vmem>>, vector<1x8x128xf32>
      %378 = vector.shape_cast %377 : vector<1x8x128xf32> to vector<8x128xf32>
      %379 = arith.mulf %378, %261 : vector<8x128xf32>
      %c35 = arith.constant 35 : index
      %380 = arith.index_cast %4 : i32 to index
      %c0_81 = arith.constant 0 : index
      %381 = vector.load %arg1[%c35, %380, %c0_81] : memref<70x16x128xf32, #tpu.memory_space<vmem>>, vector<1x8x128xf32>
      %382 = vector.shape_cast %381 : vector<1x8x128xf32> to vector<8x128xf32>
      %383 = arith.mulf %382, %265 : vector<8x128xf32>
      %384 = arith.addf %379, %383 : vector<8x128xf32>
      %c36 = arith.constant 36 : index
      %385 = arith.index_cast %4 : i32 to index
      %c0_82 = arith.constant 0 : index
      %386 = vector.load %arg1[%c36, %385, %c0_82] : memref<70x16x128xf32, #tpu.memory_space<vmem>>, vector<1x8x128xf32>
      %387 = vector.shape_cast %386 : vector<1x8x128xf32> to vector<8x128xf32>
      %388 = arith.mulf %387, %269 : vector<8x128xf32>
      %389 = arith.addf %384, %388 : vector<8x128xf32>
      %c6 = arith.constant 6 : index
      %390 = arith.index_cast %4 : i32 to index
      %c0_83 = arith.constant 0 : index
      %391 = vector.load %arg1[%c6, %390, %c0_83] : memref<70x16x128xf32, #tpu.memory_space<vmem>>, vector<1x8x128xf32>
      %392 = vector.shape_cast %391 : vector<1x8x128xf32> to vector<8x128xf32>
      %393 = arith.mulf %284, %392 : vector<8x128xf32>
      %394 = arith.addf %389, %393 : vector<8x128xf32>
      %c9 = arith.constant 9 : index
      %395 = arith.index_cast %4 : i32 to index
      %c0_84 = arith.constant 0 : index
      %396 = vector.load %arg1[%c9, %395, %c0_84] : memref<70x16x128xf32, #tpu.memory_space<vmem>>, vector<1x8x128xf32>
      %397 = vector.shape_cast %396 : vector<1x8x128xf32> to vector<8x128xf32>
      %398 = arith.mulf %293, %397 : vector<8x128xf32>
      %399 = arith.addf %394, %398 : vector<8x128xf32>
      %c12 = arith.constant 12 : index
      %400 = arith.index_cast %4 : i32 to index
      %c0_85 = arith.constant 0 : index
      %401 = vector.load %arg1[%c12, %400, %c0_85] : memref<70x16x128xf32, #tpu.memory_space<vmem>>, vector<1x8x128xf32>
      %402 = vector.shape_cast %401 : vector<1x8x128xf32> to vector<8x128xf32>
      %403 = arith.mulf %305, %402 : vector<8x128xf32>
      %404 = arith.addf %399, %403 : vector<8x128xf32>
      %c15 = arith.constant 15 : index
      %405 = arith.index_cast %4 : i32 to index
      %c0_86 = arith.constant 0 : index
      %406 = vector.load %arg1[%c15, %405, %c0_86] : memref<70x16x128xf32, #tpu.memory_space<vmem>>, vector<1x8x128xf32>
      %407 = vector.shape_cast %406 : vector<1x8x128xf32> to vector<8x128xf32>
      %408 = arith.mulf %307, %407 : vector<8x128xf32>
      %409 = arith.addf %404, %408 : vector<8x128xf32>
      %c3 = arith.constant 3 : index
      %410 = arith.index_cast %4 : i32 to index
      %c0_87 = arith.constant 0 : index
      %411 = vector.load %arg1[%c3, %410, %c0_87] : memref<70x16x128xf32, #tpu.memory_space<vmem>>, vector<1x8x128xf32>
      %412 = vector.shape_cast %411 : vector<1x8x128xf32> to vector<8x128xf32>
      %413 = arith.mulf %412, %412 : vector<8x128xf32>
      %414 = arith.mulf %413, %412 : vector<8x128xf32>
      %cst_88 = arith.constant 3.000000e+00 : f32
      %415 = vector.broadcast %cst_88 : f32 to vector<8x128xf32>
      %416 = arith.mulf %415, %412 : vector<8x128xf32>
      %cst_89 = arith.constant 1.000000e+00 : f32
      %417 = vector.broadcast %cst_89 : f32 to vector<8x128xf32>
      %418 = arith.subf %417, %416 : vector<8x128xf32>
      %cst_90 = arith.constant 3.000000e+00 : f32
      %419 = vector.broadcast %cst_90 : f32 to vector<8x128xf32>
      %420 = arith.mulf %419, %413 : vector<8x128xf32>
      %421 = arith.addf %418, %420 : vector<8x128xf32>
      %422 = arith.subf %421, %414 : vector<8x128xf32>
      %cst_91 = arith.constant 0.166666672 : f32
      %423 = vector.broadcast %cst_91 : f32 to vector<8x128xf32>
      %424 = arith.mulf %422, %423 : vector<8x128xf32>
      %cst_92 = arith.constant 6.000000e+00 : f32
      %425 = vector.broadcast %cst_92 : f32 to vector<8x128xf32>
      %426 = arith.mulf %425, %413 : vector<8x128xf32>
      %cst_93 = arith.constant 4.000000e+00 : f32
      %427 = vector.broadcast %cst_93 : f32 to vector<8x128xf32>
      %428 = arith.subf %427, %426 : vector<8x128xf32>
      %cst_94 = arith.constant 3.000000e+00 : f32
      %429 = vector.broadcast %cst_94 : f32 to vector<8x128xf32>
      %430 = arith.mulf %429, %414 : vector<8x128xf32>
      %431 = arith.addf %428, %430 : vector<8x128xf32>
      %cst_95 = arith.constant 0.166666672 : f32
      %432 = vector.broadcast %cst_95 : f32 to vector<8x128xf32>
      %433 = arith.mulf %431, %432 : vector<8x128xf32>
      %cst_96 = arith.constant 3.000000e+00 : f32
      %434 = vector.broadcast %cst_96 : f32 to vector<8x128xf32>
      %435 = arith.mulf %434, %412 : vector<8x128xf32>
      %cst_97 = arith.constant 1.000000e+00 : f32
      %436 = vector.broadcast %cst_97 : f32 to vector<8x128xf32>
      %437 = arith.addf %436, %435 : vector<8x128xf32>
      %cst_98 = arith.constant 3.000000e+00 : f32
      %438 = vector.broadcast %cst_98 : f32 to vector<8x128xf32>
      %439 = arith.mulf %438, %413 : vector<8x128xf32>
      %440 = arith.addf %437, %439 : vector<8x128xf32>
      %cst_99 = arith.constant 3.000000e+00 : f32
      %441 = vector.broadcast %cst_99 : f32 to vector<8x128xf32>
      %442 = arith.mulf %441, %414 : vector<8x128xf32>
      %443 = arith.subf %440, %442 : vector<8x128xf32>
      %cst_100 = arith.constant 0.166666672 : f32
      %444 = vector.broadcast %cst_100 : f32 to vector<8x128xf32>
      %445 = arith.mulf %443, %444 : vector<8x128xf32>
      %cst_101 = arith.constant 0.166666672 : f32
      %446 = vector.broadcast %cst_101 : f32 to vector<8x128xf32>
      %447 = arith.mulf %414, %446 : vector<8x128xf32>
      %c16 = arith.constant 16 : index
      %448 = arith.index_cast %4 : i32 to index
      %c0_102 = arith.constant 0 : index
      %449 = vector.load %arg1[%c16, %448, %c0_102] : memref<70x16x128xf32, #tpu.memory_space<vmem>>, vector<1x8x128xf32>
      %450 = vector.shape_cast %449 : vector<1x8x128xf32> to vector<8x128xf32>
      %451 = arith.mulf %424, %450 : vector<8x128xf32>
      %c19 = arith.constant 19 : index
      %452 = arith.index_cast %4 : i32 to index
      %c0_103 = arith.constant 0 : index
      %453 = vector.load %arg1[%c19, %452, %c0_103] : memref<70x16x128xf32, #tpu.memory_space<vmem>>, vector<1x8x128xf32>
      %454 = vector.shape_cast %453 : vector<1x8x128xf32> to vector<8x128xf32>
      %455 = arith.mulf %433, %454 : vector<8x128xf32>
      %456 = arith.addf %451, %455 : vector<8x128xf32>
      %c22 = arith.constant 22 : index
      %457 = arith.index_cast %4 : i32 to index
      %c0_104 = arith.constant 0 : index
      %458 = vector.load %arg1[%c22, %457, %c0_104] : memref<70x16x128xf32, #tpu.memory_space<vmem>>, vector<1x8x128xf32>
      %459 = vector.shape_cast %458 : vector<1x8x128xf32> to vector<8x128xf32>
      %460 = arith.mulf %445, %459 : vector<8x128xf32>
      %461 = arith.addf %456, %460 : vector<8x128xf32>
      %c25 = arith.constant 25 : index
      %462 = arith.index_cast %4 : i32 to index
      %c0_105 = arith.constant 0 : index
      %463 = vector.load %arg1[%c25, %462, %c0_105] : memref<70x16x128xf32, #tpu.memory_space<vmem>>, vector<1x8x128xf32>
      %464 = vector.shape_cast %463 : vector<1x8x128xf32> to vector<8x128xf32>
      %465 = arith.mulf %447, %464 : vector<8x128xf32>
      %466 = arith.addf %461, %465 : vector<8x128xf32>
      %467 = arith.subf %341, %466 : vector<8x128xf32>
      %c17 = arith.constant 17 : index
      %468 = arith.index_cast %4 : i32 to index
      %c0_106 = arith.constant 0 : index
      %469 = vector.load %arg1[%c17, %468, %c0_106] : memref<70x16x128xf32, #tpu.memory_space<vmem>>, vector<1x8x128xf32>
      %470 = vector.shape_cast %469 : vector<1x8x128xf32> to vector<8x128xf32>
      %471 = arith.mulf %424, %470 : vector<8x128xf32>
      %c20 = arith.constant 20 : index
      %472 = arith.index_cast %4 : i32 to index
      %c0_107 = arith.constant 0 : index
      %473 = vector.load %arg1[%c20, %472, %c0_107] : memref<70x16x128xf32, #tpu.memory_space<vmem>>, vector<1x8x128xf32>
      %474 = vector.shape_cast %473 : vector<1x8x128xf32> to vector<8x128xf32>
      %475 = arith.mulf %433, %474 : vector<8x128xf32>
      %476 = arith.addf %471, %475 : vector<8x128xf32>
      %c23 = arith.constant 23 : index
      %477 = arith.index_cast %4 : i32 to index
      %c0_108 = arith.constant 0 : index
      %478 = vector.load %arg1[%c23, %477, %c0_108] : memref<70x16x128xf32, #tpu.memory_space<vmem>>, vector<1x8x128xf32>
      %479 = vector.shape_cast %478 : vector<1x8x128xf32> to vector<8x128xf32>
      %480 = arith.mulf %445, %479 : vector<8x128xf32>
      %481 = arith.addf %476, %480 : vector<8x128xf32>
      %c26 = arith.constant 26 : index
      %482 = arith.index_cast %4 : i32 to index
      %c0_109 = arith.constant 0 : index
      %483 = vector.load %arg1[%c26, %482, %c0_109] : memref<70x16x128xf32, #tpu.memory_space<vmem>>, vector<1x8x128xf32>
      %484 = vector.shape_cast %483 : vector<1x8x128xf32> to vector<8x128xf32>
      %485 = arith.mulf %447, %484 : vector<8x128xf32>
      %486 = arith.addf %481, %485 : vector<8x128xf32>
      %487 = arith.subf %375, %486 : vector<8x128xf32>
      %c18 = arith.constant 18 : index
      %488 = arith.index_cast %4 : i32 to index
      %c0_110 = arith.constant 0 : index
      %489 = vector.load %arg1[%c18, %488, %c0_110] : memref<70x16x128xf32, #tpu.memory_space<vmem>>, vector<1x8x128xf32>
      %490 = vector.shape_cast %489 : vector<1x8x128xf32> to vector<8x128xf32>
      %491 = arith.mulf %424, %490 : vector<8x128xf32>
      %c21 = arith.constant 21 : index
      %492 = arith.index_cast %4 : i32 to index
      %c0_111 = arith.constant 0 : index
      %493 = vector.load %arg1[%c21, %492, %c0_111] : memref<70x16x128xf32, #tpu.memory_space<vmem>>, vector<1x8x128xf32>
      %494 = vector.shape_cast %493 : vector<1x8x128xf32> to vector<8x128xf32>
      %495 = arith.mulf %433, %494 : vector<8x128xf32>
      %496 = arith.addf %491, %495 : vector<8x128xf32>
      %c24 = arith.constant 24 : index
      %497 = arith.index_cast %4 : i32 to index
      %c0_112 = arith.constant 0 : index
      %498 = vector.load %arg1[%c24, %497, %c0_112] : memref<70x16x128xf32, #tpu.memory_space<vmem>>, vector<1x8x128xf32>
      %499 = vector.shape_cast %498 : vector<1x8x128xf32> to vector<8x128xf32>
      %500 = arith.mulf %445, %499 : vector<8x128xf32>
      %501 = arith.addf %496, %500 : vector<8x128xf32>
      %c27 = arith.constant 27 : index
      %502 = arith.index_cast %4 : i32 to index
      %c0_113 = arith.constant 0 : index
      %503 = vector.load %arg1[%c27, %502, %c0_113] : memref<70x16x128xf32, #tpu.memory_space<vmem>>, vector<1x8x128xf32>
      %504 = vector.shape_cast %503 : vector<1x8x128xf32> to vector<8x128xf32>
      %505 = arith.mulf %447, %504 : vector<8x128xf32>
      %506 = arith.addf %501, %505 : vector<8x128xf32>
      %507 = arith.subf %409, %506 : vector<8x128xf32>
      %c37 = arith.constant 37 : index
      %508 = arith.index_cast %4 : i32 to index
      %c0_114 = arith.constant 0 : index
      %509 = vector.load %arg1[%c37, %508, %c0_114] : memref<70x16x128xf32, #tpu.memory_space<vmem>>, vector<1x8x128xf32>
      %510 = vector.shape_cast %509 : vector<1x8x128xf32> to vector<8x128xf32>
      %511 = arith.mulf %510, %467 : vector<8x128xf32>
      %c40 = arith.constant 40 : index
      %512 = arith.index_cast %4 : i32 to index
      %c0_115 = arith.constant 0 : index
      %513 = vector.load %arg1[%c40, %512, %c0_115] : memref<70x16x128xf32, #tpu.memory_space<vmem>>, vector<1x8x128xf32>
      %514 = vector.shape_cast %513 : vector<1x8x128xf32> to vector<8x128xf32>
      %515 = arith.mulf %514, %487 : vector<8x128xf32>
      %516 = arith.addf %511, %515 : vector<8x128xf32>
      %c43 = arith.constant 43 : index
      %517 = arith.index_cast %4 : i32 to index
      %c0_116 = arith.constant 0 : index
      %518 = vector.load %arg1[%c43, %517, %c0_116] : memref<70x16x128xf32, #tpu.memory_space<vmem>>, vector<1x8x128xf32>
      %519 = vector.shape_cast %518 : vector<1x8x128xf32> to vector<8x128xf32>
      %520 = arith.mulf %519, %507 : vector<8x128xf32>
      %521 = arith.addf %516, %520 : vector<8x128xf32>
      %c38 = arith.constant 38 : index
      %522 = arith.index_cast %4 : i32 to index
      %c0_117 = arith.constant 0 : index
      %523 = vector.load %arg1[%c38, %522, %c0_117] : memref<70x16x128xf32, #tpu.memory_space<vmem>>, vector<1x8x128xf32>
      %524 = vector.shape_cast %523 : vector<1x8x128xf32> to vector<8x128xf32>
      %525 = arith.mulf %524, %467 : vector<8x128xf32>
      %c41 = arith.constant 41 : index
      %526 = arith.index_cast %4 : i32 to index
      %c0_118 = arith.constant 0 : index
      %527 = vector.load %arg1[%c41, %526, %c0_118] : memref<70x16x128xf32, #tpu.memory_space<vmem>>, vector<1x8x128xf32>
      %528 = vector.shape_cast %527 : vector<1x8x128xf32> to vector<8x128xf32>
      %529 = arith.mulf %528, %487 : vector<8x128xf32>
      %530 = arith.addf %525, %529 : vector<8x128xf32>
      %c44 = arith.constant 44 : index
      %531 = arith.index_cast %4 : i32 to index
      %c0_119 = arith.constant 0 : index
      %532 = vector.load %arg1[%c44, %531, %c0_119] : memref<70x16x128xf32, #tpu.memory_space<vmem>>, vector<1x8x128xf32>
      %533 = vector.shape_cast %532 : vector<1x8x128xf32> to vector<8x128xf32>
      %534 = arith.mulf %533, %507 : vector<8x128xf32>
      %535 = arith.addf %530, %534 : vector<8x128xf32>
      %c39 = arith.constant 39 : index
      %536 = arith.index_cast %4 : i32 to index
      %c0_120 = arith.constant 0 : index
      %537 = vector.load %arg1[%c39, %536, %c0_120] : memref<70x16x128xf32, #tpu.memory_space<vmem>>, vector<1x8x128xf32>
      %538 = vector.shape_cast %537 : vector<1x8x128xf32> to vector<8x128xf32>
      %539 = arith.mulf %538, %467 : vector<8x128xf32>
      %c42 = arith.constant 42 : index
      %540 = arith.index_cast %4 : i32 to index
      %c0_121 = arith.constant 0 : index
      %541 = vector.load %arg1[%c42, %540, %c0_121] : memref<70x16x128xf32, #tpu.memory_space<vmem>>, vector<1x8x128xf32>
      %542 = vector.shape_cast %541 : vector<1x8x128xf32> to vector<8x128xf32>
      %543 = arith.mulf %542, %487 : vector<8x128xf32>
      %544 = arith.addf %539, %543 : vector<8x128xf32>
      %c45 = arith.constant 45 : index
      %545 = arith.index_cast %4 : i32 to index
      %c0_122 = arith.constant 0 : index
      %546 = vector.load %arg1[%c45, %545, %c0_122] : memref<70x16x128xf32, #tpu.memory_space<vmem>>, vector<1x8x128xf32>
      %547 = vector.shape_cast %546 : vector<1x8x128xf32> to vector<8x128xf32>
      %548 = arith.mulf %547, %507 : vector<8x128xf32>
      %549 = arith.addf %544, %548 : vector<8x128xf32>
      %c2 = arith.constant 2 : index
      %550 = arith.index_cast %4 : i32 to index
      %c0_123 = arith.constant 0 : index
      %551 = vector.load %arg1[%c2, %550, %c0_123] : memref<70x16x128xf32, #tpu.memory_space<vmem>>, vector<1x8x128xf32>
      %552 = vector.shape_cast %551 : vector<1x8x128xf32> to vector<8x128xf32>
      %553 = arith.mulf %552, %552 : vector<8x128xf32>
      %554 = arith.mulf %553, %552 : vector<8x128xf32>
      %cst_124 = arith.constant 3.000000e+00 : f32
      %555 = vector.broadcast %cst_124 : f32 to vector<8x128xf32>
      %556 = arith.mulf %555, %552 : vector<8x128xf32>
      %cst_125 = arith.constant 5.000000e+00 : f32
      %557 = vector.broadcast %cst_125 : f32 to vector<8x128xf32>
      %558 = arith.addf %557, %556 : vector<8x128xf32>
      %cst_126 = arith.constant 3.000000e+00 : f32
      %559 = vector.broadcast %cst_126 : f32 to vector<8x128xf32>
      %560 = arith.mulf %559, %553 : vector<8x128xf32>
      %561 = arith.subf %558, %560 : vector<8x128xf32>
      %562 = arith.addf %561, %554 : vector<8x128xf32>
      %cst_127 = arith.constant 0.166666672 : f32
      %563 = vector.broadcast %cst_127 : f32 to vector<8x128xf32>
      %564 = arith.mulf %562, %563 : vector<8x128xf32>
      %cst_128 = arith.constant 3.000000e+00 : f32
      %565 = vector.broadcast %cst_128 : f32 to vector<8x128xf32>
      %566 = arith.mulf %565, %552 : vector<8x128xf32>
      %cst_129 = arith.constant 1.000000e+00 : f32
      %567 = vector.broadcast %cst_129 : f32 to vector<8x128xf32>
      %568 = arith.addf %567, %566 : vector<8x128xf32>
      %cst_130 = arith.constant 3.000000e+00 : f32
      %569 = vector.broadcast %cst_130 : f32 to vector<8x128xf32>
      %570 = arith.mulf %569, %553 : vector<8x128xf32>
      %571 = arith.addf %568, %570 : vector<8x128xf32>
      %cst_131 = arith.constant 2.000000e+00 : f32
      %572 = vector.broadcast %cst_131 : f32 to vector<8x128xf32>
      %573 = arith.mulf %572, %554 : vector<8x128xf32>
      %574 = arith.subf %571, %573 : vector<8x128xf32>
      %cst_132 = arith.constant 0.166666672 : f32
      %575 = vector.broadcast %cst_132 : f32 to vector<8x128xf32>
      %576 = arith.mulf %574, %575 : vector<8x128xf32>
      %cst_133 = arith.constant 0.166666672 : f32
      %577 = vector.broadcast %cst_133 : f32 to vector<8x128xf32>
      %578 = arith.mulf %554, %577 : vector<8x128xf32>
      %c55 = arith.constant 55 : index
      %579 = arith.index_cast %4 : i32 to index
      %c0_134 = arith.constant 0 : index
      %580 = vector.load %arg1[%c55, %579, %c0_134] : memref<70x16x128xf32, #tpu.memory_space<vmem>>, vector<1x8x128xf32>
      %581 = vector.shape_cast %580 : vector<1x8x128xf32> to vector<8x128xf32>
      %582 = arith.mulf %564, %581 : vector<8x128xf32>
      %c56 = arith.constant 56 : index
      %583 = arith.index_cast %4 : i32 to index
      %c0_135 = arith.constant 0 : index
      %584 = vector.load %arg1[%c56, %583, %c0_135] : memref<70x16x128xf32, #tpu.memory_space<vmem>>, vector<1x8x128xf32>
      %585 = vector.shape_cast %584 : vector<1x8x128xf32> to vector<8x128xf32>
      %586 = arith.mulf %564, %585 : vector<8x128xf32>
      %c57 = arith.constant 57 : index
      %587 = arith.index_cast %4 : i32 to index
      %c0_136 = arith.constant 0 : index
      %588 = vector.load %arg1[%c57, %587, %c0_136] : memref<70x16x128xf32, #tpu.memory_space<vmem>>, vector<1x8x128xf32>
      %589 = vector.shape_cast %588 : vector<1x8x128xf32> to vector<8x128xf32>
      %590 = arith.mulf %564, %589 : vector<8x128xf32>
      %591 = arith.mulf %582, %582 : vector<8x128xf32>
      %592 = arith.mulf %586, %586 : vector<8x128xf32>
      %593 = arith.addf %591, %592 : vector<8x128xf32>
      %594 = arith.mulf %590, %590 : vector<8x128xf32>
      %595 = arith.addf %593, %594 : vector<8x128xf32>
      %cst_137 = arith.constant 9.99999996E-13 : f32
      %596 = vector.broadcast %cst_137 : f32 to vector<8x128xf32>
      %597 = arith.cmpf olt, %595, %596 : vector<8x128xf32>
      %cst_138 = arith.constant 1.000000e+00 : f32
      %598 = vector.broadcast %cst_138 : f32 to vector<8x128xf32>
      %599 = arith.select %597, %598, %595 : vector<8x128xi1>, vector<8x128xf32>
      %600 = math.rsqrt %599 : vector<8x128xf32>
      %601 = arith.mulf %599, %600 : vector<8x128xf32>
      %cst_139 = arith.constant 0.166666672 : f32
      %602 = vector.broadcast %cst_139 : f32 to vector<8x128xf32>
      %603 = arith.mulf %595, %602 : vector<8x128xf32>
      %cst_140 = arith.constant 1.000000e+00 : f32
      %604 = vector.broadcast %cst_140 : f32 to vector<8x128xf32>
      %605 = arith.subf %604, %603 : vector<8x128xf32>
      %606 = math.sin %601 : vector<8x128xf32>
      %607 = arith.mulf %606, %600 : vector<8x128xf32>
      %608 = arith.select %597, %605, %607 : vector<8x128xi1>, vector<8x128xf32>
      %cst_141 = arith.constant 0.0416666679 : f32
      %609 = vector.broadcast %cst_141 : f32 to vector<8x128xf32>
      %610 = arith.mulf %595, %609 : vector<8x128xf32>
      %cst_142 = arith.constant 5.000000e-01 : f32
      %611 = vector.broadcast %cst_142 : f32 to vector<8x128xf32>
      %612 = arith.subf %611, %610 : vector<8x128xf32>
      %613 = math.cos %601 : vector<8x128xf32>
      %cst_143 = arith.constant 1.000000e+00 : f32
      %614 = vector.broadcast %cst_143 : f32 to vector<8x128xf32>
      %615 = arith.subf %614, %613 : vector<8x128xf32>
      %616 = arith.mulf %600, %600 : vector<8x128xf32>
      %617 = arith.mulf %615, %616 : vector<8x128xf32>
      %618 = arith.select %597, %612, %617 : vector<8x128xi1>, vector<8x128xf32>
      %619 = arith.mulf %586, %549 : vector<8x128xf32>
      %620 = arith.mulf %590, %535 : vector<8x128xf32>
      %621 = arith.subf %619, %620 : vector<8x128xf32>
      %622 = arith.mulf %590, %521 : vector<8x128xf32>
      %623 = arith.mulf %582, %549 : vector<8x128xf32>
      %624 = arith.subf %622, %623 : vector<8x128xf32>
      %625 = arith.mulf %582, %535 : vector<8x128xf32>
      %626 = arith.mulf %586, %521 : vector<8x128xf32>
      %627 = arith.subf %625, %626 : vector<8x128xf32>
      %628 = arith.mulf %586, %627 : vector<8x128xf32>
      %629 = arith.mulf %590, %624 : vector<8x128xf32>
      %630 = arith.subf %628, %629 : vector<8x128xf32>
      %631 = arith.mulf %590, %621 : vector<8x128xf32>
      %632 = arith.mulf %582, %627 : vector<8x128xf32>
      %633 = arith.subf %631, %632 : vector<8x128xf32>
      %634 = arith.mulf %582, %624 : vector<8x128xf32>
      %635 = arith.mulf %586, %621 : vector<8x128xf32>
      %636 = arith.subf %634, %635 : vector<8x128xf32>
      %637 = arith.mulf %608, %621 : vector<8x128xf32>
      %638 = arith.subf %521, %637 : vector<8x128xf32>
      %639 = arith.mulf %618, %630 : vector<8x128xf32>
      %640 = arith.addf %638, %639 : vector<8x128xf32>
      %641 = arith.mulf %608, %624 : vector<8x128xf32>
      %642 = arith.subf %535, %641 : vector<8x128xf32>
      %643 = arith.mulf %618, %633 : vector<8x128xf32>
      %644 = arith.addf %642, %643 : vector<8x128xf32>
      %645 = arith.mulf %608, %627 : vector<8x128xf32>
      %646 = arith.subf %549, %645 : vector<8x128xf32>
      %647 = arith.mulf %618, %636 : vector<8x128xf32>
      %648 = arith.addf %646, %647 : vector<8x128xf32>
      %c58 = arith.constant 58 : index
      %649 = arith.index_cast %4 : i32 to index
      %c0_144 = arith.constant 0 : index
      %650 = vector.load %arg1[%c58, %649, %c0_144] : memref<70x16x128xf32, #tpu.memory_space<vmem>>, vector<1x8x128xf32>
      %651 = vector.shape_cast %650 : vector<1x8x128xf32> to vector<8x128xf32>
      %652 = arith.mulf %576, %651 : vector<8x128xf32>
      %c59 = arith.constant 59 : index
      %653 = arith.index_cast %4 : i32 to index
      %c0_145 = arith.constant 0 : index
      %654 = vector.load %arg1[%c59, %653, %c0_145] : memref<70x16x128xf32, #tpu.memory_space<vmem>>, vector<1x8x128xf32>
      %655 = vector.shape_cast %654 : vector<1x8x128xf32> to vector<8x128xf32>
      %656 = arith.mulf %576, %655 : vector<8x128xf32>
      %c60 = arith.constant 60 : index
      %657 = arith.index_cast %4 : i32 to index
      %c0_146 = arith.constant 0 : index
      %658 = vector.load %arg1[%c60, %657, %c0_146] : memref<70x16x128xf32, #tpu.memory_space<vmem>>, vector<1x8x128xf32>
      %659 = vector.shape_cast %658 : vector<1x8x128xf32> to vector<8x128xf32>
      %660 = arith.mulf %576, %659 : vector<8x128xf32>
      %661 = arith.mulf %652, %652 : vector<8x128xf32>
      %662 = arith.mulf %656, %656 : vector<8x128xf32>
      %663 = arith.addf %661, %662 : vector<8x128xf32>
      %664 = arith.mulf %660, %660 : vector<8x128xf32>
      %665 = arith.addf %663, %664 : vector<8x128xf32>
      %cst_147 = arith.constant 9.99999996E-13 : f32
      %666 = vector.broadcast %cst_147 : f32 to vector<8x128xf32>
      %667 = arith.cmpf olt, %665, %666 : vector<8x128xf32>
      %cst_148 = arith.constant 1.000000e+00 : f32
      %668 = vector.broadcast %cst_148 : f32 to vector<8x128xf32>
      %669 = arith.select %667, %668, %665 : vector<8x128xi1>, vector<8x128xf32>
      %670 = math.rsqrt %669 : vector<8x128xf32>
      %671 = arith.mulf %669, %670 : vector<8x128xf32>
      %cst_149 = arith.constant 0.166666672 : f32
      %672 = vector.broadcast %cst_149 : f32 to vector<8x128xf32>
      %673 = arith.mulf %665, %672 : vector<8x128xf32>
      %cst_150 = arith.constant 1.000000e+00 : f32
      %674 = vector.broadcast %cst_150 : f32 to vector<8x128xf32>
      %675 = arith.subf %674, %673 : vector<8x128xf32>
      %676 = math.sin %671 : vector<8x128xf32>
      %677 = arith.mulf %676, %670 : vector<8x128xf32>
      %678 = arith.select %667, %675, %677 : vector<8x128xi1>, vector<8x128xf32>
      %cst_151 = arith.constant 0.0416666679 : f32
      %679 = vector.broadcast %cst_151 : f32 to vector<8x128xf32>
      %680 = arith.mulf %665, %679 : vector<8x128xf32>
      %cst_152 = arith.constant 5.000000e-01 : f32
      %681 = vector.broadcast %cst_152 : f32 to vector<8x128xf32>
      %682 = arith.subf %681, %680 : vector<8x128xf32>
      %683 = math.cos %671 : vector<8x128xf32>
      %cst_153 = arith.constant 1.000000e+00 : f32
      %684 = vector.broadcast %cst_153 : f32 to vector<8x128xf32>
      %685 = arith.subf %684, %683 : vector<8x128xf32>
      %686 = arith.mulf %670, %670 : vector<8x128xf32>
      %687 = arith.mulf %685, %686 : vector<8x128xf32>
      %688 = arith.select %667, %682, %687 : vector<8x128xi1>, vector<8x128xf32>
      %689 = arith.mulf %656, %648 : vector<8x128xf32>
      %690 = arith.mulf %660, %644 : vector<8x128xf32>
      %691 = arith.subf %689, %690 : vector<8x128xf32>
      %692 = arith.mulf %660, %640 : vector<8x128xf32>
      %693 = arith.mulf %652, %648 : vector<8x128xf32>
      %694 = arith.subf %692, %693 : vector<8x128xf32>
      %695 = arith.mulf %652, %644 : vector<8x128xf32>
      %696 = arith.mulf %656, %640 : vector<8x128xf32>
      %697 = arith.subf %695, %696 : vector<8x128xf32>
      %698 = arith.mulf %656, %697 : vector<8x128xf32>
      %699 = arith.mulf %660, %694 : vector<8x128xf32>
      %700 = arith.subf %698, %699 : vector<8x128xf32>
      %701 = arith.mulf %660, %691 : vector<8x128xf32>
      %702 = arith.mulf %652, %697 : vector<8x128xf32>
      %703 = arith.subf %701, %702 : vector<8x128xf32>
      %704 = arith.mulf %652, %694 : vector<8x128xf32>
      %705 = arith.mulf %656, %691 : vector<8x128xf32>
      %706 = arith.subf %704, %705 : vector<8x128xf32>
      %707 = arith.mulf %678, %691 : vector<8x128xf32>
      %708 = arith.subf %640, %707 : vector<8x128xf32>
      %709 = arith.mulf %688, %700 : vector<8x128xf32>
      %710 = arith.addf %708, %709 : vector<8x128xf32>
      %711 = arith.mulf %678, %694 : vector<8x128xf32>
      %712 = arith.subf %644, %711 : vector<8x128xf32>
      %713 = arith.mulf %688, %703 : vector<8x128xf32>
      %714 = arith.addf %712, %713 : vector<8x128xf32>
      %715 = arith.mulf %678, %697 : vector<8x128xf32>
      %716 = arith.subf %648, %715 : vector<8x128xf32>
      %717 = arith.mulf %688, %706 : vector<8x128xf32>
      %718 = arith.addf %716, %717 : vector<8x128xf32>
      %c61 = arith.constant 61 : index
      %719 = arith.index_cast %4 : i32 to index
      %c0_154 = arith.constant 0 : index
      %720 = vector.load %arg1[%c61, %719, %c0_154] : memref<70x16x128xf32, #tpu.memory_space<vmem>>, vector<1x8x128xf32>
      %721 = vector.shape_cast %720 : vector<1x8x128xf32> to vector<8x128xf32>
      %722 = arith.mulf %578, %721 : vector<8x128xf32>
      %c62 = arith.constant 62 : index
      %723 = arith.index_cast %4 : i32 to index
      %c0_155 = arith.constant 0 : index
      %724 = vector.load %arg1[%c62, %723, %c0_155] : memref<70x16x128xf32, #tpu.memory_space<vmem>>, vector<1x8x128xf32>
      %725 = vector.shape_cast %724 : vector<1x8x128xf32> to vector<8x128xf32>
      %726 = arith.mulf %578, %725 : vector<8x128xf32>
      %c63 = arith.constant 63 : index
      %727 = arith.index_cast %4 : i32 to index
      %c0_156 = arith.constant 0 : index
      %728 = vector.load %arg1[%c63, %727, %c0_156] : memref<70x16x128xf32, #tpu.memory_space<vmem>>, vector<1x8x128xf32>
      %729 = vector.shape_cast %728 : vector<1x8x128xf32> to vector<8x128xf32>
      %730 = arith.mulf %578, %729 : vector<8x128xf32>
      %731 = arith.mulf %722, %722 : vector<8x128xf32>
      %732 = arith.mulf %726, %726 : vector<8x128xf32>
      %733 = arith.addf %731, %732 : vector<8x128xf32>
      %734 = arith.mulf %730, %730 : vector<8x128xf32>
      %735 = arith.addf %733, %734 : vector<8x128xf32>
      %cst_157 = arith.constant 9.99999996E-13 : f32
      %736 = vector.broadcast %cst_157 : f32 to vector<8x128xf32>
      %737 = arith.cmpf olt, %735, %736 : vector<8x128xf32>
      %cst_158 = arith.constant 1.000000e+00 : f32
      %738 = vector.broadcast %cst_158 : f32 to vector<8x128xf32>
      %739 = arith.select %737, %738, %735 : vector<8x128xi1>, vector<8x128xf32>
      %740 = math.rsqrt %739 : vector<8x128xf32>
      %741 = arith.mulf %739, %740 : vector<8x128xf32>
      %cst_159 = arith.constant 0.166666672 : f32
      %742 = vector.broadcast %cst_159 : f32 to vector<8x128xf32>
      %743 = arith.mulf %735, %742 : vector<8x128xf32>
      %cst_160 = arith.constant 1.000000e+00 : f32
      %744 = vector.broadcast %cst_160 : f32 to vector<8x128xf32>
      %745 = arith.subf %744, %743 : vector<8x128xf32>
      %746 = math.sin %741 : vector<8x128xf32>
      %747 = arith.mulf %746, %740 : vector<8x128xf32>
      %748 = arith.select %737, %745, %747 : vector<8x128xi1>, vector<8x128xf32>
      %cst_161 = arith.constant 0.0416666679 : f32
      %749 = vector.broadcast %cst_161 : f32 to vector<8x128xf32>
      %750 = arith.mulf %735, %749 : vector<8x128xf32>
      %cst_162 = arith.constant 5.000000e-01 : f32
      %751 = vector.broadcast %cst_162 : f32 to vector<8x128xf32>
      %752 = arith.subf %751, %750 : vector<8x128xf32>
      %753 = math.cos %741 : vector<8x128xf32>
      %cst_163 = arith.constant 1.000000e+00 : f32
      %754 = vector.broadcast %cst_163 : f32 to vector<8x128xf32>
      %755 = arith.subf %754, %753 : vector<8x128xf32>
      %756 = arith.mulf %740, %740 : vector<8x128xf32>
      %757 = arith.mulf %755, %756 : vector<8x128xf32>
      %758 = arith.select %737, %752, %757 : vector<8x128xi1>, vector<8x128xf32>
      %759 = arith.mulf %726, %718 : vector<8x128xf32>
      %760 = arith.mulf %730, %714 : vector<8x128xf32>
      %761 = arith.subf %759, %760 : vector<8x128xf32>
      %762 = arith.mulf %730, %710 : vector<8x128xf32>
      %763 = arith.mulf %722, %718 : vector<8x128xf32>
      %764 = arith.subf %762, %763 : vector<8x128xf32>
      %765 = arith.mulf %722, %714 : vector<8x128xf32>
      %766 = arith.mulf %726, %710 : vector<8x128xf32>
      %767 = arith.subf %765, %766 : vector<8x128xf32>
      %768 = arith.mulf %726, %767 : vector<8x128xf32>
      %769 = arith.mulf %730, %764 : vector<8x128xf32>
      %770 = arith.subf %768, %769 : vector<8x128xf32>
      %771 = arith.mulf %730, %761 : vector<8x128xf32>
      %772 = arith.mulf %722, %767 : vector<8x128xf32>
      %773 = arith.subf %771, %772 : vector<8x128xf32>
      %774 = arith.mulf %722, %764 : vector<8x128xf32>
      %775 = arith.mulf %726, %761 : vector<8x128xf32>
      %776 = arith.subf %774, %775 : vector<8x128xf32>
      %777 = arith.mulf %748, %761 : vector<8x128xf32>
      %778 = arith.subf %710, %777 : vector<8x128xf32>
      %779 = arith.mulf %758, %770 : vector<8x128xf32>
      %780 = arith.addf %778, %779 : vector<8x128xf32>
      %781 = arith.mulf %748, %764 : vector<8x128xf32>
      %782 = arith.subf %714, %781 : vector<8x128xf32>
      %783 = arith.mulf %758, %773 : vector<8x128xf32>
      %784 = arith.addf %782, %783 : vector<8x128xf32>
      %785 = arith.mulf %748, %767 : vector<8x128xf32>
      %786 = arith.subf %718, %785 : vector<8x128xf32>
      %787 = arith.mulf %758, %776 : vector<8x128xf32>
      %788 = arith.addf %786, %787 : vector<8x128xf32>
      %cst_164 = arith.constant 0.00999999977 : f32
      %789 = vector.broadcast %cst_164 : f32 to vector<8x128xf32>
      %790 = arith.subf %780, %789 : vector<8x128xf32>
      %cst_165 = arith.constant 2.000000e-02 : f32
      %791 = vector.broadcast %cst_165 : f32 to vector<8x128xf32>
      %792 = arith.subf %784, %791 : vector<8x128xf32>
      %cst_166 = arith.constant -5.000000e-03 : f32
      %793 = vector.broadcast %cst_166 : f32 to vector<8x128xf32>
      %794 = arith.subf %788, %793 : vector<8x128xf32>
      %cst_167 = arith.constant 496.646759 : f32
      %795 = vector.broadcast %cst_167 : f32 to vector<8x128xf32>
      %796 = arith.mulf %795, %790 : vector<8x128xf32>
      %cst_168 = arith.constant 8.50000381 : f32
      %797 = vector.broadcast %cst_168 : f32 to vector<8x128xf32>
      %798 = arith.mulf %797, %792 : vector<8x128xf32>
      %799 = arith.addf %796, %798 : vector<8x128xf32>
      %cst_169 = arith.constant 325.068817 : f32
      %800 = vector.broadcast %cst_169 : f32 to vector<8x128xf32>
      %801 = arith.mulf %800, %794 : vector<8x128xf32>
      %802 = arith.addf %799, %801 : vector<8x128xf32>
      %cst_170 = arith.constant -17.3739433 : f32
      %803 = vector.broadcast %cst_170 : f32 to vector<8x128xf32>
      %804 = arith.mulf %803, %790 : vector<8x128xf32>
      %cst_171 = arith.constant 494.840179 : f32
      %805 = vector.broadcast %cst_171 : f32 to vector<8x128xf32>
      %806 = arith.mulf %805, %792 : vector<8x128xf32>
      %807 = arith.addf %804, %806 : vector<8x128xf32>
      %cst_172 = arith.constant 249.862671 : f32
      %808 = vector.broadcast %cst_172 : f32 to vector<8x128xf32>
      %809 = arith.mulf %808, %794 : vector<8x128xf32>
      %810 = arith.addf %807, %809 : vector<8x128xf32>
      %cst_173 = arith.constant -0.0096976934 : f32
      %811 = vector.broadcast %cst_173 : f32 to vector<8x128xf32>
      %812 = arith.mulf %811, %790 : vector<8x128xf32>
      %cst_174 = arith.constant -0.0201453194 : f32
      %813 = vector.broadcast %cst_174 : f32 to vector<8x128xf32>
      %814 = arith.mulf %813, %792 : vector<8x128xf32>
      %815 = arith.addf %812, %814 : vector<8x128xf32>
      %cst_175 = arith.constant 9.997500e-01 : f32
      %816 = vector.broadcast %cst_175 : f32 to vector<8x128xf32>
      %817 = arith.mulf %816, %794 : vector<8x128xf32>
      %818 = arith.addf %815, %817 : vector<8x128xf32>
      %819 = tpu.reciprocal %818 {approx = true} : vector<8x128xf32> -> vector<8x128xf32>
      %820 = arith.mulf %818, %819 : vector<8x128xf32>
      %cst_176 = arith.constant 2.000000e+00 : f32
      %821 = vector.broadcast %cst_176 : f32 to vector<8x128xf32>
      %822 = arith.subf %821, %820 : vector<8x128xf32>
      %823 = arith.mulf %819, %822 : vector<8x128xf32>
      %824 = arith.mulf %802, %823 : vector<8x128xf32>
      %c68 = arith.constant 68 : index
      %825 = arith.index_cast %4 : i32 to index
      %c0_177 = arith.constant 0 : index
      %826 = vector.load %arg1[%c68, %825, %c0_177] : memref<70x16x128xf32, #tpu.memory_space<vmem>>, vector<1x8x128xf32>
      %827 = vector.shape_cast %826 : vector<1x8x128xf32> to vector<8x128xf32>
      %828 = arith.subf %824, %827 : vector<8x128xf32>
      %c0_178 = arith.constant 0 : index
      %829 = arith.index_cast %4 : i32 to index
      %c0_179 = arith.constant 0 : index
      %830 = vector.load %arg2[%c0_178, %829, %c0_179] : memref<2x16x128xf32, #tpu.memory_space<vmem>>, vector<1x8x128xf32>
      %831 = vector.shape_cast %830 : vector<1x8x128xf32> to vector<8x128xf32>
      %832 = vector.shape_cast %828 : vector<8x128xf32> to vector<1x8x128xf32>
      tpu.vector_store %arg2[%c0_178, %829, %c0_179], %832 {strides = array<i32>} : memref<2x16x128xf32, #tpu.memory_space<vmem>>, vector<1x8x128xf32>,
      %833 = arith.mulf %810, %823 : vector<8x128xf32>
      %c69 = arith.constant 69 : index
      %834 = arith.index_cast %4 : i32 to index
      %c0_180 = arith.constant 0 : index
      %835 = vector.load %arg1[%c69, %834, %c0_180] : memref<70x16x128xf32, #tpu.memory_space<vmem>>, vector<1x8x128xf32>
      %836 = vector.shape_cast %835 : vector<1x8x128xf32> to vector<8x128xf32>
      %837 = arith.subf %833, %836 : vector<8x128xf32>
      %c1_181 = arith.constant 1 : index
      %838 = arith.index_cast %4 : i32 to index
      %c0_182 = arith.constant 0 : index
      %839 = vector.load %arg2[%c1_181, %838, %c0_182] : memref<2x16x128xf32, #tpu.memory_space<vmem>>, vector<1x8x128xf32>
      %840 = vector.shape_cast %839 : vector<1x8x128xf32> to vector<8x128xf32>
      %841 = vector.shape_cast %837 : vector<8x128xf32> to vector<1x8x128xf32>
      tpu.vector_store %arg2[%c1_181, %838, %c0_182], %841 {strides = array<i32>} : memref<2x16x128xf32, #tpu.memory_space<vmem>>, vector<1x8x128xf32>,
    }
    %c2_i32_0 = arith.constant 2 : i32
    return
  }
  func.func @transform_0(%arg0: i32) -> (i32, i32, i32) {
    %c0_i32 = arith.constant 0 : i32
    %c0_i32_0 = arith.constant 0 : i32
    %c0_i32_1 = arith.constant 0 : i32
    return %c0_i32, %arg0, %c0_i32_0 : i32, i32, i32
  }
  func.func @transform_1(%arg0: i32) -> (i32, i32, i32) {
    %c0_i32 = arith.constant 0 : i32
    %c0_i32_0 = arith.constant 0 : i32
    %c0_i32_1 = arith.constant 0 : i32
    return %c0_i32, %arg0, %c0_i32_0 : i32, i32, i32
  }
}

</mosaic_0001>

<bundles_post_ra>
// kernel: residual_fn.1
= control target key start
LH: loop header
LB: loop body
LE: loop exit
PB: predicated region body
PF: predicated region fallthrough
CT: control target
= control target key end

     0   :  { %s3346_s6 = smov 0   ;;  %s3348_s7 = smov 0   ;;  %s5009_s0 = inlined_call_operand.vmem [shape: f32[70,32,128], index: 0, kind: input, shape index: {}]   ;;  %s5010_s1 = inlined_call_operand.vmem [shape: f32[2,32,128], index: 1, kind: output, shape index: {}]  }
   0x1   :  { %s3350_s8 = smov 0  }
   0x2 LB: > { %s2987_s9 = sadd.s32 4294967295, %s3324_s8   ;;  %s3363_s10 = sadd.s32 1, %s3324_s8   ;;  %s3324_s8 = sphi %s3350_s8, %s5180_s8   ;;  %s3320_s7 = sphi %s3348_s7, %s5179_s7   ;;  %s3316_s6 = sphi %s3346_s6, %s5178_s6  }
   0x3   : > { %s15_s11 = ssub.s32 %s3324_s8, %s3363_s10  ;;  %s18_s12 = sadd.s32 1, %s3320_s7 }
   0x4   : > { %p16_p0 = scmp.eq.s32.totalorder %s15_s11, 0  ;;  %p25_p1 = scmp.ne.s32.totalorder %s3320_s7, %s3316_s6 }
   0x5   : > { %p26_p2 = scmp.eq.s32.totalorder %s3324_s8, 0  ;;  %p55_p3 = scmp.eq.s32.totalorder %s2987_s9, 1 }
   0x6   : > { %s3374_s13 = scalar_select %p16_p0, %s3320_s7, %s18_s12  }
   0x7   : > { %p27_p4 = por %p26_p2, %p25_p1  ;;  %p3376_p5 = por %p55_p3, %p25_p1 }
   0x8   : > { %p2990_p6 = scmp.ge.s32.totalorder %s3324_s8, 2 }
   0xa   : > { %77 = sbr.rel (%p2990_p6) target bundleno = 89 (0x59), region = 16 }
   0xf   : > { %80 = sbr.rel (!%p27_p4) target bundleno = 89 (0x59), region = 20  ;;  %s82_s15 = sand.u32 (%p27_p4), 1, %s3320_s7  }
  0x10   : > { %s3192_s16 = sshll.u32 (%p27_p4), %s3324_s8, 4  ;;  %s3194_s17 = smul.u32 (%p27_p4), 1120, %s82_s15 }
  0x11   : > { %s3386_s20 = scalar_lea.vmem (%p27_p4), %s5009_s0, %s3192_s16 }
  0x12   : > { %v394_v0 = vld [vmem:[%s3386_s20] sm:$0xff] (%p27_p4)  ;;  %v396_v1 = vld [vmem:[%s3386_s20 + $0x8] sm:$0xff] (%p27_p4)  ;;  %s3394_s21 = scalar_lea.vmem (%p27_p4), [#allocation2], %s3194_s17 }
  0x13   : > { %v398_v2 = vld [vmem:[%s3386_s20 + $0x20] sm:$0xff] (%p27_p4)  ;;  %v400_v3 = vld [vmem:[%s3386_s20 + $0x28] sm:$0xff] (%p27_p4)  ;;  %395 = vst [vmem:[%s3394_s21] sm:$0xff] (%p27_p4), %v394_v0  ;;  %397 = vst [vmem:[%s3394_s21 + $0x8] sm:$0xff] (%p27_p4), %v396_v1 }
  0x14   : > { %v402_v4 = vld [vmem:[%s3386_s20 + $0x40] sm:$0xff]  ;;  %v404_v5 = vld [vmem:[%s3386_s20 + $0x48] sm:$0xff]  ;;  %399 = vst [vmem:[%s3394_s21 + $0x10] sm:$0xff] %v398_v2  ;;  %401 = vst [vmem:[%s3394_s21 + $0x18] sm:$0xff] %v400_v3 }
  0x15   : > { %403 = vst [vmem:[%s3394_s21 + $0x20] sm:$0xff] %v402_v4  ;;  %405 = vst [vmem:[%s3394_s21 + $0x28] sm:$0xff] %v404_v5  ;;  %v406_v6 = vld [vmem:[%s3386_s20 + $0x60] sm:$0xff]  ;;  %v408_v7 = vld [vmem:[%s3386_s20 + $0x68] sm:$0xff] }
  0x16   : > { %v410_v8 = vld [vmem:[%s3386_s20 + $0x80] sm:$0xff]  ;;  %407 = vst [vmem:[%s3394_s21 + $0x30] sm:$0xff] %v406_v6  ;;  %409 = vst [vmem:[%s3394_s21 + $0x38] sm:$0xff] %v408_v7  ;;  %v412_v9 = vld [vmem:[%s3386_s20 + $0x88] sm:$0xff] }
  0x17   : > { %411 = vst [vmem:[%s3394_s21 + $0x40] sm:$0xff] %v410_v8  ;;  %v414_v10 = vld [vmem:[%s3386_s20 + $0xa0] sm:$0xff]  ;;  %v416_v11 = vld [vmem:[%s3386_s20 + $0xa8] sm:$0xff]  ;;  %413 = vst [vmem:[%s3394_s21 + $0x48] sm:$0xff] %v412_v9 }
  0x18   : > { %415 = vst [vmem:[%s3394_s21 + $0x50] sm:$0xff] %v414_v10  ;;  %417 = vst [vmem:[%s3394_s21 + $0x58] sm:$0xff] %v416_v11  ;;  %v418_v12 = vld [vmem:[%s3386_s20 + $0xc0] sm:$0xff]  ;;  %v420_v13 = vld [vmem:[%s3386_s20 + $0xc8] sm:$0xff] }
  0x19   : > { %v422_v14 = vld [vmem:[%s3386_s20 + $0xe0] sm:$0xff]  ;;  %419 = vst [vmem:[%s3394_s21 + $0x60] sm:$0xff] %v418_v12  ;;  %421 = vst [vmem:[%s3394_s21 + $0x68] sm:$0xff] %v420_v13  ;;  %v424_v15 = vld [vmem:[%s3386_s20 + $0xe8] sm:$0xff] }
  0x1a   : > { %423 = vst [vmem:[%s3394_s21 + $0x70] sm:$0xff] %v422_v14  ;;  %v426_v16 = vld [vmem:[%s3386_s20 + $0x100] sm:$0xff]  ;;  %v428_v17 = vld [vmem:[%s3386_s20 + $0x108] sm:$0xff]  ;;  %425 = vst [vmem:[%s3394_s21 + $0x78] sm:$0xff] %v424_v15 }
  0x1b   : > { %427 = vst [vmem:[%s3394_s21 + $0x80] sm:$0xff] %v426_v16  ;;  %429 = vst [vmem:[%s3394_s21 + $0x88] sm:$0xff] %v428_v17  ;;  %v430_v18 = vld [vmem:[%s3386_s20 + $0x120] sm:$0xff]  ;;  %v432_v19 = vld [vmem:[%s3386_s20 + $0x128] sm:$0xff] }
  0x1c   : > { %v434_v20 = vld [vmem:[%s3386_s20 + $0x140] sm:$0xff]  ;;  %431 = vst [vmem:[%s3394_s21 + $0x90] sm:$0xff] %v430_v18  ;;  %433 = vst [vmem:[%s3394_s21 + $0x98] sm:$0xff] %v432_v19  ;;  %v436_v21 = vld [vmem:[%s3386_s20 + $0x148] sm:$0xff] }
  0x1d   : > { %435 = vst [vmem:[%s3394_s21 + $0xa0] sm:$0xff] %v434_v20  ;;  %v438_v22 = vld [vmem:[%s3386_s20 + $0x160] sm:$0xff]  ;;  %v440_v23 = vld [vmem:[%s3386_s20 + $0x168] sm:$0xff]  ;;  %437 = vst [vmem:[%s3394_s21 + $0xa8] sm:$0xff] %v436_v21 }
  0x1e   : > { %439 = vst [vmem:[%s3394_s21 + $0xb0] sm:$0xff] %v438_v22  ;;  %441 = vst [vmem:[%s3394_s21 + $0xb8] sm:$0xff] %v440_v23  ;;  %v442_v24 = vld [vmem:[%s3386_s20 + $0x180] sm:$0xff]  ;;  %v444_v25 = vld [vmem:[%s3386_s20 + $0x188] sm:$0xff] }
  0x1f   : > { %v446_v26 = vld [vmem:[%s3386_s20 + $0x1a0] sm:$0xff]  ;;  %443 = vst [vmem:[%s3394_s21 + $0xc0] sm:$0xff] %v442_v24  ;;  %445 = vst [vmem:[%s3394_s21 + $0xc8] sm:$0xff] %v444_v25  ;;  %v448_v27 = vld [vmem:[%s3386_s20 + $0x1a8] sm:$0xff] }
  0x20   : > { %447 = vst [vmem:[%s3394_s21 + $0xd0] sm:$0xff] %v446_v26  ;;  %v450_v28 = vld [vmem:[%s3386_s20 + $0x1c0] sm:$0xff]  ;;  %v452_v29 = vld [vmem:[%s3386_s20 + $0x1c8] sm:$0xff]  ;;  %449 = vst [vmem:[%s3394_s21 + $0xd8] sm:$0xff] %v448_v27 }
  0x21   : > { %451 = vst [vmem:[%s3394_s21 + $0xe0] sm:$0xff] %v450_v28  ;;  %453 = vst [vmem:[%s3394_s21 + $0xe8] sm:$0xff] %v452_v29  ;;  %v454_v30 = vld [vmem:[%s3386_s20 + $0x1e0] sm:$0xff]  ;;  %v456_v31 = vld [vmem:[%s3386_s20 + $0x1e8] sm:$0xff] }
  0x22   : > { %v458_v32 = vld [vmem:[%s3386_s20 + $0x200] sm:$0xff]  ;;  %455 = vst [vmem:[%s3394_s21 + $0xf0] sm:$0xff] %v454_v30  ;;  %457 = vst [vmem:[%s3394_s21 + $0xf8] sm:$0xff] %v456_v31  ;;  %v460_v33 = vld [vmem:[%s3386_s20 + $0x208] sm:$0xff] }
  0x23   : > { %459 = vst [vmem:[%s3394_s21 + $0x100] sm:$0xff] %v458_v32  ;;  %v462_v34 = vld [vmem:[%s3386_s20 + $0x220] sm:$0xff]  ;;  %v464_v35 = vld [vmem:[%s3386_s20 + $0x228] sm:$0xff]  ;;  %461 = vst [vmem:[%s3394_s21 + $0x108] sm:$0xff] %v460_v33 }
  0x24   : > { %463 = vst [vmem:[%s3394_s21 + $0x110] sm:$0xff] %v462_v34  ;;  %465 = vst [vmem:[%s3394_s21 + $0x118] sm:$0xff] %v464_v35  ;;  %v466_v36 = vld [vmem:[%s3386_s20 + $0x240] sm:$0xff]  ;;  %v468_v37 = vld [vmem:[%s3386_s20 + $0x248] sm:$0xff] }
  0x25   : > { %v470_v38 = vld [vmem:[%s3386_s20 + $0x260] sm:$0xff]  ;;  %467 = vst [vmem:[%s3394_s21 + $0x120] sm:$0xff] %v466_v36  ;;  %469 = vst [vmem:[%s3394_s21 + $0x128] sm:$0xff] %v468_v37  ;;  %v472_v39 = vld [vmem:[%s3386_s20 + $0x268] sm:$0xff] }
  0x26   : > { %471 = vst [vmem:[%s3394_s21 + $0x130] sm:$0xff] %v470_v38  ;;  %v474_v40 = vld [vmem:[%s3386_s20 + $0x280] sm:$0xff]  ;;  %v476_v41 = vld [vmem:[%s3386_s20 + $0x288] sm:$0xff]  ;;  %473 = vst [vmem:[%s3394_s21 + $0x138] sm:$0xff] %v472_v39 }
  0x27   : > { %475 = vst [vmem:[%s3394_s21 + $0x140] sm:$0xff] %v474_v40  ;;  %477 = vst [vmem:[%s3394_s21 + $0x148] sm:$0xff] %v476_v41  ;;  %v478_v42 = vld [vmem:[%s3386_s20 + $0x2a0] sm:$0xff]  ;;  %v480_v43 = vld [vmem:[%s3386_s20 + $0x2a8] sm:$0xff] }
  0x28   : > { %v482_v44 = vld [vmem:[%s3386_s20 + $0x2c0] sm:$0xff]  ;;  %479 = vst [vmem:[%s3394_s21 + $0x150] sm:$0xff] %v478_v42  ;;  %481 = vst [vmem:[%s3394_s21 + $0x158] sm:$0xff] %v480_v43  ;;  %v484_v45 = vld [vmem:[%s3386_s20 + $0x2c8] sm:$0xff] }
  0x29   : > { %483 = vst [vmem:[%s3394_s21 + $0x160] sm:$0xff] %v482_v44  ;;  %v486_v46 = vld [vmem:[%s3386_s20 + $0x2e0] sm:$0xff]  ;;  %v488_v47 = vld [vmem:[%s3386_s20 + $0x2e8] sm:$0xff]  ;;  %485 = vst [vmem:[%s3394_s21 + $0x168] sm:$0xff] %v484_v45 }
  0x2a   : > { %487 = vst [vmem:[%s3394_s21 + $0x170] sm:$0xff] %v486_v46  ;;  %489 = vst [vmem:[%s3394_s21 + $0x178] sm:$0xff] %v488_v47  ;;  %v490_v48 = vld [vmem:[%s3386_s20 + $0x300] sm:$0xff]  ;;  %v492_v49 = vld [vmem:[%s3386_s20 + $0x308] sm:$0xff] }
  0x2b   : > { %v494_v50 = vld [vmem:[%s3386_s20 + $0x320] sm:$0xff]  ;;  %491 = vst [vmem:[%s3394_s21 + $0x180] sm:$0xff] %v490_v48  ;;  %493 = vst [vmem:[%s3394_s21 + $0x188] sm:$0xff] %v492_v49  ;;  %v496_v51 = vld [vmem:[%s3386_s20 + $0x328] sm:$0xff] }
  0x2c   : > { %495 = vst [vmem:[%s3394_s21 + $0x190] sm:$0xff] %v494_v50  ;;  %v498_v52 = vld [vmem:[%s3386_s20 + $0x340] sm:$0xff]  ;;  %v500_v53 = vld [vmem:[%s3386_s20 + $0x348] sm:$0xff]  ;;  %497 = vst [vmem:[%s3394_s21 + $0x198] sm:$0xff] %v496_v51 }
  0x2d   : > { %499 = vst [vmem:[%s3394_s21 + $0x1a0] sm:$0xff] %v498_v52  ;;  %501 = vst [vmem:[%s3394_s21 + $0x1a8] sm:$0xff] %v500_v53  ;;  %v502_v54 = vld [vmem:[%s3386_s20 + $0x360] sm:$0xff]  ;;  %v504_v55 = vld [vmem:[%s3386_s20 + $0x368] sm:$0xff] }
  0x2e   : > { %v506_v56 = vld [vmem:[%s3386_s20 + $0x380] sm:$0xff]  ;;  %503 = vst [vmem:[%s3394_s21 + $0x1b0] sm:$0xff] %v502_v54  ;;  %505 = vst [vmem:[%s3394_s21 + $0x1b8] sm:$0xff] %v504_v55  ;;  %v508_v57 = vld [vmem:[%s3386_s20 + $0x388] sm:$0xff] }
  0x2f   : > { %507 = vst [vmem:[%s3394_s21 + $0x1c0] sm:$0xff] %v506_v56  ;;  %v510_v58 = vld [vmem:[%s3386_s20 + $0x3a0] sm:$0xff]  ;;  %v512_v59 = vld [vmem:[%s3386_s20 + $0x3a8] sm:$0xff]  ;;  %509 = vst [vmem:[%s3394_s21 + $0x1c8] sm:$0xff] %v508_v57 }
  0x30   : > { %511 = vst [vmem:[%s3394_s21 + $0x1d0] sm:$0xff] %v510_v58  ;;  %513 = vst [vmem:[%s3394_s21 + $0x1d8] sm:$0xff] %v512_v59  ;;  %v514_v60 = vld [vmem:[%s3386_s20 + $0x3c0] sm:$0xff]  ;;  %v516_v61 = vld [vmem:[%s3386_s20 + $0x3c8] sm:$0xff] }
  0x31   : > { %v518_v62 = vld [vmem:[%s3386_s20 + $0x3e0] sm:$0xff]  ;;  %515 = vst [vmem:[%s3394_s21 + $0x1e0] sm:$0xff] %v514_v60  ;;  %517 = vst [vmem:[%s3394_s21 + $0x1e8] sm:$0xff] %v516_v61  ;;  %v520_v63 = vld [vmem:[%s3386_s20 + $0x3e8] sm:$0xff] }
  0x32   : > { %519 = vst [vmem:[%s3394_s21 + $0x1f0] sm:$0xff] %v518_v62  ;;  %v522_v0 = vld [vmem:[%s3386_s20 + $0x400] sm:$0xff]  ;;  %v524_v1 = vld [vmem:[%s3386_s20 + $0x408] sm:$0xff]  ;;  %521 = vst [vmem:[%s3394_s21 + $0x1f8] sm:$0xff] %v520_v63 }
  0x33   : > { %523 = vst [vmem:[%s3394_s21 + $0x200] sm:$0xff] %v522_v0  ;;  %525 = vst [vmem:[%s3394_s21 + $0x208] sm:$0xff] %v524_v1  ;;  %v526_v2 = vld [vmem:[%s3386_s20 + $0x420] sm:$0xff]  ;;  %v528_v3 = vld [vmem:[%s3386_s20 + $0x428] sm:$0xff] }
  0x34   : > { %v530_v4 = vld [vmem:[%s3386_s20 + $0x440] sm:$0xff]  ;;  %527 = vst [vmem:[%s3394_s21 + $0x210] sm:$0xff] %v526_v2  ;;  %529 = vst [vmem:[%s3394_s21 + $0x218] sm:$0xff] %v528_v3  ;;  %v532_v5 = vld [vmem:[%s3386_s20 + $0x448] sm:$0xff] }
  0x35   : > { %531 = vst [vmem:[%s3394_s21 + $0x220] sm:$0xff] %v530_v4  ;;  %v534_v6 = vld [vmem:[%s3386_s20 + $0x460] sm:$0xff]  ;;  %v536_v7 = vld [vmem:[%s3386_s20 + $0x468] sm:$0xff]  ;;  %533 = vst [vmem:[%s3394_s21 + $0x228] sm:$0xff] %v532_v5 }
  0x36   : > { %535 = vst [vmem:[%s3394_s21 + $0x230] sm:$0xff] %v534_v6  ;;  %537 = vst [vmem:[%s3394_s21 + $0x238] sm:$0xff] %v536_v7  ;;  %v538_v8 = vld [vmem:[%s3386_s20 + $0x480] sm:$0xff]  ;;  %v540_v9 = vld [vmem:[%s3386_s20 + $0x488] sm:$0xff] }
  0x37   : > { %v542_v10 = vld [vmem:[%s3386_s20 + $0x4a0] sm:$0xff]  ;;  %539 = vst [vmem:[%s3394_s21 + $0x240] sm:$0xff] %v538_v8  ;;  %541 = vst [vmem:[%s3394_s21 + $0x248] sm:$0xff] %v540_v9  ;;  %v544_v11 = vld [vmem:[%s3386_s20 + $0x4a8] sm:$0xff] }
  0x38   : > { %543 = vst [vmem:[%s3394_s21 + $0x250] sm:$0xff] %v542_v10  ;;  %v546_v12 = vld [vmem:[%s3386_s20 + $0x4c0] sm:$0xff]  ;;  %v548_v13 = vld [vmem:[%s3386_s20 + $0x4c8] sm:$0xff]  ;;  %545 = vst [vmem:[%s3394_s21 + $0x258] sm:$0xff] %v544_v11 }
  0x39   : > { %547 = vst [vmem:[%s3394_s21 + $0x260] sm:$0xff] %v546_v12  ;;  %549 = vst [vmem:[%s3394_s21 + $0x268] sm:$0xff] %v548_v13  ;;  %v550_v14 = vld [vmem:[%s3386_s20 + $0x4e0] sm:$0xff]  ;;  %v552_v15 = vld [vmem:[%s3386_s20 + $0x4e8] sm:$0xff] }
  0x3a   : > { %v554_v16 = vld [vmem:[%s3386_s20 + $0x500] sm:$0xff]  ;;  %551 = vst [vmem:[%s3394_s21 + $0x270] sm:$0xff] %v550_v14  ;;  %553 = vst [vmem:[%s3394_s21 + $0x278] sm:$0xff] %v552_v15  ;;  %v556_v17 = vld [vmem:[%s3386_s20 + $0x508] sm:$0xff] }
  0x3b   : > { %555 = vst [vmem:[%s3394_s21 + $0x280] sm:$0xff] %v554_v16  ;;  %v558_v18 = vld [vmem:[%s3386_s20 + $0x520] sm:$0xff]  ;;  %v560_v19 = vld [vmem:[%s3386_s20 + $0x528] sm:$0xff]  ;;  %557 = vst [vmem:[%s3394_s21 + $0x288] sm:$0xff] %v556_v17 }
  0x3c   : > { %559 = vst [vmem:[%s3394_s21 + $0x290] sm:$0xff] %v558_v18  ;;  %561 = vst [vmem:[%s3394_s21 + $0x298] sm:$0xff] %v560_v19  ;;  %v562_v20 = vld [vmem:[%s3386_s20 + $0x540] sm:$0xff]  ;;  %v564_v21 = vld [vmem:[%s3386_s20 + $0x548] sm:$0xff] }
  0x3d   : > { %v566_v22 = vld [vmem:[%s3386_s20 + $0x560] sm:$0xff]  ;;  %563 = vst [vmem:[%s3394_s21 + $0x2a0] sm:$0xff] %v562_v20  ;;  %565 = vst [vmem:[%s3394_s21 + $0x2a8] sm:$0xff] %v564_v21  ;;  %v568_v23 = vld [vmem:[%s3386_s20 + $0x568] sm:$0xff] }
  0x3e   : > { %567 = vst [vmem:[%s3394_s21 + $0x2b0] sm:$0xff] %v566_v22  ;;  %v570_v24 = vld [vmem:[%s3386_s20 + $0x580] sm:$0xff]  ;;  %v572_v25 = vld [vmem:[%s3386_s20 + $0x588] sm:$0xff]  ;;  %569 = vst [vmem:[%s3394_s21 + $0x2b8] sm:$0xff] %v568_v23 }
  0x3f   : > { %571 = vst [vmem:[%s3394_s21 + $0x2c0] sm:$0xff] %v570_v24  ;;  %573 = vst [vmem:[%s3394_s21 + $0x2c8] sm:$0xff] %v572_v25  ;;  %v574_v26 = vld [vmem:[%s3386_s20 + $0x5a0] sm:$0xff]  ;;  %v576_v27 = vld [vmem:[%s3386_s20 + $0x5a8] sm:$0xff] }
  0x40   : > { %v578_v28 = vld [vmem:[%s3386_s20 + $0x5c0] sm:$0xff]  ;;  %575 = vst [vmem:[%s3394_s21 + $0x2d0] sm:$0xff] %v574_v26  ;;  %577 = vst [vmem:[%s3394_s21 + $0x2d8] sm:$0xff] %v576_v27  ;;  %v580_v29 = vld [vmem:[%s3386_s20 + $0x5c8] sm:$0xff] }
  0x41   : > { %579 = vst [vmem:[%s3394_s21 + $0x2e0] sm:$0xff] %v578_v28  ;;  %v582_v30 = vld [vmem:[%s3386_s20 + $0x5e0] sm:$0xff]  ;;  %v584_v31 = vld [vmem:[%s3386_s20 + $0x5e8] sm:$0xff]  ;;  %581 = vst [vmem:[%s3394_s21 + $0x2e8] sm:$0xff] %v580_v29 }
  0x42   : > { %583 = vst [vmem:[%s3394_s21 + $0x2f0] sm:$0xff] %v582_v30  ;;  %585 = vst [vmem:[%s3394_s21 + $0x2f8] sm:$0xff] %v584_v31  ;;  %v586_v32 = vld [vmem:[%s3386_s20 + $0x600] sm:$0xff]  ;;  %v588_v33 = vld [vmem:[%s3386_s20 + $0x608] sm:$0xff] }
  0x43   : > { %v590_v34 = vld [vmem:[%s3386_s20 + $0x620] sm:$0xff]  ;;  %587 = vst [vmem:[%s3394_s21 + $0x300] sm:$0xff] %v586_v32  ;;  %589 = vst [vmem:[%s3394_s21 + $0x308] sm:$0xff] %v588_v33  ;;  %v592_v35 = vld [vmem:[%s3386_s20 + $0x628] sm:$0xff] }
  0x44   : > { %591 = vst [vmem:[%s3394_s21 + $0x310] sm:$0xff] %v590_v34  ;;  %v594_v36 = vld [vmem:[%s3386_s20 + $0x640] sm:$0xff]  ;;  %v596_v37 = vld [vmem:[%s3386_s20 + $0x648] sm:$0xff]  ;;  %593 = vst [vmem:[%s3394_s21 + $0x318] sm:$0xff] %v592_v35 }
  0x45   : > { %595 = vst [vmem:[%s3394_s21 + $0x320] sm:$0xff] %v594_v36  ;;  %597 = vst [vmem:[%s3394_s21 + $0x328] sm:$0xff] %v596_v37  ;;  %v598_v38 = vld [vmem:[%s3386_s20 + $0x660] sm:$0xff]  ;;  %v600_v39 = vld [vmem:[%s3386_s20 + $0x668] sm:$0xff] }
  0x46   : > { %v602_v40 = vld [vmem:[%s3386_s20 + $0x680] sm:$0xff]  ;;  %599 = vst [vmem:[%s3394_s21 + $0x330] sm:$0xff] %v598_v38  ;;  %601 = vst [vmem:[%s3394_s21 + $0x338] sm:$0xff] %v600_v39  ;;  %v604_v41 = vld [vmem:[%s3386_s20 + $0x688] sm:$0xff] }
  0x47   : > { %603 = vst [vmem:[%s3394_s21 + $0x340] sm:$0xff] %v602_v40  ;;  %v606_v42 = vld [vmem:[%s3386_s20 + $0x6a0] sm:$0xff]  ;;  %v608_v43 = vld [vmem:[%s3386_s20 + $0x6a8] sm:$0xff]  ;;  %605 = vst [vmem:[%s3394_s21 + $0x348] sm:$0xff] %v604_v41 }
  0x48   : > { %607 = vst [vmem:[%s3394_s21 + $0x350] sm:$0xff] %v606_v42  ;;  %609 = vst [vmem:[%s3394_s21 + $0x358] sm:$0xff] %v608_v43  ;;  %v610_v44 = vld [vmem:[%s3386_s20 + $0x6c0] sm:$0xff]  ;;  %v612_v45 = vld [vmem:[%s3386_s20 + $0x6c8] sm:$0xff] }
  0x49   : > { %v614_v46 = vld [vmem:[%s3386_s20 + $0x6e0] sm:$0xff]  ;;  %611 = vst [vmem:[%s3394_s21 + $0x360] sm:$0xff] %v610_v44  ;;  %613 = vst [vmem:[%s3394_s21 + $0x368] sm:$0xff] %v612_v45  ;;  %v616_v47 = vld [vmem:[%s3386_s20 + $0x6e8] sm:$0xff] }
  0x4a   : > { %615 = vst [vmem:[%s3394_s21 + $0x370] sm:$0xff] %v614_v46  ;;  %v618_v48 = vld [vmem:[%s3386_s20 + $0x700] sm:$0xff]  ;;  %v620_v49 = vld [vmem:[%s3386_s20 + $0x708] sm:$0xff]  ;;  %617 = vst [vmem:[%s3394_s21 + $0x378] sm:$0xff] %v616_v47 }
  0x4b   : > { %619 = vst [vmem:[%s3394_s21 + $0x380] sm:$0xff] %v618_v48  ;;  %621 = vst [vmem:[%s3394_s21 + $0x388] sm:$0xff] %v620_v49  ;;  %v622_v50 = vld [vmem:[%s3386_s20 + $0x720] sm:$0xff]  ;;  %v624_v51 = vld [vmem:[%s3386_s20 + $0x728] sm:$0xff] }
  0x4c   : > { %v626_v52 = vld [vmem:[%s3386_s20 + $0x740] sm:$0xff]  ;;  %623 = vst [vmem:[%s3394_s21 + $0x390] sm:$0xff] %v622_v50  ;;  %625 = vst [vmem:[%s3394_s21 + $0x398] sm:$0xff] %v624_v51  ;;  %v628_v53 = vld [vmem:[%s3386_s20 + $0x748] sm:$0xff] }
  0x4d   : > { %627 = vst [vmem:[%s3394_s21 + $0x3a0] sm:$0xff] %v626_v52  ;;  %v630_v54 = vld [vmem:[%s3386_s20 + $0x760] sm:$0xff]  ;;  %v632_v55 = vld [vmem:[%s3386_s20 + $0x768] sm:$0xff]  ;;  %629 = vst [vmem:[%s3394_s21 + $0x3a8] sm:$0xff] %v628_v53 }
  0x4e   : > { %631 = vst [vmem:[%s3394_s21 + $0x3b0] sm:$0xff] %v630_v54  ;;  %633 = vst [vmem:[%s3394_s21 + $0x3b8] sm:$0xff] %v632_v55  ;;  %v634_v56 = vld [vmem:[%s3386_s20 + $0x780] sm:$0xff]  ;;  %v636_v57 = vld [vmem:[%s3386_s20 + $0x788] sm:$0xff] }
  0x4f   : > { %v638_v58 = vld [vmem:[%s3386_s20 + $0x7a0] sm:$0xff]  ;;  %635 = vst [vmem:[%s3394_s21 + $0x3c0] sm:$0xff] %v634_v56  ;;  %637 = vst [vmem:[%s3394_s21 + $0x3c8] sm:$0xff] %v636_v57  ;;  %v640_v59 = vld [vmem:[%s3386_s20 + $0x7a8] sm:$0xff] }
  0x50   : > { %639 = vst [vmem:[%s3394_s21 + $0x3d0] sm:$0xff] %v638_v58  ;;  %v642_v60 = vld [vmem:[%s3386_s20 + $0x7c0] sm:$0xff]  ;;  %v644_v61 = vld [vmem:[%s3386_s20 + $0x7c8] sm:$0xff]  ;;  %641 = vst [vmem:[%s3394_s21 + $0x3d8] sm:$0xff] %v640_v59 }
  0x51   : > { %643 = vst [vmem:[%s3394_s21 + $0x3e0] sm:$0xff] %v642_v60  ;;  %645 = vst [vmem:[%s3394_s21 + $0x3e8] sm:$0xff] %v644_v61  ;;  %v646_v62 = vld [vmem:[%s3386_s20 + $0x7e0] sm:$0xff]  ;;  %v648_v63 = vld [vmem:[%s3386_s20 + $0x7e8] sm:$0xff] }
  0x52   : > { %v650_v0 = vld [vmem:[%s3386_s20 + $0x800] sm:$0xff]  ;;  %647 = vst [vmem:[%s3394_s21 + $0x3f0] sm:$0xff] %v646_v62  ;;  %649 = vst [vmem:[%s3394_s21 + $0x3f8] sm:$0xff] %v648_v63  ;;  %v652_v1 = vld [vmem:[%s3386_s20 + $0x808] sm:$0xff] }
  0x53   : > { %651 = vst [vmem:[%s3394_s21 + $0x400] sm:$0xff] %v650_v0  ;;  %v654_v2 = vld [vmem:[%s3386_s20 + $0x820] sm:$0xff]  ;;  %v656_v3 = vld [vmem:[%s3386_s20 + $0x828] sm:$0xff]  ;;  %653 = vst [vmem:[%s3394_s21 + $0x408] sm:$0xff] %v652_v1 }
  0x54   : > { %655 = vst [vmem:[%s3394_s21 + $0x410] sm:$0xff] %v654_v2  ;;  %657 = vst [vmem:[%s3394_s21 + $0x418] sm:$0xff] %v656_v3  ;;  %v658_v4 = vld [vmem:[%s3386_s20 + $0x840] sm:$0xff]  ;;  %v660_v5 = vld [vmem:[%s3386_s20 + $0x848] sm:$0xff] }
  0x55   : > { %v662_v6 = vld [vmem:[%s3386_s20 + $0x860] sm:$0xff]  ;;  %659 = vst [vmem:[%s3394_s21 + $0x420] sm:$0xff] %v658_v4  ;;  %661 = vst [vmem:[%s3394_s21 + $0x428] sm:$0xff] %v660_v5  ;;  %v664_v7 = vld [vmem:[%s3386_s20 + $0x868] sm:$0xff] }
  0x56   : > { %663 = vst [vmem:[%s3394_s21 + $0x430] sm:$0xff] %v662_v6  ;;  %v666_v8 = vld [vmem:[%s3386_s20 + $0x880] sm:$0xff]  ;;  %v668_v9 = vld [vmem:[%s3386_s20 + $0x888] sm:$0xff]  ;;  %665 = vst [vmem:[%s3394_s21 + $0x438] sm:$0xff] %v664_v7 }
  0x57   : > { %667 = vst [vmem:[%s3394_s21 + $0x440] sm:$0xff] %v666_v8  ;;  %669 = vst [vmem:[%s3394_s21 + $0x448] sm:$0xff] %v668_v9  ;;  %v670_v10 = vld [vmem:[%s3386_s20 + $0x8a0] sm:$0xff]  ;;  %v672_v11 = vld [vmem:[%s3386_s20 + $0x8a8] sm:$0xff] }
  0x58   : > { %671 = vst [vmem:[%s3394_s21 + $0x450] sm:$0xff] %v670_v10  ;;  %673 = vst [vmem:[%s3394_s21 + $0x458] sm:$0xff] %v672_v11 }
  0x59 PF: > { %p2993_p7 = scmp.ge.s32.totalorder %s3324_s8, 1  ;;  %p678_p8 = scmp.lt.s32.totalorder %s3324_s8, 3 }
  0x5b   : > { %p679_p9 = pnand %p2993_p7, %p678_p8 }
  0x5c   : > { %s685_s22 = sand.u32 (!%p679_p9), 1, %s3316_s6   ;;  %s3678_s27 = smov (!%p679_p9), 0  }
  0x5d   : > { %682 = sbr.rel (%p679_p9) target bundleno = 479 (0x1df), region = 58  ;;  %s2994_s24 = sshll.u32 (!%p679_p9), %s685_s22, 5 }
  0x5e   : > { %s3673_s23 = smul.u32 (!%p679_p9), 1120, %s685_s22  ;;  %s3676_s26 = scalar_lea.vmem (!%p679_p9), [#allocation3], %s2994_s24 }
  0x60   : > { %s687_s25 = scalar_lea.vmem (!%p679_p9), [#allocation2], %s3673_s23 }
  0x62 LB: >> { %s2995_s28 = sshll.u32 %s3328_s27, 3  ;;  %s710_s27 = sadd.s32 1, %s3328_s27   ;;  %s3328_s27 = sphi %s3678_s27, %s710_s27  }
  0x63   : >> { %s3688_s29 = scalar_lea.vmem %s687_s25, %s2995_s28 [#allocation2]  ;;  %s2648_s30 = scalar_lea.vmem %s3676_s26, %s2995_s28 [#allocation3] }
  0x64   : >> { %v2997_v12 = vld [vmem:[%s3688_s29 + $0x430] sm:$0xff]  ;;  %v735_v13 = vld [vmem:[%s3688_s29] sm:$0xff]  ;;  %p707_p10 = scmp.ge.s32.totalorder %s710_s27, 2  }
  0x65   : >> { %3258 = vrcp.f32 %v2997_v12  ;;  %v736_v14 = vmul.f32 %v735_v13, %v735_v13  ;;  %v738_v15 = vmul.f32 3.0, %v735_v13  ;;  %v3005_v20 = vld [vmem:[%s3688_s29 + $0x340] sm:$0xff]  ;;  %v3007_v21 = vld [vmem:[%s3688_s29 + $0x350] sm:$0xff] }
  0x66   : >> { %v3009_v26 = vld [vmem:[%s3688_s29 + $0x360] sm:$0xff]  ;;  %v3019_v31 = vld [vmem:[%s3688_s29 + $0x310] sm:$0xff] }
  0x67   : >> { %v737_v16 = vmul.f32 %v736_v14, %v735_v13  ;;  %v739_v17 = vadd.f32 5.0, %v738_v15  ;;  %v740_v18 = vmul.f32 3.0, %v736_v14  ;;  %v744_v19 = vadd.f32 1.0, %v738_v15  ;;  %v3021_v33 = vld [vmem:[%s3688_s29 + $0x320] sm:$0xff]  ;;  %v3023_v34 = vld [vmem:[%s3688_s29 + $0x330] sm:$0xff] }
  0x68   : >> { %v3033_v35 = vld [vmem:[%s3688_s29 + $0x2e0] sm:$0xff]  ;;  %v3035_v40 = vld [vmem:[%s3688_s29 + $0x2f0] sm:$0xff] }
  0x69   : >> { %v741_v22 = vsub.f32 %v739_v17, %v740_v18  ;;  %v745_v23 = vadd.f32 %v744_v19, %v740_v18  ;;  %v746_v24 = vmul.f32 2.0, %v737_v16  ;;  %v749_v25 = vmul.f32 0.16666667, %v737_v16  ;;  %v3037_v41 = vld [vmem:[%s3688_s29 + $0x300] sm:$0xff]  ;;  %v3001_v3 = vld [vmem:[%s3688_s29 + $0x410] sm:$0xff] }
  0x6a   : >> { %v3135_v50 = vld [vmem:[%s3688_s29 + $0x20] sm:$0xff] }
  0x6b   : >> { %v742_v27 = vadd.f32 %v741_v22, %v737_v16  ;;  %v747_v28 = vsub.f32 %v745_v23, %v746_v24  ;;  %v3695_v29 = vmul.f32 %v3005_v20, %v749_v25  ;;  %v3697_v30 = vmul.f32 %v3007_v21, %v749_v25  ;;  %v2999_v2 = vld [vmem:[%s3688_s29 + $0x400] sm:$0xff] }
  0x6c   : >> { %v3700_v32 = vmul.f32 %v3009_v26, %v749_v25  ;;  %v1803_v61 = vmul.f32 %v3135_v50, %v3135_v50  ;;  %v1805_v62 = vmul.f32 3.0, %v3135_v50  ;;  %v3003_v4 = vld [vmem:[%s3688_s29 + $0x420] sm:$0xff] }
  0x6d   : >> { %v743_v36 = vmul.f32 0.16666667, %v742_v27  ;;  %v748_v37 = vmul.f32 0.16666667, %v747_v28  ;;  %v762_v38 = vmul.f32 %v3695_v29, %v3695_v29  ;;  %v763_v39 = vmul.f32 %v3697_v30, %v3697_v30 }
  0x6e   : >> { %v765_v42 = vmul.f32 %v3700_v32, %v3700_v32  ;;  %v1806_v8 = vadd.f32 5.0, %v1805_v62  ;;  %v1807_v9 = vmul.f32 3.0, %v1803_v61  ;;  %v3765_v18 = vmul.f32 %v3135_v50, %v1803_v61  ;;  %v3141_v61 = vld [vmem:[%s3688_s29 + $0x390] sm:$0xff] }
  0x6f   : >> { %v764_v43 = vadd.f32 %v763_v39, %v762_v38  ;;  %v3713_v44 = vmul.f32 %v3019_v31, %v748_v37  ;;  %v3715_v45 = vmul.f32 %v3021_v33, %v748_v37  ;;  %v3717_v46 = vmul.f32 %v3023_v34, %v748_v37 }
  0x70   : >> { %v3719_v47 = vmul.f32 %v3033_v35, %v743_v36  ;;  %v3721_v48 = vmul.f32 %v3035_v40, %v743_v36  ;;  %v3723_v49 = vmul.f32 %v3037_v41, %v743_v36  ;;  %v1808_v19 = vsub.f32 %v1806_v8, %v1807_v9 }
  0x71   : >> { %5082 = vst [vmem:[#allocation4_spill] sm:$0xff] %v3713_v44  ;;  %5083 = vst [vmem:[#allocation5_spill] sm:$0xff] %v3715_v45  ;;  %v3726_v52 = vadd.f32 %v765_v42, %v764_v43  ;;  %v1030_v53 = vmul.f32 %v3713_v44, %v3713_v44  ;;  %v1031_v54 = vmul.f32 %v3715_v45, %v3715_v45  ;;  %v1811_v33 = vadd.f32 1.0, %v1805_v62 }
  0x72   : >> { %5084 = vst [vmem:[#allocation6_spill] sm:$0xff] %v3717_v46  ;;  %5085 = vst [vmem:[#allocation7_spill] sm:$0xff] %v3719_v47  ;;  %v3259_v51 = vpop.eup %3258  ;;  %v1033_v55 = vmul.f32 %v3717_v46, %v3717_v46  ;;  %v1298_v57 = vmul.f32 %v3719_v47, %v3719_v47  ;;  %v1299_v58 = vmul.f32 %v3721_v48, %v3721_v48 }
  0x73   : >> { %5086 = vst [vmem:[#allocation8_spill] sm:$0xff] %v3721_v48  ;;  %5087 = vst [vmem:[#allocation9_spill] sm:$0xff] %v3723_v49  ;;  %v716_v56 = vmul.f32 %v3259_v51, %v2997_v12  ;;  %v1301_v59 = vmul.f32 %v3723_v49, %v3723_v49  ;;  %vm767_vm0 = vcmp.lt.f32.partialorder %v3726_v52, 1e-12  ;;  %v1032_v60 = vadd.f32 %v1031_v54, %v1030_v53  ;;  %v3139_v53 = vld [vmem:[%s3688_s29 + $0x380] sm:$0xff]  ;;  %v3153_v49 = vld [vmem:[%s3688_s29 + $0x3b0] sm:$0xff] }
  0x74   : >> { %v768_v0 = vsel %vm767_vm0, 1.0, %v3726_v52  ;;  %v1300_v1 = vadd.f32 %v1299_v58, %v1298_v57  ;;  %v1809_v31 = vadd.f32 %v1808_v19, %v3765_v18  ;;  %v1812_v50 = vadd.f32 %v1811_v33, %v1807_v9 }
  0x75   : >> { %v717_v63 = vsub.f32 2.0, %v716_v56  ;;  %3260 = vrsqrt.f32 %v768_v0  ;;  %v3747_v5 = vadd.f32 %v1033_v55, %v1032_v60 }
  0x76   : >> { %v3749_v7 = vadd.f32 %v1301_v59, %v1300_v1  ;;  %v1810_v43 = vmul.f32 0.16666667, %v1809_v31 }
  0x77   : >> { %5088 = vst [vmem:[#allocation10_spill] sm:$0xff] %v3747_v5  ;;  %v718_v6 = vmul.f32 %v3259_v51, %v717_v63  ;;  %vm1035_vm1 = vcmp.lt.f32.partialorder %v3747_v5, 1e-12  ;;  %v3137_v51 = vld [vmem:[%s3688_s29 + $0x370] sm:$0xff] }
  0x78   : >> { %v1036_v13 = vsel %vm1035_vm1, 1.0, %v3747_v5  ;;  %vm1303_vm2 = vcmp.lt.f32.partialorder %v3749_v7, 1e-12  ;;  %v3831_v59 = vmul.f32 %v3137_v51, %v1810_v43  ;;  %v3833_v60 = vmul.f32 %v3139_v53, %v1810_v43 }
  0x79   : >> { %v722_v10 = vmul.f32 %v2999_v2, %v718_v6  ;;  %v727_v11 = vmul.f32 %v3001_v3, %v718_v6  ;;  %v732_v12 = vmul.f32 %v3003_v4, %v718_v6  ;;  %3262 = vrsqrt.f32 %v1036_v13 }
  0x7a   : >> { %v1304_v17 = vsel %vm1303_vm2, 1.0, %v3749_v7  ;;  %5090 = vst [vmem:[#allocation12_spill] sm:$0xff] %v3831_v59  ;;  %5091 = vst [vmem:[#allocation13_spill] sm:$0xff] %v3833_v60  ;;  %v3840_v3 = vmul.f32 %v3141_v61, %v1810_v43  ;;  %v1829_v9 = vmul.f32 %v3831_v59, %v3831_v59  ;;  %v5015_v61 = vmov 2475754826  }
  0x7b   : >> { %v3756_v14 = vadd.f32 0.01, %v722_v10  ;;  %v3758_v15 = vadd.f32 0.02, %v727_v11  ;;  %v3760_v16 = vadd.f32 -0.005, %v732_v12  ;;  %3264 = vrsqrt.f32 %v1304_v17 }
  0x7c   : >> { %5092 = vst [vmem:[#allocation14_spill] sm:$0xff] %v3840_v3  ;;  %v1830_v10 = vmul.f32 %v3833_v60, %v3833_v60  ;;  %v3863_v43 = vmul.f32 %v3840_v3, %v3840_v3 }
  0x7d   : >> { %v988_v20 = vmul.f32 %v3697_v30, %v3760_v16  ;;  %v989_v21 = vmul.f32 %v3700_v32, %v3758_v15  ;;  %v991_v22 = vmul.f32 %v3700_v32, %v3756_v14  ;;  %v992_v23 = vmul.f32 %v3695_v29, %v3760_v16 }
  0x7e   : >> { %v994_v24 = vmul.f32 %v3695_v29, %v3758_v15  ;;  %v995_v25 = vmul.f32 %v3697_v30, %v3756_v14  ;;  %v3859_v33 = vadd.f32 %v1830_v10, %v1829_v9 }
  0x7f   : >> { %v3779_v26 = vsub.f32 %v988_v20, %v989_v21  ;;  %v3781_v27 = vsub.f32 %v991_v22, %v992_v23  ;;  %v3151_v20 = vld [vmem:[%s3688_s29 + $0x3a0] sm:$0xff]  ;;  %v3854_v21 = vmul.f32 0.16666667, %v3726_v52 }
  0x80   : >> { %v3783_v28 = vsub.f32 %v994_v24, %v995_v25 }
  0x81   : >> { %v3788_v34 = vmul.f32 %v3781_v27, %v3700_v32  ;;  %v3792_v35 = vmul.f32 %v3779_v26, %v3700_v32  ;;  %v3796_v36 = vmul.f32 %v3781_v27, %v3695_v29  ;;  %v3800_v37 = vmul.f32 %v3779_v26, %v3697_v30 }
  0x82   : >> { %v3804_v38 = vmul.f32 %v3783_v28, %v3697_v30  ;;  %v3808_v39 = vmul.f32 %v3783_v28, %v3695_v29  ;;  %v3810_v40 = vpop.eup %3260  ;;  %v1813_v29 = vmul.f32 2.0, %v3765_v18 }
  0x83   : >> { %5089 = vst [vmem:[#allocation11_spill] sm:$0xff] %v3800_v37  ;;  %v3815_v41 = vmul.f32 %v3810_v40, %v768_v0 }
  0x84   : >> { %v1814_v63 = vsub.f32 %v1812_v50, %v1813_v29 }
  0x85   : >> { %v5012_v54 = vand.u32 2147483647, %v3815_v41  ;;  %v776_v55 = vand.u32 2139095040, %v3815_v41 }
  0x86   : >> { %v3826_v56 = vpop.eup %3262 }
  0x87   : >> { %v777_v57 = vshrl.u32 %v776_v55, 23  ;;  %v3829_v58 = vmul.f32 %v3826_v56, %v1036_v13  ;;  %v780_v62 = vand.u32 8388607, %v5012_v54  ;;  %v3850_v13 = vmul.f32 0.16666667, %v1814_v63 }
  0x88   : >> { %v3842_v4 = vpop.eup %3264  ;;  %v5017_v63 = vmov 2131351028  }
  0x89   : >> { %v3010_v0 = vadd.s32 4294967169, %v777_v57  ;;  %v5011_v1 = vand.u32 2147483647, %v3829_v58  ;;  %v1044_v2 = vand.u32 2139095040, %v3829_v58  ;;  %v781_v11 = vor.u32 8388608, %v780_v62 }
  0x8a   : >> { %v3857_v24 = vmul.f32 %v3842_v4, %v1304_v17  ;;  %v3870_v53 = vmul.f32 %v3151_v20, %v3850_v13  ;;  %v5013_v57 = vmov 683565275  }
  0x8b   : >> { %v783_v6 = vadd.s32 1, %v3010_v0  ;;  %v1048_v8 = vand.u32 8388607, %v5011_v1  ;;  %v1045_v12 = vshrl.u32 %v1044_v2, 23  ;;  %v3865_v50 = vshll.u32 %v781_v11, 8 }
  0x8c   : >> { %5093 = vst [vmem:[#allocation15_spill] sm:$0xff] %v3857_v24  ;;  %5094 = vst [vmem:[#allocation16_spill] sm:$0xff] %v3870_v53  ;;  %v5019_v2 = vmov 2102212464   ;;  %v1312_v10 = vand.u32 2139095040, %v3857_v24 }
  0x8d   : >> { %vm784_vm3 = vcmp.gt.s32.totalorder %v783_v6, 0  ;;  %v1049_v19 = vor.u32 8388608, %v1048_v8  ;;  %v3024_v23 = vadd.s32 4294967169, %v1045_v12  ;;  %v5021_v8 = vmov 920167782  }
  0x8e   : >> { %v785_v22 = vsel %vm784_vm3, %v783_v6, 0 }
  0x8f   : >> { %v786_v25 = vshrl.u32 %v785_v22, 5  ;;  %v787_v31 = vand.u32 31, %v785_v22  ;;  %v1051_v29 = vadd.s32 1, %v3024_v23  ;;  %v3867_v51 = vshll.u32 %v1049_v19, 8 }
  0x90   : >> { %v5027_v23 = vmov 1326507024  }
  0x91   : >> { %v788_v55 = vsub.s32 32, %v787_v31  ;;  %v790_v17 = vshll.u32 %v5013_v57, %v787_v31  ;;  %v793_v62 = vshll.u32 %v5015_v61, %v787_v31  ;;  %v796_v0 = vshll.u32 %v5017_v63, %v787_v31 }
  0x92   : >> { %v799_v6 = vshll.u32 %v5019_v2, %v787_v31  ;;  %v802_v9 = vshll.u32 %v5021_v8, %v787_v31  ;;  %vm805_vm4 = vcmp.lt.s32.totalorder %v786_v25, 1  ;;  %vm806_vm5 = vcmp.lt.s32.totalorder %v786_v25, 2 }
  0x93   : >> { %v789_v11 = vshrl.u32 %v5013_v57, %v788_v55  ;;  %v791_v12 = vshrl.u32 %v5015_v61, %v788_v55  ;;  %v794_v19 = vshrl.u32 %v5017_v63, %v788_v55  ;;  %v797_v20 = vshrl.u32 %v5019_v2, %v788_v55 }
  0x94   : >> { %v800_v22 = vshrl.u32 %v5021_v8, %v788_v55  ;;  %v803_v32 = vshrl.u32 %v5027_v23, %v788_v55  ;;  %vm808_vm6 = vcmp.lt.s32.totalorder %v786_v25, 4  ;;  %vm1052_vm7 = vcmp.gt.s32.totalorder %v1051_v29, 0 }
  0x95   : >> { %v792_v30 = vor.u32 %v791_v12, %v790_v17  ;;  %v795_v31 = vor.u32 %v794_v19, %v793_v62  ;;  %v798_v42 = vor.u32 %v797_v20, %v796_v0  ;;  %vm807_vm8 = vcmp.lt.s32.totalorder %v786_v25, 3 }
  0x96   : >> { %v801_v1 = vor.u32 %v800_v22, %v799_v6  ;;  %v804_v54 = vor.u32 %v803_v32, %v802_v9  ;;  %v1053_v57 = vsel %vm1052_vm7, %v1051_v29, 0  ;;  %v1313_v9 = vshrl.u32 %v1312_v10, 23 }
  0x97   : >> { %v809_v61 = vsel %vm805_vm4, %v789_v11, %v792_v30  ;;  %v810_v63 = vsel %vm808_vm6, %v798_v42, 2102212464  ;;  %v813_v2 = vsel %vm805_vm4, %v792_v30, %v795_v31  ;;  %v817_v8 = vsel %vm805_vm4, %v795_v31, %v798_v42 }
  0x98   : >> { %v811_v59 = vsel %vm807_vm8, %v795_v31, %v810_v63  ;;  %v814_v60 = vsel %vm808_vm6, %v801_v1, 920167782  ;;  %v818_v55 = vsel %vm808_vm6, %v804_v54, 1326507024  ;;  %v1054_v23 = vshrl.u32 %v1053_v57, 5 }
  0x99   : >> { %v812_v17 = vsel %vm806_vm5, %v809_v61, %v811_v59  ;;  %v815_v62 = vsel %vm807_vm8, %v798_v42, %v814_v60  ;;  %v819_v0 = vsel %vm807_vm8, %v801_v1, %v818_v55  ;;  %v1055_v12 = vand.u32 31, %v1053_v57 }
  0x9a   : >> { %v816_v32 = vsel %vm806_vm5, %v813_v2, %v815_v62  ;;  %v820_v29 = vsel %vm806_vm5, %v817_v8, %v819_v0  ;;  %v828_v6 = vmul.u32 %v3865_v50, %v812_v17  ;;  %v5095_v42 = vmov 683565275  }
  0x9b   : >> { %v3892_v30 = vmul.u32.u64.low %v3865_v50, %v820_v29  ;;  %v3893_v11 = vmul.u32.u64.high %v3865_v50, %v820_v29, %v3892_v30  ;;  %v3896_v63 = vmul.u32.u64.low %v3865_v50, %v816_v32  ;;  %v3897_v54 = vmul.u32.u64.high %v3865_v50, %v816_v32, %v3896_v63 }
  0x9c   : >> { %v1056_v59 = vsub.s32 32, %v1055_v12  ;;  %v1058_v60 = vshll.u32 %v5095_v42, %v1055_v12  ;;  %v5096_v1 = vmov 2475754826   ;;  %v5097_v61 = vmov 2131351028  }
  0x9d   : >> { %v1061_v57 = vshll.u32 %v5096_v1, %v1055_v12  ;;  %v1064_v25 = vshll.u32 %v5097_v61, %v1055_v12  ;;  %v5098_v2 = vmov 2102212464   ;;  %v5099_v19 = vmov 920167782  }
  0x9e   : >> { %v1067_v8 = vshll.u32 %v5098_v2, %v1055_v12  ;;  %v1070_v10 = vshll.u32 %v5099_v19, %v1055_v12  ;;  %vm1073_vm9 = vcmp.lt.s32.totalorder %v1054_v23, 1  ;;  %vm1074_vm10 = vcmp.lt.s32.totalorder %v1054_v23, 2 }
  0x9f   : >> { %v1057_v20 = vshrl.u32 %v5095_v42, %v1056_v59  ;;  %v1059_v50 = vshrl.u32 %v5096_v1, %v1056_v59  ;;  %v1062_v22 = vshrl.u32 %v5097_v61, %v1056_v59  ;;  %v1065_v31 = vshrl.u32 %v5098_v2, %v1056_v59 }
  0xa0   : >> { %vm830_vm11 = vc.u32 %v3893_v11, %v3896_v63  ;;  %v831_v55 = vadd.s32 1, %v3897_v54  ;;  %v1068_v17 = vshrl.u32 %v5099_v19, %v1056_v59  ;;  %vm1075_vm12 = vcmp.lt.s32.totalorder %v1054_v23, 3 }
  0xa1   : >> { %v1060_v62 = vor.u32 %v1059_v50, %v1058_v60  ;;  %v1063_v0 = vor.u32 %v1062_v22, %v1061_v57  ;;  %v1066_v12 = vor.u32 %v1065_v31, %v1064_v25  ;;  %v5100_v32 = vmov 1326507024   ;;  %v3155_v50 = vld [vmem:[%s3688_s29 + $0x3c0] sm:$0xff] }
  0xa2   : >> { %v1071_v29 = vshrl.u32 %v5100_v32, %v1056_v59  ;;  %v832_v30 = vsel %vm830_vm11, %v831_v55, %v3897_v54  ;;  %v1069_v3 = vor.u32 %v1068_v17, %v1067_v8  ;;  %vm1076_vm13 = vcmp.lt.s32.totalorder %v1054_v23, 4 }
  0xa3   : >> { %v3038_v47 = vadd.s32 4294967169, %v1313_v9  ;;  %v833_v48 = vadd.s32 %v832_v30, %v828_v6  ;;  %v1077_v45 = vsel %vm1073_vm9, %v1057_v20, %v1060_v62  ;;  %v1078_v46 = vsel %vm1076_vm13, %v1066_v12, 2102212464 }
  0xa4   : >> { %v1072_v44 = vor.u32 %v1071_v29, %v1070_v10  ;;  %v1079_v37 = vsel %vm1075_vm12, %v1063_v0, %v1078_v46  ;;  %v1081_v60 = vsel %vm1073_vm9, %v1060_v62, %v1063_v0  ;;  %v1082_v57 = vsel %vm1076_vm13, %v1069_v3, 920167782 }
  0xa5   : >> { %v1085_v25 = vsel %vm1073_vm9, %v1063_v0, %v1066_v12  ;;  %v834_v59 = vadd.s32 536870912, %v833_v48  ;;  %v1083_v54 = vsel %vm1075_vm12, %v1066_v12, %v1082_v57  ;;  %v3922_v9 = vmul.f32 %v3153_v49, %v3850_v13 }
  0xa6   : >> { %v1086_v8 = vsel %vm1076_vm13, %v1072_v44, 1326507024  ;;  %v1080_v6 = vsel %vm1074_vm10, %v1077_v45, %v1079_v37  ;;  %v1084_v10 = vsel %vm1074_vm10, %v1081_v60, %v1083_v54  ;;  %v5044_v46 = vand.u32 2147483647, %v3857_v24 }
  0xa7   : >> { %5101 = vst [vmem:[#allocation17_spill] sm:$0xff] %v3922_v9  ;;  %v1087_v20 = vsel %vm1075_vm12, %v1069_v3, %v1086_v8  ;;  %v3929_v22 = vshrl.u32 %v834_v59, 30  ;;  %v3933_v55 = vmul.u32.u64.low %v3867_v51, %v1084_v10  ;;  %v3934_v17 = vmul.u32.u64.high %v3867_v51, %v1084_v10, %v3933_v55 }
  0xa8   : >> { %v1088_v31 = vsel %vm1074_vm10, %v1085_v25, %v1087_v20  ;;  %v3938_v44 = vmul.f32 0.041666668, %v3726_v52  ;;  %v1319_v37 = vadd.s32 1, %v3038_v47  ;;  %v3946_v62 = vmul.f32 0.16666667, %v3747_v5 }
  0xa9   : >> { %v3941_v45 = vmul.u32.u64.low %v3867_v51, %v1088_v31  ;;  %v3942_v49 = vmul.u32.u64.high %v3867_v51, %v1088_v31, %v3941_v45  ;;  %v836_v3 = vshll.u32 %v3929_v22, 30  ;;  %v3950_v23 = vadd.f32 %v3863_v43, %v3859_v33 }
  0xaa   : >> { %5102 = vst [vmem:[#allocation18_spill] sm:$0xff] %v3946_v62  ;;  %v3953_v0 = vmul.f32 %v3155_v50, %v3850_v13  ;;  %v1096_v12 = vmul.u32 %v3867_v51, %v1080_v6  ;;  %vm1320_vm14 = vcmp.gt.s32.totalorder %v1319_v37, 0  ;;  %v2097_v29 = vmul.f32 %v3870_v53, %v3870_v53  ;;  %v3986_v45 = vld [vmem:[%s3688_s29 + $0x10] sm:$0xff] }
  0xab   : >> { %5103 = vst [vmem:[#allocation19_spill] sm:$0xff] %v3950_v23  ;;  %v2098_v47 = vmul.f32 %v3922_v9, %v3922_v9  ;;  %v3960_v30 = vsub.s32 %v833_v48, %v836_v3  ;;  %v1099_v60 = vadd.s32 1, %v3934_v17  ;;  %v1316_v33 = vand.u32 8388607, %v5044_v46 }
  0xac   : >> { %5104 = vst [vmem:[#allocation20_spill] sm:$0xff] %v3953_v0  ;;  %v1321_v43 = vsel %vm1320_vm14, %v1319_v37, 0  ;;  %vm1098_vm15 = vc.u32 %v3942_v49, %v3933_v55  ;;  %v3968_v13 = vmul.f32 0.041666668, %v3747_v5  ;;  %v3971_v51 = vmul.f32 0.16666667, %v3749_v7 }
  0xad   : >> { %v3974_v57 = vmul.f32 0.16666667, %v3765_v18  ;;  %v839_v25 = vsub.s32 0, %v3960_v30  ;;  %v1100_v59 = vsel %vm1098_vm15, %v1099_v60, %v3934_v17  ;;  %v2100_v54 = vmul.f32 %v3953_v0, %v3953_v0 }
  0xae   : >> { %5105 = vst [vmem:[#allocation21_spill] sm:$0xff] %v3968_v13  ;;  %5106 = vst [vmem:[#allocation22_spill] sm:$0xff] %v3971_v51  ;;  %v1101_v8 = vadd.s32 %v1100_v59, %v1096_v12  ;;  %v1323_v6 = vand.u32 31, %v1321_v43  ;;  %vm1834_vm3 = vcmp.lt.f32.partialorder %v3950_v23, 1e-12  ;;  %v2099_v10 = vadd.f32 %v2098_v47, %v2097_v29 }
  0xaf   : >> { %5107 = vst [vmem:[#allocation23_spill] sm:$0xff] %v3974_v57  ;;  %v3011_v20 = vmin.u32 %v839_v25, %v3960_v30  ;;  %v1317_v31 = vor.u32 8388608, %v1316_v33  ;;  %vm775_vm4 = vcmp.lt.s32.totalorder %v3815_v41, 0  ;;  %v3993_v29 = vmul.f32 %v3810_v40, %v3810_v40 }
  0xb0   : >> { %v1102_v37 = vadd.s32 536870912, %v1101_v8  ;;  %v1324_v60 = vsub.s32 32, %v1323_v6  ;;  %v3998_v47 = vsel %vm1834_vm3, 1.0, %v3950_v23  ;;  %v4004_v25 = vmul.f32 %v3986_v45, %v3986_v45 }
  0xb1   : >> { %v841_v12 = vclz %v3011_v20  ;;  %v4007_v59 = vmul.f32 3.0, %v3986_v45  ;;  %v4009_v3 = vadd.f32 %v2100_v54, %v2099_v10  ;;  %v829_v20 = vadd.s32 %v3896_v63, %v3893_v11 }
  0xb2   : >> { %v4000_v33 = vshrl.u32 %v1102_v37, 30  ;;  %v859_v46 = vsub.s32 4, %v3929_v22  ;;  %v4014_v18 = vshll.u32 %v1317_v31, 8  ;;  %v4017_v50 = vshrl.u32 %v1321_v43, 5 }
  0xb3   : >> { %5108 = vst [vmem:[#allocation24_spill] sm:$0xff] %v4009_v3  ;;  %v3012_v17 = vadd.s32 4294967294, %v841_v12  ;;  %v1326_v48 = vshll.u32 %v5095_v42, %v1323_v6  ;;  %v1327_v9 = vshrl.u32 %v5096_v1, %v1324_v60  ;;  %v1329_v54 = vshll.u32 %v5096_v1, %v1323_v6 }
  0xb4   : >> { %v1104_v37 = vshll.u32 %v4000_v33, 30  ;;  %v1330_v10 = vshrl.u32 %v5097_v61, %v1324_v60  ;;  %v1332_v11 = vshll.u32 %v5097_v61, %v1323_v6  ;;  %v1335_v31 = vshll.u32 %v5098_v2, %v1323_v6 }
  0xb5   : >> { %vm3013_vm5 = vcmp.lt.s32.totalorder %v3012_v17, 0  ;;  %v1336_v53 = vshrl.u32 %v5099_v19, %v1324_v60  ;;  %v1333_v51 = vshrl.u32 %v5098_v2, %v1324_v60  ;;  %v1338_v1 = vshll.u32 %v5099_v19, %v1323_v6 }
  0xb6   : >> { %v844_v63 = vsel %vm3013_vm5, 0, %v3012_v17  ;;  %v4024_v12 = vsub.s32 %v1101_v8, %v1104_v37  ;;  %v1560_v13 = vsub.f32 1.0, %v4007_v59  ;;  %v4034_v17 = vmul.f32 3.0, %v4004_v25 }
  0xb7   : >> { %v845_v43 = vsub.s32 32, %v844_v63  ;;  %v846_v0 = vshll.u32 %v3960_v30, %v844_v63  ;;  %v849_v23 = vsub.s32 4294967266, %v844_v63  ;;  %v860_v61 = vsel %vm775_vm4, %v859_v46, %v3929_v22 }
  0xb8   : >> { %v1107_v57 = vsub.s32 0, %v4024_v12  ;;  %v1339_v30 = vshrl.u32 %v5100_v32, %v1324_v60  ;;  %v1328_v2 = vor.u32 %v1327_v9, %v1326_v48  ;;  %v1331_v5 = vor.u32 %v1330_v10, %v1329_v54 }
  0xb9   : >> { %v847_v8 = vshrl.u32 %v829_v20, %v845_v43  ;;  %v850_v37 = vadd.s32 127, %v849_v23  ;;  %v1337_v62 = vor.u32 %v1336_v53, %v1335_v31  ;;  %v5109_v6 = vand.u32 2147483647, %v3815_v41 }
  0xba   : >> { %v3025_v63 = vmin.u32 %v1107_v57, %v4024_v12  ;;  %v1334_v23 = vor.u32 %v1333_v51, %v1332_v11  ;;  %vm1341_vm7 = vcmp.lt.s32.totalorder %v4017_v50, 1  ;;  %v1325_v46 = vshrl.u32 %v5095_v42, %v1324_v60 }
  0xbb   : >> { %vm4043_vm6 = vcmp.le.f32.partialorder %v5109_v6, 0.7853982  ;;  %v848_v24 = vor.u32 %v847_v8, %v846_v0  ;;  %v851_v20 = vshll.u32 %v850_v37, 23  ;;  %v1340_v22 = vor.u32 %v1339_v30, %v1338_v1 }
  0xbc   : >> { %v1109_v43 = vclz %v3025_v63  ;;  %vm1343_vm8 = vcmp.lt.s32.totalorder %v4017_v50, 3  ;;  %vm1342_vm9 = vcmp.lt.s32.totalorder %v4017_v50, 2  ;;  %vm1344_vm10 = vcmp.lt.s32.totalorder %v4017_v50, 4 }
  0xbd   : >> { %v852_v9 = vor.u32 4788187, %v851_v20  ;;  %v855_v57 = vcvt.s32.f32 %v848_v24  ;;  %v1346_v48 = vsel %vm1344_vm10, %v1334_v23, 2102212464  ;;  %v1349_v0 = vsel %vm1341_vm7, %v1328_v2, %v1331_v5 }
  0xbe   : >> { %v3026_v53 = vadd.s32 4294967294, %v1109_v43  ;;  %v1350_v51 = vsel %vm1344_vm10, %v1337_v62, 920167782  ;;  %v1097_v10 = vadd.s32 %v3933_v55, %v3942_v49  ;;  %v1353_v24 = vsel %vm1341_vm7, %v1331_v5, %v1334_v23 }
  0xbf   : >> { %v853_v54 = vand.u32 2147483647, %v852_v9  ;;  %v1351_v1 = vsel %vm1343_vm8, %v1334_v23, %v1350_v51  ;;  %v1345_v60 = vsel %vm1341_vm7, %v1325_v46, %v1328_v2  ;;  %v1347_v11 = vsel %vm1343_vm8, %v1331_v5, %v1346_v48 }
  0xc0   : >> { %vm3027_vm11 = vcmp.lt.s32.totalorder %v3026_v53, 0  ;;  %v1354_v31 = vsel %vm1344_vm10, %v1340_v22, 1326507024  ;;  %v1352_v30 = vsel %vm1342_vm9, %v1349_v0, %v1351_v1  ;;  %v1348_v5 = vsel %vm1342_vm9, %v1345_v60, %v1347_v11 }
  0xc1   : >> { %v856_v8 = vmul.f32 %v855_v57, %v853_v54  ;;  %v1112_v37 = vsel %vm3027_vm11, 0, %v3026_v53  ;;  %v1355_v55 = vsel %vm1343_vm8, %v1337_v62, %v1354_v31  ;;  %v862_v57 = vsel %vm4043_vm6, 0, %v860_v61 }
  0xc2   : >> { %v1113_v49 = vsub.s32 32, %v1112_v37  ;;  %v1114_v63 = vshll.u32 %v4024_v12, %v1112_v37  ;;  %v1117_v6 = vsub.s32 4294967266, %v1112_v37  ;;  %v1356_v20 = vsel %vm1342_vm9, %v1353_v24, %v1355_v55 }
  0xc3   : >> { %v857_v2 = vxor.u32 2147483648, %v856_v8  ;;  %v4074_v23 = vmul.u32.u64.low %v4014_v18, %v1356_v20  ;;  %v4075_v43 = vmul.u32.u64.high %v4014_v18, %v1356_v20, %v4074_v23  ;;  %v4087_v50 = vmul.f32 0.041666668, %v3749_v7 }
  0xc4   : >> { %v1115_v46 = vshrl.u32 %v1097_v10, %v1113_v49  ;;  %v1118_v22 = vadd.s32 127, %v1117_v6  ;;  %v4078_v9 = vmul.u32.u64.low %v4014_v18, %v1352_v30  ;;  %v4079_v62 = vmul.u32.u64.high %v4014_v18, %v1352_v30, %v4078_v9 }
  0xc5   : >> { %v858_v12 = vsel %vm775_vm4, %v857_v2, %v856_v8  ;;  %v1558_v53 = vmul.f32 %v3986_v45, %v4004_v25  ;;  %v1127_v54 = vsub.s32 4, %v4000_v33  ;;  %v1364_v10 = vmul.u32 %v4014_v18, %v1348_v5 }
  0xc6   : >> { %v861_v48 = vsel %vm4043_vm6, %v3815_v41, %v858_v12  ;;  %v1116_v0 = vor.u32 %v1115_v46, %v1114_v63  ;;  %v1119_v51 = vshll.u32 %v1118_v22, 23  ;;  %vm1366_vm12 = vc.u32 %v4075_v43, %v4078_v9 }
  0xc7   : >> { %3266 = vcosq.f32 %v861_v48  ;;  %v1562_v61 = vadd.f32 %v4034_v17, %v1560_v13  ;;  %v1367_v45 = vadd.s32 1, %v4079_v62  ;;  %v866_v60 = vadd.s32 3, %v862_v57 }
  0xc8   : >> { %3268 = vsinq.f32 %v861_v48  ;;  %v1120_v1 = vor.u32 4788187, %v1119_v51  ;;  %v1123_v24 = vcvt.s32.f32 %v1116_v0  ;;  %vm1043_vm13 = vcmp.lt.s32.totalorder %v3829_v58, 0 }
  0xc9   : >> { %v1565_v19 = vmul.f32 6.0, %v4004_v25  ;;  %vm2102_vm14 = vcmp.lt.f32.partialorder %v4009_v3, 1e-12  ;;  %v1128_v18 = vsel %vm1043_vm13, %v1127_v54, %v4000_v33  ;;  %v1368_v13 = vsel %vm1366_vm12, %v1367_v45, %v4079_v62 }
  0xca   : >> { %v1121_v11 = vand.u32 2147483647, %v1120_v1  ;;  %v1570_v31 = vadd.f32 1.0, %v4007_v59  ;;  %v4108_v8 = vand.u32 3, %v862_v57  ;;  %v4112_v37 = vmul.f32 %v3826_v56, %v3826_v56  ;;  %v3091_v59 = vld [vmem:[%s3688_s29 + $0x30] sm:$0xff] }
  0xcb   : >> { %v1369_v30 = vadd.s32 %v1368_v13, %v1364_v10  ;;  %3270 = vrsqrt.f32 %v3998_v47  ;;  %v5112_v25 = vand.u32 2147483647, %v3829_v58  ;;  %v1563_v63 = vsub.f32 %v1562_v61, %v1558_v53  ;;  %v3055_v61 = vld [vmem:[%s3688_s29 + $0x40] sm:$0xff] }
  0xcc   : >> { %v1124_v33 = vmul.f32 %v1123_v24, %v1121_v11  ;;  %v4123_v6 = vand.u32 3, %v866_v60  ;;  %v4130_v5 = vsel %vm2102_vm14, 1.0, %v4009_v3  ;;  %v1566_v46 = vsub.f32 4.0, %v1565_v19  ;;  %v3069_v60 = vld [vmem:[%s3688_s29 + $0x50] sm:$0xff]  ;;  %v3083_v19 = vld [vmem:[%s3688_s29 + $0x60] sm:$0xff] }
  0xcd   : >> { %vm4117_vm15 = vcmp.le.f32.partialorder %v5112_v25, 0.7853982  ;;  %v1370_v2 = vadd.s32 536870912, %v1369_v30  ;;  %v1567_v22 = vmul.f32 3.0, %v1558_v53  ;;  %v1571_v62 = vadd.f32 %v1570_v31, %v4034_v17 }
  0xce   : >> { %v1130_v20 = vsel %vm4117_vm15, 0, %v1128_v18  ;;  %v1125_v23 = vxor.u32 2147483648, %v1124_v33  ;;  %vm865_vm4 = vweird.f32 %v3815_v41  ;;  %vm975_vm5 = vcmp.lt.s32.totalorder %v4108_v8, 2  ;;  %v3061_v18 = vld [vmem:[%s3688_s29 + $0xd0] sm:$0xff] }
  0xcf   : >> { %v4135_v12 = vshrl.u32 %v1370_v2, 30  ;;  %v4139_v57 = vmul.f32 %v3842_v4, %v3842_v4  ;;  %v4141_v48 = vmul.f32 %v3091_v59, %v3091_v59  ;;  %vm976_vm6 = vcmp.eq.s32.totalorder %v4108_v8, 0 }
  0xd0   : >> { %v1126_v0 = vsel %vm1043_vm13, %v1125_v23, %v1124_v33  ;;  %v1134_v17 = vadd.s32 3, %v1130_v20  ;;  %v1564_v51 = vmul.f32 0.16666667, %v1563_v63  ;;  %vm868_vm7 = vcmp.lt.s32.totalorder %v4123_v6, 2 }
  0xd1   : >> { %vm979_vm8 = vcmp.eq.s32.totalorder %v4108_v8, 2  ;;  %v1129_v54 = vsel %vm4117_vm15, %v3829_v58, %v1126_v0  ;;  %v1372_v10 = vshll.u32 %v4135_v12, 30  ;;  %v1568_v1 = vadd.f32 %v1567_v22, %v1566_v46 }
  0xd2   : >> { %3272 = vcosq.f32 %v1129_v54  ;;  %v1572_v24 = vsub.f32 %v1571_v62, %v1567_v22  ;;  %v4153_v45 = vmul.f32 0.16666667, %v1558_v53  ;;  %vm869_vm9 = vcmp.eq.s32.totalorder %v4123_v6, 0 }
  0xd3   : >> { %vm872_vm10 = vcmp.eq.s32.totalorder %v4123_v6, 2  ;;  %3274 = vsinq.f32 %v1129_v54  ;;  %v4159_v11 = vsub.s32 %v1369_v30, %v1372_v10  ;;  %v4162_v31 = vand.u32 3, %v1134_v17  ;;  %v3057_v54 = vld [vmem:[%s3688_s29 + $0x70] sm:$0xff] }
  0xd4   : >> { %v3267_v13 = vpop.eup %3266  ;;  %v4164_v25 = vand.u32 3, %v1130_v20  ;;  %v4168_v53 = vadd.s32 %v4078_v9, %v4075_v43  ;;  %v4170_v55 = vmul.f32 %v3055_v61, %v1564_v51  ;;  %v4173_v2 = vmul.f32 %v3069_v60, %v1564_v51  ;;  %v3075_v43 = vld [vmem:[%s3688_s29 + $0xe0] sm:$0xff] }
  0xd5   : >> { %v3269_v33 = vpop.eup %3268  ;;  %v873_v63 = vxor.u32 2147483648, %v3267_v13  ;;  %v1375_v30 = vsub.s32 0, %v4159_v11  ;;  %v4175_v23 = vmul.f32 %v3083_v19, %v1564_v51  ;;  %v4177_v22 = vmul.f32 0.16666667, %v1568_v1  ;;  %v3059_v51 = vld [vmem:[%s3688_s29 + $0xa0] sm:$0xff] }
  0xd6   : >> { %v870_v46 = vxor.u32 2147483648, %v3269_v33  ;;  %v4179_v20 = vmul.f32 0.16666667, %v1572_v24  ;;  %v4182_v62 = vmul.f32 %v3061_v18, %v4153_v45  ;;  %v4193_v10 = vmul.f32 %v3091_v59, %v4141_v48 }
  0xd7   : >> { %v874_v9 = vsel %vm872_vm10, %v873_v63, %v3269_v33  ;;  %v981_v0 = vsel %vm979_vm8, %v873_v63, %v3269_v33  ;;  %v3039_v17 = vmin.u32 %v1375_v30, %v4159_v11  ;;  %vm1137_vm11 = vcmp.eq.s32.totalorder %v4162_v31, 0 }
  0xd8   : >> { %5115 = vst [vmem:[#allocation25_spill] sm:$0xff] %v4182_v62  ;;  %v4195_v61 = vpop.eup %3270  ;;  %v871_v1 = vsel %vm869_vm9, %v3267_v13, %v870_v46  ;;  %v978_v24 = vsel %vm976_vm6, %v3267_v13, %v870_v46  ;;  %vm1140_vm12 = vcmp.eq.s32.totalorder %v4162_v31, 2  ;;  %vm1244_vm13 = vcmp.eq.s32.totalorder %v4164_v25, 0 }
  0xd9   : >> { %5116 = vst [vmem:[#allocation26_spill] sm:$0xff] %v4195_v61  ;;  %v4204_v60 = vmul.f32 3.0, %v3091_v59  ;;  %v4207_v19 = vmul.f32 6.0, %v4141_v48  ;;  %v875_v18 = vsel %vm868_vm7, %v871_v1, %v874_v9  ;;  %v982_v33 = vsel %vm975_vm5, %v978_v24, %v981_v0 }
  0xda   : >> { %vm1136_vm15 = vcmp.lt.s32.totalorder %v4162_v31, 2  ;;  %vm1247_vm6 = vcmp.eq.s32.totalorder %v4164_v25, 2  ;;  %v1377_v13 = vclz %v3039_v17  ;;  %v4216_v63 = vmul.f32 %v3075_v43, %v4153_v45 }
  0xdb   : >> { %v876_v59 = vsel %vm865_vm4, nan, %v875_v18  ;;  %v983_v30 = vsel %vm865_vm4, nan, %v982_v33  ;;  %vm1133_vm8 = vweird.f32 %v3829_v58  ;;  %vm1243_vm7 = vcmp.lt.s32.totalorder %v4164_v25, 2 }
  0xdc   : >> { %5117 = vst [vmem:[#allocation27_spill] sm:$0xff] %v4216_v63  ;;  %v4225_v8 = vmul.f32 %v3057_v54, %v4177_v22  ;;  %v4228_v6 = vmul.f32 %v3059_v51, %v4179_v20  ;;  %v877_v46 = vmul.f32 %v3810_v40, %v876_v59  ;;  %v984_v43 = vsub.f32 1.0, %v983_v30 }
  0xdd   : >> { %v3040_v9 = vadd.s32 4294967294, %v1377_v13  ;;  %v4232_v0 = vmul.f32 3.0, %v4141_v48  ;;  %v1683_v17 = vsub.f32 1.0, %v4204_v60  ;;  %v4238_v24 = vmul.f32 3.0, %v4193_v10 }
  0xde   : >> { %v5118_v54 = vsub.f32 1.0, %v3854_v21  ;;  %v986_v40 = vmul.f32 %v3993_v29, %v984_v43  ;;  %v4246_v48 = vadd.f32 1.0, %v4204_v60  ;;  %v5119_v49 = vsub.f32 0.5, %v3938_v44 }
  0xdf   : >> { %vm3041_vm4 = vcmp.lt.s32.totalorder %v3040_v9, 0  ;;  %v3273_v30 = vpop.eup %3272  ;;  %v1685_v25 = vadd.f32 %v4232_v0, %v1683_v17 }
  0xe0   : >> { %v878_v51 = vsel %vm767_vm0, %v5118_v54, %v877_v46  ;;  %v1380_v59 = vsel %vm3041_vm4, 0, %v3040_v9  ;;  %v987_v21 = vsel %vm767_vm0, %v5119_v49, %v986_v40  ;;  %v3275_v54 = vpop.eup %3274  ;;  %v5121_v9 = vsub.f32 %v3792_v35, %v3808_v39  ;;  %v5122_v49 = vld [vmem:[#allocation11_spill] sm:$0xff] }
  0xe1   : >> { %v1006_v18 = vmul.f32 %v3779_v26, %v878_v51  ;;  %v1010_v33 = vmul.f32 %v3781_v27, %v878_v51  ;;  %v1014_v13 = vmul.f32 %v3783_v28, %v878_v51  ;;  %v1381_v46 = vsub.s32 32, %v1380_v59 }
  0xe2   : >> { %v1382_v29 = vshll.u32 %v4159_v11, %v1380_v59  ;;  %v1385_v43 = vsub.s32 4294967266, %v1380_v59  ;;  %v5120_v26 = vsub.f32 %v3804_v38, %v3788_v34  ;;  %v1012_v44 = vmul.f32 %v5121_v9, %v987_v21  ;;  %v5127_v9 = vld [vmem:[#allocation15_spill] sm:$0xff] }
  0xe3   : >> { %v1007_v60 = vadd.f32 %v1006_v18, %v3756_v14  ;;  %v1011_v28 = vadd.f32 %v1010_v33, %v3758_v15  ;;  %v1015_v52 = vadd.f32 %v1014_v13, %v3760_v16  ;;  %v5123_v51 = vsub.f32 %v3796_v36, %v5122_v49  ;;  %v5124_v33 = vld [vmem:[#allocation6_spill] sm:$0xff] }
  0xe4   : >> { %v1008_v27 = vmul.f32 %v5120_v26, %v987_v21  ;;  %v1138_v40 = vxor.u32 2147483648, %v3275_v54  ;;  %v1141_v59 = vxor.u32 2147483648, %v3273_v30  ;;  %v1383_v18 = vshrl.u32 %v4168_v53, %v1381_v46  ;;  %v5126_v26 = vld [vmem:[#allocation4_spill] sm:$0xff] }
  0xe5   : >> { %v1016_v11 = vmul.f32 %v5123_v51, %v987_v21  ;;  %v1013_v14 = vadd.f32 %v1012_v44, %v1011_v28  ;;  %v1386_v34 = vadd.s32 127, %v1385_v43  ;;  %v5125_v43 = vld [vmem:[#allocation5_spill] sm:$0xff]  ;;  %vm1311_vm0 = vcmp.lt.s32.totalorder %v5127_v9, 0  ;;  %v5128_v51 = vld [vmem:[#allocation18_spill] sm:$0xff] }
  0xe6   : >> { %v1009_v1 = vadd.f32 %v1008_v27, %v1007_v60  ;;  %v1139_v15 = vsel %vm1137_vm11, %v3273_v30, %v1138_v40  ;;  %v1142_v35 = vsel %vm1140_vm12, %v1141_v59, %v3275_v54  ;;  %v1246_v16 = vsel %vm1244_vm13, %v3273_v30, %v1138_v40 }
  0xe7   : >> { %v1017_v38 = vadd.f32 %v1016_v11, %v1015_v52  ;;  %v1143_v36 = vsel %vm1136_vm15, %v1139_v15, %v1142_v35  ;;  %v1249_v39 = vsel %vm1247_vm6, %v1141_v59, %v3275_v54  ;;  %v1257_v13 = vmul.f32 %v5124_v33, %v1013_v14 }
  0xe8   : >> { %v1259_v53 = vmul.f32 %v5124_v33, %v1009_v1  ;;  %v1144_v21 = vsel %vm1133_vm8, nan, %v1143_v36  ;;  %v1250_v46 = vsel %vm1243_vm7, %v1246_v16, %v1249_v39  ;;  %v1262_v54 = vmul.f32 %v5126_v26, %v1013_v14 }
  0xe9   : >> { %v1256_v60 = vmul.f32 %v5125_v43, %v1017_v38  ;;  %v1260_v30 = vmul.f32 %v5126_v26, %v1017_v38  ;;  %v1145_v31 = vmul.f32 %v3826_v56, %v1144_v21  ;;  %v1251_v27 = vsel %vm1133_vm8, nan, %v1250_v46 }
  0xea   : >> { %v1263_v28 = vmul.f32 %v5125_v43, %v1009_v1  ;;  %v1252_v44 = vsub.f32 1.0, %v1251_v27  ;;  %v5129_v11 = vsub.f32 1.0, %v5128_v51  ;;  %v1384_v58 = vor.u32 %v1383_v18, %v1382_v29  ;;  %v3073_v51 = vld [vmem:[%s3688_s29 + $0xb0] sm:$0xff] }
  0xeb   : >> { %v1258_v52 = vsub.f32 %v1256_v60, %v1257_v13  ;;  %v1261_v49 = vsub.f32 %v1259_v53, %v1260_v30  ;;  %v1387_v15 = vshll.u32 %v1386_v34, 23  ;;  %v5131_v17 = vand.u32 2147483647, %v5127_v9  ;;  %v5134_v34 = vld [vmem:[#allocation21_spill] sm:$0xff] }
  0xec   : >> { %v1146_v59 = vsel %vm1035_vm1, %v5129_v11, %v1145_v31  ;;  %v1264_v56 = vsub.f32 %v1262_v54, %v1263_v28  ;;  %v1254_v35 = vmul.f32 %v4112_v37, %v1252_v44  ;;  %v5135_v21 = vsub.f32 0.5, %v5134_v34  ;;  %v3071_v31 = vld [vmem:[%s3688_s29 + $0x80] sm:$0xff] }
  0xed   : >> { %v1266_v16 = vmul.f32 %v1261_v49, %v5124_v33  ;;  %v1268_v36 = vmul.f32 %v1258_v52, %v5124_v33  ;;  %v1271_v39 = vmul.f32 %v1261_v49, %v5126_v26  ;;  %vm4304_vm5 = vcmp.le.f32.partialorder %v5131_v17, 0.7853982 }
  0xee   : >> { %v1265_v53 = vmul.f32 %v1264_v56, %v5125_v43  ;;  %v1269_v29 = vmul.f32 %v1264_v56, %v5126_v26  ;;  %v1272_v18 = vmul.f32 %v1258_v52, %v5125_v43  ;;  %v1274_v37 = vmul.f32 %v1258_v52, %v1146_v59 }
  0xef   : >> { %v1255_v33 = vsel %vm1035_vm1, %v5135_v21, %v1254_v35  ;;  %v1278_v46 = vmul.f32 %v1261_v49, %v1146_v59  ;;  %v1282_v60 = vmul.f32 %v1264_v56, %v1146_v59  ;;  %v1388_v30 = vor.u32 4788187, %v1387_v15 }
  0xf0   : >> { %v1267_v27 = vsub.f32 %v1265_v53, %v1266_v16  ;;  %v1270_v54 = vsub.f32 %v1268_v36, %v1269_v29  ;;  %v1273_v28 = vsub.f32 %v1271_v39, %v1272_v18  ;;  %v1275_v44 = vadd.f32 %v1274_v37, %v1009_v1  ;;  %v5139_v39 = vld [vmem:[#allocation8_spill] sm:$0xff]  ;;  %v5140_v53 = vld [vmem:[#allocation9_spill] sm:$0xff]  ;;  %v5141_v18 = vld [vmem:[#allocation7_spill] sm:$0xff] }
  0xf1   : >> { %v1279_v11 = vadd.f32 %v1278_v46, %v1013_v14  ;;  %v1283_v17 = vadd.f32 %v1282_v60, %v1017_v38  ;;  %v1389_v26 = vand.u32 2147483647, %v1388_v30  ;;  %v1391_v41 = vcvt.s32.f32 %v1384_v58  ;;  %v3085_v46 = vld [vmem:[%s3688_s29 + $0x90] sm:$0xff] }
  0xf2   : >> { %v1276_v43 = vmul.f32 %v1267_v27, %v1255_v33  ;;  %v1280_v52 = vmul.f32 %v1270_v54, %v1255_v33  ;;  %v1284_v3 = vmul.f32 %v1273_v28, %v1255_v33  ;;  %v4318_v34 = vmul.f32 %v3071_v31, %v4177_v22  ;;  %v3087_v31 = vld [vmem:[%s3688_s29 + $0xc0] sm:$0xff] }
  0xf3   : >> { %v1392_v40 = vmul.f32 %v1391_v41, %v1389_v26  ;;  %v5136_v49 = vsub.s32 4, %v4135_v12  ;;  %v4326_v1 = vmul.f32 %v3073_v51, %v4179_v20  ;;  %v4329_v14 = vmul.f32 0.16666667, %v4193_v10  ;;  %v3093_v51 = vld [vmem:[%s3688_s29 + $0x100] sm:$0xff] }
  0xf4   : >> { %v4331_v38 = vadd.f32 %v1276_v43, %v1275_v44  ;;  %v4333_v56 = vadd.f32 %v1280_v52, %v1279_v11  ;;  %v4335_v58 = vadd.f32 %v1284_v3, %v1283_v17  ;;  %v5137_v41 = vsub.f32 4.0, %v4207_v19  ;;  %v3095_v43 = vld [vmem:[%s3688_s29 + $0x130] sm:$0xff] }
  0xf5   : >> { %v1396_v59 = vsel %vm1311_vm0, %v5136_v49, %v4135_v12  ;;  %v1393_v35 = vxor.u32 2147483648, %v1392_v40  ;;  %v1686_v12 = vsub.f32 %v1685_v25, %v4193_v10  ;;  %v1694_v16 = vadd.f32 %v4246_v48, %v4232_v0  ;;  %v3099_v52 = vld [vmem:[%s3688_s29 + $0x190] sm:$0xff] }
  0xf6   : >> { %v1691_v15 = vadd.f32 %v4238_v24, %v5137_v41  ;;  %v4345_v36 = vmul.f32 %v4195_v61, %v3998_v47  ;;  %v1524_v3 = vmul.f32 %v5139_v39, %v4335_v58  ;;  %v1525_v19 = vmul.f32 %v5140_v53, %v4333_v56 }
  0xf7   : >> { %v1527_v29 = vmul.f32 %v5140_v53, %v4331_v38  ;;  %v1528_v10 = vmul.f32 %v5141_v18, %v4335_v58  ;;  %v1394_v0 = vsel %vm1311_vm0, %v1393_v35, %v1392_v40  ;;  %v1398_v47 = vsel %vm4304_vm5, 0, %v1396_v59  ;;  %v3101_v40 = vld [vmem:[%s3688_s29 + $0x110] sm:$0xff]  ;;  %v3107_v35 = vld [vmem:[%s3688_s29 + $0x1a0] sm:$0xff] }
  0xf8   : >> { %5138 = vst [vmem:[#allocation11_spill] sm:$0xff] %v4345_v36  ;;  %v1530_v48 = vmul.f32 %v5141_v18, %v4333_v56  ;;  %v1531_v25 = vmul.f32 %v5139_v39, %v4331_v38  ;;  %v1397_v37 = vsel %vm4304_vm5, %v5127_v9, %v1394_v0  ;;  %v4366_v21 = vsub.f32 %v1524_v3, %v1525_v19  ;;  %v3167_v0 = vld [vmem:[%s3688_s29 + $0x3e0] sm:$0xff] }
  0xf9   : >> { %v4368_v33 = vsub.f32 %v1527_v29, %v1528_v10  ;;  %v1692_v60 = vmul.f32 0.16666667, %v1691_v15  ;;  %3276 = vcosq.f32 %v1397_v37  ;;  %v1687_v27 = vmul.f32 0.16666667, %v1686_v12  ;;  %v3103_v15 = vld [vmem:[%s3688_s29 + $0x140] sm:$0xff]  ;;  %v3111_v10 = vld [vmem:[%s3688_s29 + $0x150] sm:$0xff] }
  0xfa   : >> { %v4371_v30 = vsub.f32 %v1530_v48, %v1531_v25  ;;  %v1695_v54 = vsub.f32 %v1694_v16, %v4238_v24  ;;  %3278 = vsinq.f32 %v1397_v37  ;;  %v4381_v28 = vmul.f32 %v4366_v21, %v5140_v53  ;;  %v3097_v48 = vld [vmem:[%s3688_s29 + $0x160] sm:$0xff] }
  0xfb   : >> { %v4377_v13 = vmul.f32 %v4368_v33, %v5140_v53  ;;  %v4385_v44 = vmul.f32 %v4368_v33, %v5141_v18  ;;  %v4398_v17 = vmul.f32 %v4366_v21, %v5139_v39  ;;  %v4401_v26 = vmul.f32 %v3085_v46, %v4177_v22  ;;  %v3165_v53 = vld [vmem:[%s3688_s29 + $0x3d0] sm:$0xff] }
  0xfc   : >> { %v4390_v11 = vmul.f32 %v4371_v30, %v5139_v39  ;;  %v4394_v24 = vmul.f32 %v4371_v30, %v5141_v18  ;;  %v1402_v49 = vadd.s32 3, %v1398_v47  ;;  %v4406_v59 = vand.u32 3, %v1398_v47  ;;  %v3169_v47 = vld [vmem:[%s3688_s29 + $0x3f0] sm:$0xff] }
  0xfd   : >> { %v4409_v41 = vmul.f32 %v3087_v31, %v4179_v20  ;;  %v5071_v12 = vand.u32 2147483647, %v4345_v36  ;;  %v1843_v3 = vand.u32 2139095040, %v4345_v36  ;;  %v1696_v20 = vmul.f32 0.16666667, %v1695_v54  ;;  %v3105_v46 = vld [vmem:[%s3688_s29 + $0x170] sm:$0xff] }
  0xfe   : >> { %v1701_v19 = vmul.f32 %v3093_v51, %v1687_v27  ;;  %v1705_v29 = vmul.f32 %v3095_v43, %v1692_v60  ;;  %v4423_v18 = vmul.f32 %v3099_v52, %v4329_v14  ;;  %v1721_v25 = vmul.f32 %v3101_v40, %v1687_v27  ;;  %v3109_v54 = vld [vmem:[%s3688_s29 + $0x120] sm:$0xff]  ;;  %v5142_v43 = vld [vmem:[#allocation23_spill] sm:$0xff] }
  0xff   : >> { %v1725_v37 = vmul.f32 %v3103_v15, %v1692_v60  ;;  %v4431_v31 = vmul.f32 %v3107_v35, %v4329_v14  ;;  %v1844_v39 = vshrl.u32 %v1843_v3, 23  ;;  %v1403_v16 = vand.u32 3, %v1402_v49 }
 0x100   : >> { %vm1511_vm1 = vcmp.lt.s32.totalorder %v4406_v59, 2  ;;  %v1847_v51 = vand.u32 8388607, %v5071_v12  ;;  %v4438_v52 = vmul.f32 %v3165_v53, %v5142_v43  ;;  %vm1401_vm9 = vweird.f32 %v5127_v9  ;;  %v3113_v53 = vld [vmem:[%s3688_s29 + $0x180] sm:$0xff] }
 0x101   : >> { %v1745_v40 = vmul.f32 %v3111_v10, %v1692_v60  ;;  %v3142_v15 = vadd.s32 4294967169, %v1844_v39  ;;  %v4442_v22 = vmul.f32 %v3167_v0, %v5142_v43  ;;  %v4445_v35 = vmul.f32 %v3169_v47, %v5142_v43 }
 0x102   : >> { %5143 = vst [vmem:[#allocation6_spill] sm:$0xff] %v4438_v52  ;;  %v1706_v49 = vadd.f32 %v1705_v29, %v1701_v19  ;;  %v1710_v3 = vmul.f32 %v3097_v48, %v1696_v20  ;;  %v1730_v61 = vmul.f32 %v3105_v46, %v1696_v20  ;;  %v2365_v36 = vmul.f32 %v4438_v52, %v4438_v52 }
 0x103   : >> { %5144 = vst [vmem:[#allocation5_spill] sm:$0xff] %v4442_v22  ;;  %5145 = vst [vmem:[#allocation4_spill] sm:$0xff] %v4445_v35  ;;  %v1726_v12 = vadd.f32 %v1725_v37, %v1721_v25  ;;  %v1741_v63 = vmul.f32 %v3109_v54, %v1687_v27  ;;  %v1850_v62 = vadd.s32 1, %v3142_v15  ;;  %v2366_v60 = vmul.f32 %v4442_v22, %v4442_v22 }
 0x104   : >> { %vm1404_vm10 = vcmp.lt.s32.totalorder %v1403_v16, 2  ;;  %vm1405_vm11 = vcmp.eq.s32.totalorder %v1403_v16, 0  ;;  %vm1512_vm12 = vcmp.eq.s32.totalorder %v4406_v59, 0  ;;  %v1848_v39 = vor.u32 8388608, %v1847_v51 }
 0x105   : >> { %vm1408_vm13 = vcmp.eq.s32.totalorder %v1403_v16, 2  ;;  %vm1851_vm15 = vcmp.gt.s32.totalorder %v1850_v62, 0  ;;  %v2367_v19 = vadd.f32 %v2366_v60, %v2365_v36  ;;  %v2368_v29 = vmul.f32 %v4445_v35, %v4445_v35  ;;  %v5150_v35 = vld [vmem:[#allocation22_spill] sm:$0xff] }
 0x106   : >> { %v3277_v10 = vpop.eup %3276  ;;  %vm1515_vm6 = vcmp.eq.s32.totalorder %v4406_v59, 2  ;;  %v4456_v27 = vadd.f32 %v1710_v3, %v1706_v49  ;;  %v4458_v0 = vmul.f32 %v3113_v53, %v1696_v20  ;;  %v1852_v47 = vsel %vm1851_vm15, %v1850_v62, 0 }
 0x107   : >> { %v3279_v48 = vpop.eup %3278  ;;  %v1409_v25 = vxor.u32 2147483648, %v3277_v10  ;;  %v4460_v37 = vadd.f32 %v1730_v61, %v1726_v12  ;;  %v4462_v46 = vadd.f32 %v1745_v40, %v1741_v63  ;;  %v1854_v54 = vand.u32 31, %v1852_v47 }
 0x108   : >> { %v1406_v51 = vxor.u32 2147483648, %v3279_v48  ;;  %v4464_v36 = vshrl.u32 %v1852_v47, 5  ;;  %v4466_v43 = vshll.u32 %v1848_v39, 8  ;;  %3280 = vrsqrt.f32 %v4130_v5 }
 0x109   : >> { %v1410_v15 = vsel %vm1408_vm13, %v1409_v25, %v3279_v48  ;;  %v1517_v49 = vsel %vm1515_vm6, %v1409_v25, %v3279_v48  ;;  %v1855_v20 = vsub.s32 32, %v1854_v54  ;;  %v4470_v3 = vadd.f32 %v2368_v29, %v2367_v19 }
 0x10a   : >> { %v1407_v62 = vsel %vm1405_vm11, %v3277_v10, %v1406_v51  ;;  %v1514_v61 = vsel %vm1512_vm12, %v3277_v10, %v1406_v51  ;;  %v1857_v63 = vshll.u32 %v5095_v42, %v1854_v54  ;;  %v5146_v12 = vmov 2475754826  }
 0x10b   : >> { %v1860_v40 = vshll.u32 %v5146_v12, %v1854_v54  ;;  %v1411_v53 = vsel %vm1404_vm10, %v1407_v62, %v1410_v15  ;;  %v1518_v60 = vsel %vm1511_vm1, %v1514_v61, %v1517_v49  ;;  %v1858_v39 = vshrl.u32 %v5146_v12, %v1855_v20 }
 0x10c   : >> { %v5147_v47 = vmov 2131351028   ;;  %v1412_v19 = vsel %vm1401_vm9, nan, %v1411_v53  ;;  %v1519_v29 = vsel %vm1401_vm9, nan, %v1518_v60  ;;  %v5148_v25 = vmov 2102212464  }
 0x10d   : >> { %v1863_v48 = vshll.u32 %v5147_v47, %v1854_v54  ;;  %v1861_v10 = vshrl.u32 %v5147_v47, %v1855_v20  ;;  %v1864_v51 = vshrl.u32 %v5148_v25, %v1855_v20  ;;  %v1413_v16 = vmul.f32 %v3842_v4, %v1412_v19 }
 0x10e   : >> { %v1520_v15 = vsub.f32 1.0, %v1519_v29  ;;  %v1856_v59 = vshrl.u32 %v5095_v42, %v1855_v20  ;;  %v1866_v49 = vshll.u32 %v5148_v25, %v1854_v54  ;;  %v1859_v62 = vor.u32 %v1858_v39, %v1857_v63 }
 0x10f   : >> { %v1862_v61 = vor.u32 %v1861_v10, %v1860_v40  ;;  %v5149_v22 = vmov 920167782   ;;  %v5151_v9 = vsub.f32 1.0, %v5150_v35  ;;  %v1865_v4 = vor.u32 %v1864_v51, %v1863_v48  ;;  %v3053_v51 = vld [vmem:[%s3688_s29 + $0x1e0] sm:$0xff] }
 0x110   : >> { %v1867_v52 = vshrl.u32 %v5149_v22, %v1855_v20  ;;  %v1869_v53 = vshll.u32 %v5149_v22, %v1854_v54  ;;  %v1522_v47 = vmul.f32 %v4139_v57, %v1520_v15  ;;  %v1870_v19 = vshrl.u32 %v5100_v32, %v1855_v20  ;;  %v3079_v15 = vld [vmem:[%s3688_s29 + $0x230] sm:$0xff] }
 0x111   : >> { %v1414_v60 = vsel %vm1303_vm2, %v5151_v9, %v1413_v16  ;;  %vm1872_vm8 = vcmp.lt.s32.totalorder %v4464_v36, 1  ;;  %v5152_v35 = vsub.f32 0.5, %v4087_v50  ;;  %vm1873_vm7 = vcmp.lt.s32.totalorder %v4464_v36, 2 }
 0x112   : >> { %v1542_v29 = vmul.f32 %v4366_v21, %v1414_v60  ;;  %v1546_v63 = vmul.f32 %v4368_v33, %v1414_v60  ;;  %v1550_v54 = vmul.f32 %v4371_v30, %v1414_v60  ;;  %v1868_v40 = vor.u32 %v1867_v52, %v1866_v49  ;;  %v3051_v52 = vld [vmem:[%s3688_s29 + $0x1d0] sm:$0xff] }
 0x113   : >> { %v1523_v57 = vsel %vm1303_vm2, %v5152_v35, %v1522_v47  ;;  %v1871_v39 = vor.u32 %v1870_v19, %v1869_v53  ;;  %v5153_v33 = vsub.f32 %v4390_v11, %v4377_v13  ;;  %v5154_v50 = vsub.f32 %v4381_v28, %v4394_v24  ;;  %v3049_v47 = vld [vmem:[%s3688_s29 + $0x1c0] sm:$0xff]  ;;  %v3063_v13 = vld [vmem:[%s3688_s29 + $0x1f0] sm:$0xff] }
 0x114   : >> { %v1543_v21 = vadd.f32 %v1542_v29, %v4331_v38  ;;  %v1547_v20 = vadd.f32 %v1546_v63, %v4333_v56  ;;  %v1551_v48 = vadd.f32 %v1550_v54, %v4335_v58  ;;  %v5155_v10 = vsub.f32 %v4385_v44, %v4398_v17  ;;  %v3065_v11 = vld [vmem:[%s3688_s29 + $0x200] sm:$0xff]  ;;  %v3067_v28 = vld [vmem:[%s3688_s29 + $0x210] sm:$0xff] }
 0x115   : >> { %v1544_v30 = vmul.f32 %v5153_v33, %v1523_v57  ;;  %v1548_v7 = vmul.f32 %v5154_v50, %v1523_v57  ;;  %vm1874_vm2 = vcmp.lt.s32.totalorder %v4464_v36, 3  ;;  %vm1875_vm4 = vcmp.lt.s32.totalorder %v4464_v36, 4  ;;  %v3077_v24 = vld [vmem:[%s3688_s29 + $0x220] sm:$0xff]  ;;  %v4534_v17 = vpop.eup %3280 }
 0x116   : >> { %v1552_v38 = vmul.f32 %v5155_v10, %v1523_v57  ;;  %v1876_v58 = vsel %vm1872_vm8, %v1856_v59, %v1859_v62  ;;  %v1877_v44 = vsel %vm1875_vm4, %v1865_v4, 2102212464  ;;  %v3081_v53 = vld [vmem:[%s3688_s29 + $0x240] sm:$0xff]  ;;  %v1880_v60 = vsel %vm1872_vm8, %v1859_v62, %v1862_v61 }
 0x117   : >> { %v1545_v56 = vadd.f32 %v1544_v30, %v1543_v21  ;;  %v1549_v16 = vadd.f32 %v1548_v7, %v1547_v20  ;;  %v1878_v9 = vsel %vm1874_vm2, %v1862_v61, %v1877_v44  ;;  %v1881_v19 = vsel %vm1875_vm4, %v1868_v40, 920167782 }
 0x118   : >> { %v1553_v49 = vadd.f32 %v1552_v38, %v1551_v48  ;;  %v1884_v7 = vsel %vm1872_vm8, %v1862_v61, %v1865_v4  ;;  %v1879_v48 = vsel %vm1873_vm7, %v1876_v58, %v1878_v9  ;;  %v1751_v44 = vadd.f32 %v4458_v0, %v4462_v46 }
 0x119   : >> { %v1578_v29 = vmul.f32 %v3049_v47, %v1545_v56  ;;  %v1582_v63 = vmul.f32 %v3051_v52, %v1549_v16  ;;  %v1612_v54 = vmul.f32 %v3063_v13, %v1545_v56  ;;  %v1616_v59 = vmul.f32 %v3065_v11, %v1549_v16 }
 0x11a   : >> { %v1587_v35 = vmul.f32 %v3053_v51, %v1553_v49  ;;  %v1621_v57 = vmul.f32 %v3067_v28, %v1553_v49  ;;  %v1646_v21 = vmul.f32 %v3077_v24, %v1545_v56  ;;  %v1650_v33 = vmul.f32 %v3079_v15, %v1549_v16  ;;  %v3115_v51 = vld [vmem:[%s3688_s29 + $0x1b0] sm:$0xff] }
 0x11b   : >> { %v1583_v30 = vadd.f32 %v1582_v63, %v1578_v29  ;;  %v1617_v20 = vadd.f32 %v1616_v59, %v1612_v54  ;;  %v1655_v50 = vmul.f32 %v3081_v53, %v1553_v49  ;;  %v1882_v47 = vsel %vm1874_vm2, %v1865_v4, %v1881_v19  ;;  %v3089_v56 = vld [vmem:[%s3688_s29 + $0xf0] sm:$0xff]  ;;  %v3123_v29 = vld [vmem:[%s3688_s29 + $0x260] sm:$0xff] }
 0x11c   : >> { %v1651_v62 = vadd.f32 %v1650_v33, %v1646_v21  ;;  %v1885_v52 = vsel %vm1875_vm4, %v1871_v39, 1326507024  ;;  %v1883_v13 = vsel %vm1873_vm7, %v1880_v60, %v1882_v47  ;;  %v1755_v36 = vmul.f32 %v3115_v51, %v4329_v14  ;;  %v3117_v60 = vld [vmem:[%s3688_s29 + $0x250] sm:$0xff]  ;;  %v3127_v33 = vld [vmem:[%s3688_s29 + $0x2c0] sm:$0xff] }
 0x11d   : >> { %v1588_v10 = vadd.f32 %v1587_v35, %v1583_v30  ;;  %v1622_v38 = vadd.f32 %v1621_v57, %v1617_v20  ;;  %v1886_v11 = vsel %vm1874_vm2, %v1868_v40, %v1885_v52  ;;  %v4576_v49 = vmul.f32 %v4534_v17, %v4130_v5  ;;  %v3125_v63 = vld [vmem:[%s3688_s29 + $0x290] sm:$0xff]  ;;  %v3131_v30 = vld [vmem:[%s3688_s29 + $0x2a0] sm:$0xff] }
 0x11e   : >> { %v1656_v61 = vadd.f32 %v1655_v50, %v1651_v62  ;;  %v1887_v16 = vsel %vm1873_vm7, %v1884_v7, %v1886_v11  ;;  %v4560_v28 = vmul.u32.u64.low %v4466_v43, %v1883_v13  ;;  %v4561_v4 = vmul.u32.u64.high %v4466_v43, %v1883_v13, %v4560_v28  ;;  %v3129_v54 = vld [vmem:[%s3688_s29 + $0x270] sm:$0xff] }
 0x11f   : >> { %v1593_v39 = vadd.f32 %v4170_v55, %v1588_v10  ;;  %v1627_v24 = vadd.f32 %v4173_v2, %v1622_v38  ;;  %v4567_v15 = vmul.u32.u64.low %v4466_v43, %v1887_v16  ;;  %v4568_v58 = vmul.u32.u64.high %v4466_v43, %v1887_v16, %v4567_v15  ;;  %v3121_v21 = vld [vmem:[%s3688_s29 + $0x2b0] sm:$0xff] }
 0x120   : >> { %v1661_v40 = vadd.f32 %v4175_v23, %v1656_v61  ;;  %v1675_v2 = vmul.f32 %v3089_v56, %v4153_v45  ;;  %v1895_v9 = vmul.u32 %v4466_v43, %v1879_v48  ;;  %v1716_v0 = vadd.f32 %v4423_v18, %v4456_v27  ;;  %v3133_v7 = vld [vmem:[%s3688_s29 + $0x2d0] sm:$0xff] }
 0x121   : >> { %v1598_v53 = vadd.f32 %v4225_v8, %v1593_v39  ;;  %v1632_v55 = vadd.f32 %v4318_v34, %v1627_v24  ;;  %v1898_v14 = vadd.s32 1, %v4561_v4  ;;  %vm2370_vm0 = vcmp.lt.f32.partialorder %v4470_v3, 1e-12 }
 0x122   : >> { %v1666_v23 = vadd.f32 %v4401_v26, %v1661_v40  ;;  %v1736_v45 = vadd.f32 %v4431_v31, %v4460_v37  ;;  %vm1897_vm5 = vc.u32 %v4568_v58, %v4560_v28  ;;  %v1756_v26 = vadd.f32 %v1755_v36, %v1751_v44  ;;  %v3119_v31 = vld [vmem:[%s3688_s29 + $0x280] sm:$0xff] }
 0x123   : >> { %v1603_v5 = vadd.f32 %v4228_v6, %v1598_v53  ;;  %v1637_v8 = vadd.f32 %v4326_v1, %v1632_v55  ;;  %v1899_v18 = vsel %vm1897_vm5, %v1898_v14, %v4561_v4  ;;  %v2111_v27 = vand.u32 2139095040, %v4576_v49  ;;  %v5156_v6 = vld [vmem:[#allocation25_spill] sm:$0xff]  ;;  %v5157_v1 = vld [vmem:[#allocation27_spill] sm:$0xff] }
 0x124   : >> { %v1671_v34 = vadd.f32 %v4409_v41, %v1666_v23  ;;  %v1900_v37 = vadd.s32 %v1899_v18, %v1895_v9  ;;  %v4603_v41 = vsel %vm2370_vm0, 1.0, %v4470_v3  ;;  %v5080_v62 = vand.u32 2147483647, %v4576_v49  ;;  %v5158_v9 = vld [vmem:[#allocation14_spill] sm:$0xff]  ;;  %v5159_v14 = vld [vmem:[#allocation13_spill] sm:$0xff] }
 0x125   : >> { %v1608_v46 = vadd.f32 %v5156_v6, %v1603_v5  ;;  %v1642_v43 = vadd.f32 %v5157_v1, %v1637_v8  ;;  %v2112_v59 = vshrl.u32 %v2111_v27, 23  ;;  %3282 = vrsqrt.f32 %v4603_v41  ;;  %v5160_v8 = vld [vmem:[#allocation12_spill] sm:$0xff] }
 0x126   : >> { %v1676_v19 = vadd.f32 %v1675_v2, %v1671_v34  ;;  %v1901_v20 = vadd.s32 536870912, %v1900_v37  ;;  %v2115_v15 = vand.u32 8388607, %v5080_v62 }
 0x127   : >> { %v1717_v35 = vsub.f32 %v1608_v46, %v1716_v0  ;;  %v1737_v57 = vsub.f32 %v1642_v43, %v1736_v45  ;;  %v3156_v48 = vadd.s32 4294967169, %v2112_v59 }
 0x128   : >> { %v1757_v50 = vsub.f32 %v1676_v19, %v1756_v26  ;;  %v4614_v39 = vshrl.u32 %v1901_v20, 30  ;;  %v2116_v27 = vor.u32 8388608, %v2115_v15 }
 0x129   : >> { %v1761_v47 = vmul.f32 %v3117_v60, %v1717_v35  ;;  %v1765_v52 = vmul.f32 %v3119_v31, %v1737_v57  ;;  %v1775_v10 = vmul.f32 %v3123_v29, %v1717_v35  ;;  %v1779_v38 = vmul.f32 %v3125_v63, %v1737_v57 }
 0x12a   : >> { %v1770_v51 = vmul.f32 %v3121_v21, %v1757_v50  ;;  %v1784_v13 = vmul.f32 %v3127_v33, %v1757_v50  ;;  %v1789_v11 = vmul.f32 %v3129_v54, %v1717_v35  ;;  %v1793_v61 = vmul.f32 %v3131_v30, %v1737_v57 }
 0x12b   : >> { %v1766_v56 = vadd.f32 %v1765_v52, %v1761_v47  ;;  %v1780_v16 = vadd.f32 %v1779_v38, %v1775_v10  ;;  %v1798_v4 = vmul.f32 %v3133_v7, %v1757_v50  ;;  %v1903_v36 = vshll.u32 %v4614_v39, 30 }
 0x12c   : >> { %v1794_v24 = vadd.f32 %v1793_v61, %v1789_v11  ;;  %v2118_v53 = vadd.s32 1, %v3156_v48  ;;  %v1896_v29 = vadd.s32 %v4560_v28, %v4568_v58  ;;  %v4655_v54 = vshll.u32 %v2116_v27, 8 }
 0x12d   : >> { %v4618_v40 = vadd.f32 %v1770_v51, %v1766_v56  ;;  %v4620_v44 = vadd.f32 %v1784_v13, %v1780_v16  ;;  %v1904_v2 = vsub.s32 %v1900_v37, %v1903_v36  ;;  %v1926_v58 = vsub.s32 4, %v4614_v39 }
 0x12e   : >> { %v4623_v55 = vadd.f32 %v1798_v4, %v1794_v24  ;;  %vm2119_vm1 = vcmp.gt.s32.totalorder %v2118_v53, 0  ;;  %v5161_v51 = vmov 2131351028  }
 0x12f   : >> { %v2056_v23 = vmul.f32 %v5158_v9, %v4620_v44  ;;  %v2058_v0 = vmul.f32 %v5158_v9, %v4618_v40  ;;  %v2061_v34 = vmul.f32 %v5160_v8, %v4620_v44  ;;  %v1906_v26 = vsub.s32 0, %v1904_v2 }
 0x130   : >> { %v2055_v5 = vmul.f32 %v5159_v14, %v4623_v55  ;;  %v2059_v45 = vmul.f32 %v5160_v8, %v4623_v55  ;;  %v2062_v18 = vmul.f32 %v5159_v14, %v4618_v40  ;;  %v2120_v37 = vsel %vm2119_vm1, %v2118_v53, 0 }
 0x131   : >> { %v3143_v1 = vmin.u32 %v1906_v26, %v1904_v2  ;;  %v2121_v33 = vshrl.u32 %v2120_v37, 5  ;;  %v2122_v30 = vand.u32 31, %v2120_v37 }
 0x132   : >> { %v4637_v6 = vsub.f32 %v2055_v5, %v2056_v23  ;;  %v4639_v46 = vsub.f32 %v2058_v0, %v2059_v45  ;;  %v4641_v43 = vsub.f32 %v2061_v34, %v2062_v18  ;;  %v4651_v19 = vpop.eup %3282 }
 0x133   : >> { %v1908_v63 = vclz %v3143_v1  ;;  %v4682_v48 = vmul.f32 %v4651_v19, %v4603_v41  ;;  %v2123_v47 = vsub.s32 32, %v2122_v30  ;;  %v2125_v52 = vshll.u32 %v5095_v42, %v2122_v30 }
 0x134   : >> { %v4645_v60 = vmul.f32 %v4639_v46, %v5158_v9  ;;  %v4649_v31 = vmul.f32 %v4637_v6, %v5158_v9  ;;  %v4659_v59 = vmul.f32 %v4641_v43, %v5159_v14  ;;  %v4663_v35 = vmul.f32 %v4641_v43, %v5160_v8 }
 0x135   : >> { %v4667_v57 = vmul.f32 %v4639_v46, %v5160_v8  ;;  %v4671_v21 = vmul.f32 %v4637_v6, %v5159_v14  ;;  %v3144_v28 = vadd.s32 4294967294, %v1908_v63  ;;  %v2128_v10 = vshll.u32 %v5146_v12, %v2122_v30 }
 0x136   : >> { %v2066_v20 = vsub.f32 %v4659_v59, %v4645_v60  ;;  %v2069_v50 = vsub.f32 %v4649_v31, %v4663_v35  ;;  %v2131_v13 = vshll.u32 %v5161_v51, %v2122_v30  ;;  %v2134_v11 = vshll.u32 %v5148_v25, %v2122_v30 }
 0x137   : >> { %vm3145_vm9 = vcmp.lt.s32.totalorder %v3144_v28, 0  ;;  %v2137_v61 = vshll.u32 %v5149_v22, %v2122_v30  ;;  %v2124_v24 = vshrl.u32 %v5095_v42, %v2123_v47  ;;  %v2126_v41 = vshrl.u32 %v5146_v12, %v2123_v47 }
 0x138   : >> { %v1911_v38 = vsel %vm3145_vm9, 0, %v3144_v28  ;;  %v2129_v15 = vshrl.u32 %v5161_v51, %v2123_v47  ;;  %v2132_v36 = vshrl.u32 %v5148_v25, %v2123_v47  ;;  %v2135_v53 = vshrl.u32 %v5149_v22, %v2123_v47 }
 0x139   : >> { %v1912_v56 = vsub.s32 32, %v1911_v38  ;;  %v1913_v16 = vshll.u32 %v1904_v2, %v1911_v38  ;;  %v1916_v4 = vsub.s32 4294967266, %v1911_v38  ;;  %v2138_v0 = vshrl.u32 %v5100_v32, %v2123_v47 }
 0x13a   : >> { %vm2140_vm10 = vcmp.lt.s32.totalorder %v2121_v33, 1  ;;  %v2127_v14 = vor.u32 %v2126_v41, %v2125_v52  ;;  %v2130_v5 = vor.u32 %v2129_v15, %v2128_v10  ;;  %v2133_v8 = vor.u32 %v2132_v36, %v2131_v13 }
 0x13b   : >> { %v1914_v9 = vshrl.u32 %v1896_v29, %v1912_v56  ;;  %v1917_v23 = vadd.s32 127, %v1916_v4  ;;  %v2136_v2 = vor.u32 %v2135_v53, %v2134_v11  ;;  %v2139_v26 = vor.u32 %v2138_v0, %v2137_v61  ;;  %v5162_v4 = vld [vmem:[#allocation11_spill] sm:$0xff] }
 0x13c   : >> { %vm2141_vm11 = vcmp.lt.s32.totalorder %v2121_v33, 2  ;;  %vm2142_vm12 = vcmp.lt.s32.totalorder %v2121_v33, 3  ;;  %vm2143_vm13 = vcmp.lt.s32.totalorder %v2121_v33, 4  ;;  %v2144_v18 = vsel %vm2140_vm10, %v2124_v24, %v2127_v14 }
 0x13d   : >> { %v1915_v45 = vor.u32 %v1914_v9, %v1913_v16  ;;  %v1918_v34 = vshll.u32 %v1917_v23, 23  ;;  %v2148_v27 = vsel %vm2140_vm10, %v2127_v14, %v2130_v5  ;;  %v2145_v29 = vsel %vm2143_vm13, %v2133_v8, 2102212464 }
 0x13e   : >> { %v2149_v63 = vsel %vm2143_vm13, %v2136_v2, 920167782  ;;  %v2146_v28 = vsel %vm2142_vm12, %v2130_v5, %v2145_v29  ;;  %v2152_v47 = vsel %vm2140_vm10, %v2130_v5, %v2133_v8  ;;  %v2153_v52 = vsel %vm2143_vm13, %v2139_v26, 1326507024 }
 0x13f   : >> { %v1919_v1 = vor.u32 4788187, %v1918_v34  ;;  %v1922_v37 = vcvt.s32.f32 %v1915_v45  ;;  %v2150_v30 = vsel %vm2142_vm12, %v2133_v8, %v2149_v63  ;;  %v2154_v13 = vsel %vm2142_vm12, %v2136_v2, %v2153_v52 }
 0x140   : >> { %v2151_v38 = vsel %vm2141_vm11, %v2148_v27, %v2150_v30  ;;  %v2147_v11 = vsel %vm2141_vm11, %v2144_v18, %v2146_v28  ;;  %v2155_v61 = vsel %vm2141_vm11, %v2152_v47, %v2154_v13  ;;  %vm1842_vm15 = vcmp.lt.s32.totalorder %v5162_v4, 0  ;;  %v5164_v27 = vld [vmem:[#allocation19_spill] sm:$0xff]  ;;  %v5165_v13 = vld [vmem:[#allocation26_spill] sm:$0xff] }
 0x141   : >> { %v1920_v10 = vand.u32 2147483647, %v1919_v1  ;;  %v4702_v56 = vmul.u32.u64.low %v4655_v54, %v2151_v38  ;;  %v4703_v16 = vmul.u32.u64.high %v4655_v54, %v2151_v38, %v4702_v56  ;;  %v1927_v36 = vsel %vm1842_vm15, %v1926_v58, %v4614_v39 }
 0x142   : >> { %v4707_v41 = vmul.u32.u64.low %v4655_v54, %v2155_v61  ;;  %v4708_v15 = vmul.u32.u64.high %v4655_v54, %v2155_v61, %v4707_v41  ;;  %v2379_v53 = vand.u32 2139095040, %v4682_v48  ;;  %v5163_v9 = vand.u32 2147483647, %v5162_v4 }
 0x143   : >> { %v1923_v24 = vmul.f32 %v1922_v37, %v1920_v10  ;;  %v2163_v23 = vmul.u32 %v4655_v54, %v2147_v11  ;;  %v2166_v0 = vadd.s32 1, %v4703_v16  ;;  %v5079_v26 = vand.u32 2147483647, %v4682_v48 }
 0x144   : >> { %vm1841_vm6 = vcmp.le.f32.partialorder %v5163_v9, 0.7853982  ;;  %v2380_v14 = vshrl.u32 %v2379_v53, 23  ;;  %vm2165_vm8 = vc.u32 %v4708_v15, %v4702_v56  ;;  %v4721_v1 = vmul.f32 0.16666667, %v5164_v27 }
 0x145   : >> { %v1924_v33 = vxor.u32 2147483648, %v1923_v24  ;;  %v1929_v8 = vsel %vm1841_vm6, 0, %v1927_v36  ;;  %v2167_v45 = vsel %vm2165_vm8, %v2166_v0, %v4703_v16  ;;  %v4724_v37 = vmul.f32 0.041666668, %v5164_v27 }
 0x146   : >> { %v3170_v39 = vadd.s32 4294967169, %v2380_v14  ;;  %v2168_v58 = vadd.s32 %v2167_v45, %v2163_v23  ;;  %v1933_v34 = vadd.s32 3, %v1929_v8  ;;  %v2041_v29 = vand.u32 3, %v1929_v8 }
 0x147   : >> { %v1925_v5 = vsel %vm1842_vm15, %v1924_v33, %v1923_v24  ;;  %v2383_v47 = vand.u32 8388607, %v5079_v26  ;;  %v1839_v38 = vsub.f32 1.0, %v4721_v1  ;;  %v4734_v11 = vmul.f32 %v5165_v13, %v5165_v13 }
 0x148   : >> { %v1928_v2 = vsel %vm1841_vm6, %v5162_v4, %v1925_v5  ;;  %v2386_v18 = vadd.s32 1, %v3170_v39  ;;  %v2169_v54 = vadd.s32 536870912, %v2168_v58  ;;  %v1934_v30 = vand.u32 3, %v1933_v34 }
 0x149   : >> { %3284 = vcosq.f32 %v1928_v2  ;;  %vm1932_vm2 = vweird.f32 %v5162_v4  ;;  %v1947_v16 = vsub.f32 0.5, %v4724_v37  ;;  %vm2042_vm4 = vcmp.lt.s32.totalorder %v2041_v29, 2 }
 0x14a   : >> { %3286 = vsinq.f32 %v1928_v2  ;;  %vm2387_vm7 = vcmp.gt.s32.totalorder %v2386_v18, 0  ;;  %v4726_v63 = vshrl.u32 %v2169_v54, 30  ;;  %vm2043_vm5 = vcmp.eq.s32.totalorder %v2041_v29, 0 }
 0x14b   : >> { %v2388_v28 = vsel %vm2387_vm7, %v2386_v18, 0  ;;  %vm1935_vm1 = vcmp.lt.s32.totalorder %v1934_v30, 2  ;;  %vm2046_vm9 = vcmp.eq.s32.totalorder %v2041_v29, 2  ;;  %v2384_v41 = vor.u32 8388608, %v2383_v47 }
 0x14c   : >> { %v2390_v52 = vand.u32 31, %v2388_v28  ;;  %v2171_v10 = vshll.u32 %v4726_v63, 30  ;;  %vm1936_vm10 = vcmp.eq.s32.totalorder %v1934_v30, 0  ;;  %vm1939_vm11 = vcmp.eq.s32.totalorder %v1934_v30, 2 }
 0x14d   : >> { %v4759_v34 = vshll.u32 %v2384_v41, 8  ;;  %v5166_v37 = vsub.f32 %v4667_v57, %v4671_v21 }
 0x14e   : >> { %v2391_v61 = vsub.s32 32, %v2390_v52  ;;  %v4738_v24 = vsub.s32 %v2168_v58, %v2171_v10  ;;  %v2393_v36 = vshll.u32 %v5095_v42, %v2390_v52  ;;  %v2396_v33 = vshll.u32 %v5146_v12, %v2390_v52 }
 0x14f   : >> { %v2399_v23 = vshll.u32 %v5161_v51, %v2390_v52  ;;  %v2402_v5 = vshll.u32 %v5148_v25, %v2390_v52  ;;  %v4751_v45 = vshll.u32 %v5149_v22, %v2390_v52  ;;  %v2164_v58 = vadd.s32 %v4702_v56, %v4708_v15 }
 0x150   : >> { %v2174_v53 = vsub.s32 0, %v4738_v24  ;;  %v2394_v9 = vshrl.u32 %v5146_v12, %v2391_v61  ;;  %v2397_v0 = vshrl.u32 %v5161_v51, %v2391_v61  ;;  %v2400_v14 = vshrl.u32 %v5148_v25, %v2391_v61 }
 0x151   : >> { %v2403_v8 = vshrl.u32 %v5149_v22, %v2391_v61  ;;  %v4754_v39 = vshrl.u32 %v5100_v32, %v2391_v61  ;;  %v4757_v51 = vshrl.u32 %v2388_v28, 5  ;;  %v2392_v47 = vshrl.u32 %v5095_v42, %v2391_v61 }
 0x152   : >> { %v3157_v2 = vmin.u32 %v2174_v53, %v4738_v24  ;;  %v2395_v10 = vor.u32 %v2394_v9, %v2393_v36  ;;  %v2398_v22 = vor.u32 %v2397_v0, %v2396_v33  ;;  %v2401_v52 = vor.u32 %v2400_v14, %v2399_v23 }
 0x153   : >> { %v2404_v26 = vor.u32 %v2403_v8, %v2402_v5  ;;  %v2407_v56 = vor.u32 %v4754_v39, %v4751_v45  ;;  %vm2408_vm12 = vcmp.lt.s32.totalorder %v4757_v51, 1  ;;  %vm2409_vm13 = vcmp.lt.s32.totalorder %v4757_v51, 2 }
 0x154   : >> { %v2176_v54 = vclz %v3157_v2  ;;  %vm2411_vm6 = vcmp.lt.s32.totalorder %v4757_v51, 4  ;;  %vm2410_vm8 = vcmp.lt.s32.totalorder %v4757_v51, 3  ;;  %v2416_v14 = vsel %vm2408_vm12, %v2395_v10, %v2398_v22 }
 0x155   : >> { %v2417_v4 = vsel %vm2411_vm6, %v2404_v26, 920167782  ;;  %v2421_v35 = vsel %vm2411_vm6, %v2407_v56, 1326507024 }
 0x156   : >> { %v3285_v12 = vpop.eup %3284  ;;  %v3158_v7 = vadd.s32 4294967294, %v2176_v54 }
 0x157   : >> { %v3287_v25 = vpop.eup %3286  ;;  %v1940_v18 = vxor.u32 2147483648, %v3285_v12 }
 0x158   : >> { %v1937_v53 = vxor.u32 2147483648, %v3287_v25  ;;  %vm3159_vm15 = vcmp.lt.s32.totalorder %v3158_v7, 0 }
 0x159   : >> { %v1941_v32 = vsel %vm1939_vm11, %v1940_v18, %v3287_v25  ;;  %v2048_v62 = vsel %vm2046_vm9, %v1940_v18, %v3287_v25  ;;  %v2179_v9 = vsel %vm3159_vm15, 0, %v3158_v7  ;;  %v5170_v18 = vld [vmem:[#allocation20_spill] sm:$0xff] }
 0x15a   : >> { %v1938_v15 = vsel %vm1936_vm10, %v3285_v12, %v1937_v53  ;;  %v2045_v28 = vsel %vm2043_vm5, %v3285_v12, %v1937_v53  ;;  %v2180_v0 = vsub.s32 32, %v2179_v9  ;;  %v2181_v30 = vshll.u32 %v4738_v24, %v2179_v9 }
 0x15b   : >> { %v1942_v42 = vsel %vm1935_vm1, %v1938_v15, %v1941_v32  ;;  %v2049_v61 = vsel %vm2042_vm4, %v2045_v28, %v2048_v62  ;;  %v2184_v29 = vsub.s32 4294967266, %v2179_v9  ;;  %v2413_v62 = vsel %vm2411_vm6, %v2401_v52, 2102212464 }
 0x15c   : >> { %v1943_v41 = vsel %vm1932_vm2, nan, %v1942_v42  ;;  %v2050_v36 = vsel %vm1932_vm2, nan, %v2049_v61  ;;  %v2182_v5 = vshrl.u32 %v2164_v58, %v2180_v0  ;;  %v2418_v24 = vsel %vm2410_vm8, %v2401_v52, %v2417_v4 }
 0x15d   : >> { %v1944_v33 = vmul.f32 %v5165_v13, %v1943_v41  ;;  %v2051_v23 = vsub.f32 1.0, %v2050_v36  ;;  %v2185_v39 = vadd.s32 127, %v2184_v29  ;;  %v2194_v28 = vsub.s32 4, %v4726_v63 }
 0x15e   : >> { %v2183_v12 = vor.u32 %v2182_v5, %v2181_v30 }
 0x15f   : >> { %v1945_v7 = vsel %vm1834_vm3, %v1839_v38, %v1944_v33  ;;  %v2053_v13 = vmul.f32 %v4734_v11, %v2051_v23  ;;  %v2412_v38 = vsel %vm2408_vm12, %v2392_v47, %v2395_v10  ;;  %v2414_v11 = vsel %vm2410_vm8, %v2398_v22, %v2413_v62  ;;  %v5171_v10 = vld [vmem:[#allocation16_spill] sm:$0xff] }
 0x160   : >> { %v2073_v8 = vmul.f32 %v4637_v6, %v1945_v7  ;;  %v2077_v2 = vmul.f32 %v4639_v46, %v1945_v7  ;;  %v2081_v45 = vmul.f32 %v4641_v43, %v1945_v7  ;;  %v2186_v60 = vshll.u32 %v2185_v39, 23 }
 0x161   : >> { %v2054_v1 = vsel %vm1834_vm3, %v1947_v16, %v2053_v13  ;;  %vm2110_vm3 = vcmp.lt.s32.totalorder %v4576_v49, 0  ;;  %v2415_v23 = vsel %vm2409_vm13, %v2412_v38, %v2414_v11 }
 0x162   : >> { %v2074_v58 = vsub.f32 %v4618_v40, %v2073_v8  ;;  %v2075_v6 = vmul.f32 %v2066_v20, %v2054_v1  ;;  %v2078_v46 = vsub.f32 %v4620_v44, %v2077_v2  ;;  %v2079_v43 = vmul.f32 %v2069_v50, %v2054_v1 }
 0x163   : >> { %v2082_v27 = vsub.f32 %v4623_v55, %v2081_v45  ;;  %v2083_v16 = vmul.f32 %v5166_v37, %v2054_v1  ;;  %v5167_v40 = vand.u32 2147483647, %v4576_v49  ;;  %v2419_v44 = vsel %vm2409_vm13, %v2416_v14, %v2418_v24 }
 0x164   : >> { %v4824_v31 = vadd.f32 %v2075_v6, %v2074_v58  ;;  %v4826_v59 = vadd.f32 %v2079_v43, %v2078_v46  ;;  %v2420_v55 = vsel %vm2408_vm12, %v2398_v22, %v2401_v52  ;;  %v2187_v21 = vor.u32 4788187, %v2186_v60  ;;  %v5172_v22 = vld [vmem:[#allocation17_spill] sm:$0xff]  ;;  %v5173_v60 = vld [vmem:[#allocation24_spill] sm:$0xff] }
 0x165   : >> { %vm4818_vm7 = vcmp.le.f32.partialorder %v5167_v40, 0.7853982  ;;  %v4832_v57 = vadd.f32 %v2083_v16, %v2082_v27  ;;  %v2190_v20 = vcvt.s32.f32 %v2183_v12  ;;  %v2422_v50 = vsel %vm2410_vm8, %v2404_v26, %v2421_v35 }
 0x166   : >> { %v2324_v54 = vmul.f32 %v5170_v18, %v4826_v59  ;;  %v2326_v47 = vmul.f32 %v5170_v18, %v4824_v31  ;;  %v2329_v53 = vmul.f32 %v5171_v10, %v4826_v59  ;;  %v2330_v52 = vmul.f32 %v5172_v22, %v4824_v31 }
 0x167   : >> { %v2188_v32 = vand.u32 2147483647, %v2187_v21  ;;  %v2323_v56 = vmul.f32 %v5172_v22, %v4832_v57  ;;  %v2327_v15 = vmul.f32 %v5171_v10, %v4832_v57  ;;  %v2423_v26 = vsel %vm2409_vm13, %v2420_v55, %v2422_v50 }
 0x168   : >> { %v4851_v42 = vsub.f32 %v2329_v53, %v2330_v52  ;;  %v4854_v61 = vmul.u32.u64.low %v4759_v34, %v2423_v26  ;;  %v4855_v41 = vmul.u32.u64.high %v4759_v34, %v2423_v26, %v4854_v61  ;;  %v2431_v5 = vmul.u32 %v4759_v34, %v2415_v23 }
 0x169   : >> { %v2191_v36 = vmul.f32 %v2190_v20, %v2188_v32  ;;  %v4857_v9 = vsub.f32 %v2323_v56, %v2324_v54  ;;  %v4859_v33 = vsub.f32 %v2326_v47, %v2327_v15  ;;  %v2195_v45 = vsel %vm2110_vm3, %v2194_v28, %v4726_v63 }
 0x16a   : >> { %v4865_v0 = vmul.f32 %v4851_v42, %v5172_v22  ;;  %v4869_v30 = vmul.f32 %v4851_v42, %v5171_v10  ;;  %v4872_v29 = vmul.u32.u64.low %v4759_v34, %v2419_v44  ;;  %v4873_v62 = vmul.u32.u64.high %v4759_v34, %v2419_v44, %v4872_v29 }
 0x16b   : >> { %v2192_v14 = vxor.u32 2147483648, %v2191_v36  ;;  %v4877_v4 = vmul.f32 %v4859_v33, %v5170_v18  ;;  %v4881_v51 = vmul.f32 %v4857_v9, %v5170_v18  ;;  %v4885_v7 = vmul.f32 %v4859_v33, %v5171_v10 }
 0x16c   : >> { %v4889_v13 = vmul.f32 %v4857_v9, %v5172_v22  ;;  %vm2433_vm2 = vc.u32 %v4855_v41, %v4872_v29  ;;  %v2434_v1 = vadd.s32 1, %v4873_v62  ;;  %v2197_v38 = vsel %vm4818_vm7, 0, %v2195_v45 }
 0x16d   : >> { %v2193_v24 = vsel %vm2110_vm3, %v2192_v14, %v2191_v36  ;;  %v2334_v8 = vsub.f32 %v4865_v0, %v4877_v4  ;;  %v2337_v2 = vsub.f32 %v4881_v51, %v4869_v30  ;;  %v2201_v6 = vadd.s32 3, %v2197_v38  ;;  %v5174_v0 = vld [vmem:[#allocation4_spill] sm:$0xff]  ;;  %v5175_v30 = vld [vmem:[#allocation6_spill] sm:$0xff] }
 0x16e   : >> { %v2196_v39 = vsel %vm4818_vm7, %v4576_v49, %v2193_v24  ;;  %v2340_v34 = vsub.f32 %v4885_v7, %v4889_v13  ;;  %v2435_v12 = vsel %vm2433_vm2, %v2434_v1, %v4873_v62  ;;  %v2309_v27 = vand.u32 3, %v2197_v38 }
 0x16f   : >> { %3288 = vcosq.f32 %v2196_v39  ;;  %v2436_v11 = vadd.s32 %v2435_v12, %v2431_v5  ;;  %v2202_v43 = vand.u32 3, %v2201_v6  ;;  %v2106_v44 = vmul.f32 0.16666667, %v5173_v60 }
 0x170   : >> { %3290 = vsinq.f32 %v2196_v39  ;;  %vm2314_vm5 = vcmp.eq.s32.totalorder %v2309_v27, 2  ;;  %vm2311_vm9 = vcmp.eq.s32.totalorder %v2309_v27, 0  ;;  %v2214_v20 = vmul.f32 0.041666668, %v5173_v60 }
 0x171   : >> { %v2437_v58 = vadd.s32 536870912, %v2436_v11  ;;  %vm2207_vm4 = vcmp.eq.s32.totalorder %v2202_v43, 2  ;;  %vm2204_vm1 = vcmp.eq.s32.totalorder %v2202_v43, 0  ;;  %vm2203_vm10 = vcmp.lt.s32.totalorder %v2202_v43, 2 }
 0x172   : >> { %vm2310_vm11 = vcmp.lt.s32.totalorder %v2309_v27, 2  ;;  %vm2200_vm12 = vweird.f32 %v4576_v49  ;;  %v2107_v47 = vsub.f32 1.0, %v2106_v44  ;;  %v2320_v32 = vmul.f32 %v4534_v17, %v4534_v17 }
 0x173   : >> { %v4911_v63 = vshrl.u32 %v2437_v58, 30  ;;  %v2215_v26 = vsub.f32 0.5, %v2214_v20  ;;  %v2432_v49 = vadd.s32 %v4872_v29, %v4855_v41 }
 0x175   : >> { %v2439_v46 = vshll.u32 %v4911_v63, 30 }
 0x177   : >> { %v2440_v37 = vsub.s32 %v2436_v11, %v2439_v46 }
 0x179   : >> { %v2442_v16 = vsub.s32 0, %v2440_v37 }
 0x17b   : >> { %v3171_v35 = vmin.u32 %v2442_v16, %v2440_v37 }
 0x17c   : >> { %v3289_v40 = vpop.eup %3288 }
 0x17d   : >> { %v3291_v55 = vpop.eup %3290  ;;  %v2208_v25 = vxor.u32 2147483648, %v3289_v40  ;;  %v2444_v54 = vclz %v3171_v35 }
 0x17e   : >> { %v2205_v21 = vxor.u32 2147483648, %v3291_v55 }
 0x17f   : >> { %v2209_v50 = vsel %vm2207_vm4, %v2208_v25, %v3291_v55  ;;  %v2316_v18 = vsel %vm2314_vm5, %v2208_v25, %v3291_v55  ;;  %v3172_v56 = vadd.s32 4294967294, %v2444_v54  ;;  %v5177_v54 = vand.u32 2147483647, %v4682_v48 }
 0x180   : >> { %v2206_v10 = vsel %vm2204_vm1, %v3289_v40, %v2205_v21  ;;  %v2313_v53 = vsel %vm2311_vm9, %v3289_v40, %v2205_v21  ;;  %vm2468_vm5 = vweird.f32 %v4682_v48 }
 0x181   : >> { %v2210_v22 = vsel %vm2203_vm10, %v2206_v10, %v2209_v50  ;;  %v2317_v52 = vsel %vm2310_vm11, %v2313_v53, %v2316_v18  ;;  %vm3173_vm13 = vcmp.lt.s32.totalorder %v3172_v56, 0  ;;  %v2462_v50 = vsub.s32 4, %v4911_v63 }
 0x182   : >> { %v2211_v15 = vsel %vm2200_vm12, nan, %v2210_v22  ;;  %v2318_v28 = vsel %vm2200_vm12, nan, %v2317_v52  ;;  %v2447_v23 = vsel %vm3173_vm13, 0, %v3172_v56  ;;  %vm2377_vm15 = vcmp.le.f32.partialorder %v5177_v54, 0.7853982 }
 0x183   : >> { %v2212_v61 = vmul.f32 %v4534_v17, %v2211_v15  ;;  %v2319_v36 = vsub.f32 1.0, %v2318_v28  ;;  %v2448_v7 = vsub.s32 32, %v2447_v23  ;;  %v2449_v13 = vshll.u32 %v2440_v37, %v2447_v23 }
 0x184   : >> { %v2452_v39 = vsub.s32 4294967266, %v2447_v23  ;;  %v2374_v23 = vmul.f32 0.16666667, %v4470_v3 }
 0x185   : >> { %v2213_v62 = vsel %vm2102_vm14, %v2107_v47, %v2212_v61  ;;  %v2321_v14 = vmul.f32 %v2320_v32, %v2319_v36  ;;  %v2450_v1 = vshrl.u32 %v2432_v49, %v2448_v7  ;;  %v2482_v7 = vmul.f32 0.041666668, %v4470_v3 }
 0x186   : >> { %v2341_v5 = vmul.f32 %v4857_v9, %v2213_v62  ;;  %v2345_v24 = vmul.f32 %v4859_v33, %v2213_v62  ;;  %v2349_v45 = vmul.f32 %v4851_v42, %v2213_v62  ;;  %v2453_v11 = vadd.s32 127, %v2452_v39 }
 0x187   : >> { %v2322_v17 = vsel %vm2102_vm14, %v2215_v26, %v2321_v14  ;;  %v2451_v38 = vor.u32 %v2450_v1, %v2449_v13  ;;  %vm2378_vm14 = vcmp.lt.s32.totalorder %v4682_v48, 0  ;;  %v2588_v1 = vmul.f32 %v4651_v19, %v4651_v19 }
 0x188   : >> { %v2342_v41 = vsub.f32 %v4824_v31, %v2341_v5  ;;  %v2343_v29 = vmul.f32 %v2334_v8, %v2322_v17  ;;  %v2346_v12 = vsub.f32 %v4826_v59, %v2345_v24  ;;  %v2347_v9 = vmul.f32 %v2337_v2, %v2322_v17 }
 0x189   : >> { %v2350_v33 = vsub.f32 %v4832_v57, %v2349_v45  ;;  %v2351_v42 = vmul.f32 %v2340_v34, %v2322_v17  ;;  %v2454_v46 = vshll.u32 %v2453_v11, 23  ;;  %v5176_v57 = vld [vmem:[#allocation5_spill] sm:$0xff]  ;;  %v2458_v34 = vcvt.s32.f32 %v2451_v38 }
 0x18a   : >> { %v4937_v58 = vadd.f32 %v2343_v29, %v2342_v41  ;;  %v4939_v6 = vadd.f32 %v2347_v9, %v2346_v12  ;;  %v2463_v32 = vsel %vm2378_vm14, %v2462_v50, %v4911_v63  ;;  %v2375_v45 = vsub.f32 1.0, %v2374_v23 }
 0x18b   : >> { %v4941_v31 = vadd.f32 %v2351_v42, %v2350_v33  ;;  %v2455_v2 = vor.u32 4788187, %v2454_v46  ;;  %v2465_v15 = vsel %vm2377_vm15, 0, %v2463_v32  ;;  %v2483_v9 = vsub.f32 0.5, %v2482_v7 }
 0x18c   : >> { %v2592_v4 = vmul.f32 %v5174_v0, %v4939_v6  ;;  %v2594_v59 = vmul.f32 %v5174_v0, %v4937_v58  ;;  %v2597_v51 = vmul.f32 %v5175_v30, %v4939_v6  ;;  %v2598_v8 = vmul.f32 %v5176_v57, %v4937_v58 }
 0x18d   : >> { %v2591_v43 = vmul.f32 %v5176_v57, %v4941_v31  ;;  %v2595_v27 = vmul.f32 %v5175_v30, %v4941_v31  ;;  %v2456_v16 = vand.u32 2147483647, %v2455_v2  ;;  %v2469_v26 = vadd.s32 3, %v2465_v15 }
 0x18e   : >> { %v2599_v37 = vsub.f32 %v2597_v51, %v2598_v8  ;;  %v2577_v61 = vand.u32 3, %v2465_v15 }
 0x18f   : >> { %v2593_v40 = vsub.f32 %v2591_v43, %v2592_v4  ;;  %v2596_v60 = vsub.f32 %v2594_v59, %v2595_v27  ;;  %v2459_v25 = vmul.f32 %v2458_v34, %v2456_v16  ;;  %v2470_v28 = vand.u32 3, %v2469_v26 }
 0x190   : >> { %v2600_v44 = vmul.f32 %v2599_v37, %v5176_v57  ;;  %v2604_v55 = vmul.f32 %v2599_v37, %v5175_v30  ;;  %vm2582_vm8 = vcmp.eq.s32.totalorder %v2577_v61, 2  ;;  %vm2579_vm7 = vcmp.eq.s32.totalorder %v2577_v61, 0 }
 0x191   : >> { %v2601_v35 = vmul.f32 %v2596_v60, %v5174_v0  ;;  %v2603_v21 = vmul.f32 %v2593_v40, %v5174_v0  ;;  %v2606_v20 = vmul.f32 %v2596_v60, %v5175_v30  ;;  %v2607_v18 = vmul.f32 %v2593_v40, %v5176_v57 }
 0x192   : >> { %v2460_v47 = vxor.u32 2147483648, %v2459_v25  ;;  %vm2475_vm6 = vcmp.eq.s32.totalorder %v2470_v28, 2  ;;  %vm2472_vm3 = vcmp.eq.s32.totalorder %v2470_v28, 0  ;;  %vm2471_vm2 = vcmp.lt.s32.totalorder %v2470_v28, 2 }
 0x193   : >> { %v2602_v10 = vsub.f32 %v2600_v44, %v2601_v35  ;;  %v2605_v53 = vsub.f32 %v2603_v21, %v2604_v55  ;;  %v2608_v22 = vsub.f32 %v2606_v20, %v2607_v18  ;;  %vm2578_vm4 = vcmp.lt.s32.totalorder %v2577_v61, 2 }
 0x194   : >> { %v2461_v52 = vsel %vm2378_vm14, %v2460_v47, %v2459_v25 }
 0x195   : >> { %v2464_v56 = vsel %vm2377_vm15, %v4682_v48, %v2461_v52  ;;  %v3184_v52 = vld [vmem:[%s3688_s29 + $0x450] sm:$0xff] }
 0x196   : >> { %3292 = vcosq.f32 %v2464_v56 }
 0x197   : >> { %3294 = vsinq.f32 %v2464_v56 }
 0x1a3   : >> { %v3293_v36 = vpop.eup %3292 }
 0x1a4   : >> { %v3295_v49 = vpop.eup %3294  ;;  %v2476_v62 = vxor.u32 2147483648, %v3293_v36 }
 0x1a5   : >> { %v2473_v14 = vxor.u32 2147483648, %v3295_v49 }
 0x1a6   : >> { %v2477_v63 = vsel %vm2475_vm6, %v2476_v62, %v3295_v49  ;;  %v2584_v13 = vsel %vm2582_vm8, %v2476_v62, %v3295_v49 }
 0x1a7   : >> { %v2474_v5 = vsel %vm2472_vm3, %v3293_v36, %v2473_v14  ;;  %v2581_v24 = vsel %vm2579_vm7, %v3293_v36, %v2473_v14 }
 0x1a8   : >> { %v2478_v39 = vsel %vm2471_vm2, %v2474_v5, %v2477_v63  ;;  %v2585_v17 = vsel %vm2578_vm4, %v2581_v24, %v2584_v13 }
 0x1a9   : >> { %v2479_v41 = vsel %vm2468_vm5, nan, %v2478_v39  ;;  %v2586_v29 = vsel %vm2468_vm5, nan, %v2585_v17 }
 0x1aa   : >> { %v2480_v12 = vmul.f32 %v4651_v19, %v2479_v41  ;;  %v2587_v33 = vsub.f32 1.0, %v2586_v29 }
 0x1ac   : >> { %v2481_v48 = vsel %vm2370_vm0, %v2375_v45, %v2480_v12  ;;  %v2589_v42 = vmul.f32 %v2588_v1, %v2587_v33 }
 0x1ad   : >> { %v2609_v38 = vmul.f32 %v2593_v40, %v2481_v48  ;;  %v2613_v11 = vmul.f32 %v2596_v60, %v2481_v48  ;;  %v2617_v46 = vmul.f32 %v2599_v37, %v2481_v48 }
 0x1ae   : >> { %v2590_v0 = vsel %vm2370_vm0, %v2483_v9, %v2589_v42 }
 0x1af   : >> { %v2610_v4 = vsub.f32 %v4937_v58, %v2609_v38  ;;  %v2611_v59 = vmul.f32 %v2602_v10, %v2590_v0  ;;  %v2614_v30 = vsub.f32 %v4939_v6, %v2613_v11  ;;  %v2615_v51 = vmul.f32 %v2605_v53, %v2590_v0 }
 0x1b0   : >> { %v2618_v19 = vsub.f32 %v4941_v31, %v2617_v46  ;;  %v2619_v57 = vmul.f32 %v2608_v22, %v2590_v0  ;;  %v3182_v22 = vld [vmem:[%s3688_s29 + $0x440] sm:$0xff] }
 0x1b1   : >> { %v2612_v8 = vadd.f32 %v2611_v59, %v2610_v4  ;;  %v2616_v2 = vadd.f32 %v2615_v51, %v2614_v30 }
 0x1b2   : >> { %v2620_v34 = vadd.f32 %v2619_v57, %v2618_v19 }
 0x1b3   : >> { %v3178_v43 = vadd.f32 -0.01, %v2612_v8  ;;  %v3179_v27 = vadd.f32 -0.02, %v2616_v2 }
 0x1b4   : >> { %v3180_v16 = vadd.f32 0.005, %v2620_v34 }
 0x1b5   : >> { %v2624_v40 = vmul.f32 496.64676, %v3178_v43  ;;  %v2625_v37 = vmul.f32 8.500004, %v3179_v27  ;;  %v2629_v60 = vmul.f32 -17.373943, %v3178_v43 }
 0x1b6   : >> { %v2627_v3 = vmul.f32 325.06882, %v3180_v16  ;;  %v2630_v44 = vmul.f32 494.84018, %v3179_v27  ;;  %v2632_v58 = vmul.f32 249.86267, %v3180_v16 }
 0x1b7   : >> { %v2626_v55 = vadd.f32 %v2625_v37, %v2624_v40  ;;  %v2634_v6 = vmul.f32 -0.009697693, %v3178_v43  ;;  %v2635_v25 = vmul.f32 -0.02014532, %v3179_v27  ;;  %v2637_v31 = vmul.f32 0.99975, %v3180_v16 }
 0x1b8   : >> { %v2631_v35 = vadd.f32 %v2630_v44, %v2629_v60 }
 0x1b9   : >> { %v2628_v21 = vadd.f32 %v2627_v3, %v2626_v55  ;;  %v2636_v20 = vadd.f32 %v2635_v25, %v2634_v6 }
 0x1ba   : >> { %v2633_v50 = vadd.f32 %v2632_v58, %v2631_v35 }
 0x1bb   : >> { %v2638_v18 = vadd.f32 %v2637_v31, %v2636_v20 }
 0x1bd   : >> { %3296 = vrcp.f32 %v2638_v18 }
 0x1ca   : >> { %v3297_v54 = vpop.eup %3296 }
 0x1cb   : >> { %v2640_v47 = vmul.f32 %v3297_v54, %v2638_v18 }
 0x1cd   : >> { %v2641_v10 = vsub.f32 2.0, %v2640_v47 }
 0x1cf   : >> { %v2642_v53 = vmul.f32 %v3297_v54, %v2641_v10 }
 0x1d1   : >> { %v2643_v32 = vmul.f32 %v2642_v53, %v2628_v21  ;;  %v2650_v56 = vmul.f32 %v2642_v53, %v2633_v50  ;;  %709 = sbr.rel (!%p707_p10) target bundleno = 98 (0x62), region = 214 }
 0x1d3   : >> { %v2647_v15 = vsub.f32 %v2643_v32, %v3182_v22  ;;  %v2654_v26 = vsub.f32 %v2650_v56, %v3184_v52 }
 0x1d5   : >> { %2649 = vst [vmem:[%s2648_s30] sm:$0xff] %v2647_v15  ;;  %3186 = vst [vmem:[%s2648_s30 + $0x10] sm:$0xff] %v2654_v26 }
 0x1d6   : > { %2663 = sbr.rel (!%p3376_p5) target bundleno = 479 (0x1df), region = 73  ;;  %s3193_s2 = sshll.u32 (%p3376_p5), %s2987_s9, 4 }
 0x1d7   : > { %s2666_s5 = scalar_lea.vmem (%p3376_p5), %s5010_s1, %s3193_s2 }
 0x1dc   : > { %v2701_v28 = vld [vmem:[%s3676_s26] sm:$0xff]  ;;  %v2703_v61 = vld [vmem:[%s3676_s26 + $0x8] sm:$0xff]  ;;  %v2705_v36 = vld [vmem:[%s3676_s26 + $0x10] sm:$0xff] }
 0x1dd   : > { %v2707_v49 = vld [vmem:[%s3676_s26 + $0x18] sm:$0xff]  ;;  %2702 = vst [vmem:[%s2666_s5] sm:$0xff] %v2701_v28  ;;  %2704 = vst [vmem:[%s2666_s5 + $0x8] sm:$0xff] %v2703_v61 }
 0x1de   : > { %2706 = vst [vmem:[%s2666_s5 + $0x20] sm:$0xff] %v2705_v36  ;;  %2708 = vst [vmem:[%s2666_s5 + $0x28] sm:$0xff] %v2707_v49 }
 0x1df PF: > { %p8_p11 = scmp.ge.s32.totalorder %s3363_s10, 4   ;;  %s5178_s6 = smov %s3320_s7 }
 0x1e0   : > { %s5179_s7 = smov %s3374_s13  ;;  %s5180_s8 = smov %s3363_s10 }
 0x1e1   :  { %10 = sbr.rel (!%p8_p11) target bundleno = 2 (0x2), region = 225 }

</bundles_post_ra>
